<compile_context>
chip_gen: v6e
topology: v6e:2x2x1
jax: 0.10.0
libtpu: 0.0.40
codegen_flags: <defaults>
</compile_context>

<pallas_src>
import numpy as np

import jax
import jax.numpy as jnp
from jax import lax
from jax.experimental import pallas as pl
from jax.experimental.pallas import tpu as pltpu

OBS_SIZE = 21
OBS_WIDTH = 2
INPUT_SIZE = OBS_SIZE * OBS_WIDTH * 2          # 84
IN_PAD = 128                                   # input features padded to lane width
HIDDEN = 256
HEAD_NAMES = ["throttle", "steer", "pitch", "yaw", "roll",
              "jump", "boost", "drift", "on_ground"]
HEAD_SIZES = [3, 3, 3, 3, 3, 2, 2, 2, 2]
HEAD_OFFSETS = [int(v) for v in np.cumsum([0] + HEAD_SIZES)[:-1]]   # [0,3,...,21]
N_HEADS = len(HEAD_SIZES)
TOTAL_OUT = sum(HEAD_SIZES)                    # 23
OUT_PAD = 128                                  # lane-dense output slab
CAT_HIDDEN = N_HEADS * HIDDEN                  # 2304
# heads span at most 3 contiguous lanes -> lane neighbours at distance +-1, +-2
SHIFTS = (1, 2, OUT_PAD - 2, OUT_PAD - 1)


def _round_up(x, m):
    return ((x + m - 1) // m) * m


# ---------------------------------------------------------------------------
# Fused Pallas kernel: trunk (4x Linear+ReLU) + all 9 heads + log_softmax
# ---------------------------------------------------------------------------
def fused_kernel(x_ref, w0, b0, w1, b1, w2, b2, w3, b3,
                 hw1, hb1, hw2, hb2, hid_ref, o_ref):
    # ---- trunk: 4x (Linear + ReLU); bf16 MXU inputs, f32 accumulate/elementwise
    h = x_ref[...]                                                    # (tb, 128) bf16
    for w, b in ((w0, b0), (w1, b1), (w2, b2), (w3, b3)):
        z = jnp.dot(h, w[...], preferred_element_type=jnp.float32)
        h = jnp.maximum(z + b[...], 0.0).astype(jnp.bfloat16)         # (tb, 256) bf16

    # ---- all 9 head hidden layers as ONE wide matmul (256 x 2304); keep bf16
    z1 = jnp.dot(h, hw1[...], preferred_element_type=jnp.float32)
    h1 = jnp.maximum(z1 + hb1[...], 0.0).astype(jnp.bfloat16)         # (tb, 2304) bf16

    # ---- all logits via block-diagonal packed W2 (2304 x 128, lane-dense)
    logits = jnp.dot(h1, hw2[...], preferred_element_type=jnp.float32) + hb2[...]

    # ---- per-head log_softmax via roll-based segmented max / sum.
    # hid[l] = head index of lane l (padding lanes carry unique ids so they only
    # ever match themselves).  The same-head masks are built with the exact same
    # roll as the data, so the result is independent of the roll sign convention.
    hid = jnp.broadcast_to(hid_ref[...], logits.shape)                # (tb, 128) f32
    same = []
    mx = logits                                                       # per-head max
    for s in SHIFTS:
        sm = pltpu.roll(hid, shift=s, axis=1) == hid
        same.append(sm)
        mx = jnp.where(sm, jnp.maximum(mx, pltpu.roll(logits, shift=s, axis=1)), mx)
    shifted = logits - mx
    es = jnp.exp(shifted)
    den = es                                                          # per-head sum
    for s, sm in zip(SHIFTS, same):
        den = den + jnp.where(sm, pltpu.roll(es, shift=s, axis=1), 0.0)
    # padding lanes see only themselves (logit 0, denom 1) -> output exactly 0
    o_ref[...] = shifted - jnp.log(den)


# ---------------------------------------------------------------------------
# Parameter init (deterministic, PyTorch-Linear-style) and packing
# ---------------------------------------------------------------------------
def init_linear(key, fan_in, fan_out):
    kw, kb = jax.random.split(key)
    bound = 1.0 / jnp.sqrt(fan_in)
    w = jax.random.uniform(kw, (fan_in, fan_out), jnp.float32, -bound, bound)
    b = jax.random.uniform(kb, (1, fan_out), jnp.float32, -bound, bound)
    return w, b


def init_params(key):
    keys = jax.random.split(key, 4 + 2 * N_HEADS)
    trunk = [
        init_linear(keys[0], INPUT_SIZE, HIDDEN),
        init_linear(keys[1], HIDDEN, HIDDEN),
        init_linear(keys[2], HIDDEN, HIDDEN),
        init_linear(keys[3], HIDDEN, HIDDEN),
    ]
    heads = []
    for i in range(N_HEADS):
        w1, b1 = init_linear(keys[4 + 2 * i], HIDDEN, HIDDEN)
        w2, b2 = init_linear(keys[5 + 2 * i], HIDDEN, HEAD_SIZES[i])
        heads.append((w1, b1, w2, b2))
    return trunk, heads


def pack_params(trunk_f32, heads_f32):
    """Pad / concatenate / block-diagonalize; weights -> bf16, biases stay f32."""
    # trunk: zero-pad first layer's input rows 84 -> 128
    (w0, b0) = trunk_f32[0]
    w0p = jnp.zeros((IN_PAD, HIDDEN), jnp.float32).at[:INPUT_SIZE].set(w0)
    trunk_w = [w0p.astype(jnp.bfloat16)] + [w.astype(jnp.bfloat16)
                                            for w, _ in trunk_f32[1:]]
    trunk_b = [b0] + [b for _, b in trunk_f32[1:]]

    # heads: concatenate W1 -> (256, 2304), b1 -> (1, 2304)
    hw1 = jnp.concatenate([w1 for (w1, _, _, _) in heads_f32], axis=1).astype(jnp.bfloat16)
    hb1 = jnp.concatenate([b1 for (_, b1, _, _) in heads_f32], axis=1)

    # heads: block-diagonal W2 -> (2304, 128), packed bias -> (1, 128)
    hw2 = jnp.zeros((CAT_HIDDEN, OUT_PAD), jnp.float32)
    hb2 = jnp.zeros((1, OUT_PAD), jnp.float32)
    for h, (_, _, w2, b2) in enumerate(heads_f32):
        off, n = HEAD_OFFSETS[h], HEAD_SIZES[h]
        hw2 = hw2.at[h * HIDDEN:(h + 1) * HIDDEN, off:off + n].set(w2)
        hb2 = hb2.at[0, off:off + n].set(b2[0])
    hw2 = hw2.astype(jnp.bfloat16)

    # lane -> head-id map; padding lanes get unique ids (only match themselves)
    hid = np.arange(OUT_PAD, dtype=np.float32) + 100.0
    for h in range(N_HEADS):
        off, n = HEAD_OFFSETS[h], HEAD_SIZES[h]
        hid[off:off + n] = float(h)
    hid = jnp.asarray(hid.reshape(1, OUT_PAD))

    return (trunk_w, trunk_b, hw1, hb1, hw2, hb2, hid)


# ---------------------------------------------------------------------------
# Forward pass (matches FullyConnected.forward) — ONE pallas_call
# ---------------------------------------------------------------------------
def _choose_tb(b):
    """Batch tile: multiple of 16 (bf16 sublanes), <= 512 (VMEM headroom),
    trading zero-row padding against ~0.35us (~128 rows) per-grid-step cost."""
    best_tb, best_cost = 16, None
    for tb in (512, 256, 128, 64, 32, 16):
        bp = _round_up(b, tb)
        cost = (bp - b) + 128 * (bp // tb)
        if best_cost is None or cost < best_cost:
            best_tb, best_cost = tb, cost
    # split into >= 2 grid steps when there is enough work so both of v7x's
    # TensorCores participate (harmless on single-TC v5e/v6e)
    if _round_up(b, best_tb) // best_tb == 1 and best_tb >= 64:
        best_tb //= 2
    return best_tb


@jax.jit
def fully_connected_forward(seq, packed):
    trunk_w, trunk_b, hw1, hb1, hw2, hb2, hid = packed

    x = seq.reshape(-1, INPUT_SIZE)                        # seq.view(-1, input_size)
    b = x.shape[0]
    tb = _choose_tb(b)
    bp = _round_up(b, tb)

    # single fused pad: features 84 -> 128, rows b -> bp, already bf16
    xp = lax.pad(x.astype(jnp.bfloat16), jnp.zeros((), jnp.bfloat16),
                 ((0, bp - b, 0), (0, IN_PAD - INPUT_SIZE, 0)))

    weight_args = []
    for w, bias in zip(trunk_w, trunk_b):
        weight_args += [w, bias]
    weight_args += [hw1, hb1, hw2, hb2, hid]

    def resident(arr):
        nd = arr.ndim
        # constant index_map -> block stays VMEM-resident across the batch grid
        return pl.BlockSpec(arr.shape, lambda i, _nd=nd: (0,) * _nd)

    in_specs = ([pl.BlockSpec((tb, IN_PAD), lambda i: (i, 0))]
                + [resident(a) for a in weight_args])
    out_spec = pl.BlockSpec((tb, OUT_PAD), lambda i: (i, 0))

    slab = pl.pallas_call(
        fused_kernel,
        out_shape=jax.ShapeDtypeStruct((bp, OUT_PAD), jnp.float32),
        grid_spec=pltpu.PrefetchScalarGridSpec(
            num_scalar_prefetch=0,
            grid=(bp // tb,),
            in_specs=in_specs,
            out_specs=out_spec,
        ),
        compiler_params=pltpu.CompilerParams(
            dimension_semantics=("parallel",),      # batch axis split across TCs
            vmem_limit_bytes=40 * 1024 * 1024,      # headroom for tb=512 (v5e default is 16 MiB)
        ),
    )(xp, *weight_args)

    outs = tuple(slab[:b, HEAD_OFFSETS[h]:HEAD_OFFSETS[h] + HEAD_SIZES[h]]
                 for h in range(N_HEADS))
    return outs


# ---------------------------------------------------------------------------
# Pure-JAX reference (same bf16-input / f32-accumulate numerics as the kernel)
# ---------------------------------------------------------------------------
def reference_forward(seq, trunk_f32, heads_f32):
    x = seq.reshape(-1, INPUT_SIZE).astype(jnp.float32)
    h = x
    for w, b in trunk_f32:
        z = jnp.dot(h.astype(jnp.bfloat16), w.astype(jnp.bfloat16),
                    preferred_element_type=jnp.float32)
        h = jnp.maximum(z + b, 0.0)
    outs = []
    for w1, b1, w2, b2 in heads_f32:
        z1 = jnp.dot(h.astype(jnp.bfloat16), w1.astype(jnp.bfloat16),
                     preferred_element_type=jnp.float32)
        hh = jnp.maximum(z1 + b1, 0.0)
        logits = jnp.dot(hh.astype(jnp.bfloat16), w2.astype(jnp.bfloat16),
                         preferred_element_type=jnp.float32) + b2
        outs.append(jax.nn.log_softmax(logits, axis=1))
    return tuple(outs)


if __name__ == "__main__":
    key = jax.random.PRNGKey(0)
    k_param, k_x = jax.random.split(key)
    trunk_f32, heads_f32 = init_params(k_param)
    packed = pack_params(trunk_f32, heads_f32)

    # batch=2 exercises the single-step grid; batch=40 exercises grid>1 + padding
    for batch in (2, 40):
        k_b = jax.random.fold_in(k_x, batch)
        # input matching seq.view(-1, 84): (batch, obs_size, obs_width, 2)
        seq = jax.random.normal(k_b, (batch, OBS_SIZE, OBS_WIDTH, 2), jnp.float32)

        outs = jax.block_until_ready(fully_connected_forward(seq, packed))
        refs = reference_forward(seq, trunk_f32, heads_f32)
        for name, o, r in zip(HEAD_NAMES, outs, refs):
            assert o.shape == r.shape, (name, o.shape, r.shape)
            err = float(jnp.max(jnp.abs(o - r)))
            assert err < 1e-2, (batch, name, err)   # tolerance reflects bf16 matmul inputs

    print("KERNEL_OK")
</pallas_src>

<mosaic_0001>
module attributes {stable_mosaic.version = 11 : i64} {
  func.func @fused_kernel(%arg0: i32, %arg1: memref<16x128xbf16, #tpu.memory_space<vmem>>, %arg2: memref<128x256xbf16, #tpu.memory_space<vmem>>, %arg3: memref<1x256xf32, #tpu.memory_space<vmem>>, %arg4: memref<256x256xbf16, #tpu.memory_space<vmem>>, %arg5: memref<1x256xf32, #tpu.memory_space<vmem>>, %arg6: memref<256x256xbf16, #tpu.memory_space<vmem>>, %arg7: memref<1x256xf32, #tpu.memory_space<vmem>>, %arg8: memref<256x256xbf16, #tpu.memory_space<vmem>>, %arg9: memref<1x256xf32, #tpu.memory_space<vmem>>, %arg10: memref<256x2304xbf16, #tpu.memory_space<vmem>>, %arg11: memref<1x2304xf32, #tpu.memory_space<vmem>>, %arg12: memref<2304x128xbf16, #tpu.memory_space<vmem>>, %arg13: memref<1x128xf32, #tpu.memory_space<vmem>>, %arg14: memref<1x128xf32, #tpu.memory_space<vmem>>, %arg15: memref<16x128xf32, #tpu.memory_space<vmem>>) attributes {dimension_semantics = [#tpu.dimension_semantics<parallel>], iteration_bounds = array<i64: 1>, scalar_prefetch = 0 : i64, scratch_operands = 0 : i64, tpu.core_type = #tpu.core_type<tc>, window_params = [{transform_indices = @transform_0, window_bounds = array<i64: 16, 128>}, {pipeline_mode = #tpu.pipeline_mode<synchronous>, transform_indices = @transform_1, window_bounds = array<i64: 128, 256>}, {pipeline_mode = #tpu.pipeline_mode<synchronous>, transform_indices = @transform_2, window_bounds = array<i64: 1, 256>}, {pipeline_mode = #tpu.pipeline_mode<synchronous>, transform_indices = @transform_3, window_bounds = array<i64: 256, 256>}, {pipeline_mode = #tpu.pipeline_mode<synchronous>, transform_indices = @transform_4, window_bounds = array<i64: 1, 256>}, {pipeline_mode = #tpu.pipeline_mode<synchronous>, transform_indices = @transform_5, window_bounds = array<i64: 256, 256>}, {pipeline_mode = #tpu.pipeline_mode<synchronous>, transform_indices = @transform_6, window_bounds = array<i64: 1, 256>}, {pipeline_mode = #tpu.pipeline_mode<synchronous>, transform_indices = @transform_7, window_bounds = array<i64: 256, 256>}, {pipeline_mode = #tpu.pipeline_mode<synchronous>, transform_indices = @transform_8, window_bounds = array<i64: 1, 256>}, {pipeline_mode = #tpu.pipeline_mode<synchronous>, transform_indices = @transform_9, window_bounds = array<i64: 256, 2304>}, {pipeline_mode = #tpu.pipeline_mode<synchronous>, transform_indices = @transform_10, window_bounds = array<i64: 1, 2304>}, {pipeline_mode = #tpu.pipeline_mode<synchronous>, transform_indices = @transform_11, window_bounds = array<i64: 2304, 128>}, {pipeline_mode = #tpu.pipeline_mode<synchronous>, transform_indices = @transform_12, window_bounds = array<i64: 1, 128>}, {pipeline_mode = #tpu.pipeline_mode<synchronous>, transform_indices = @transform_13, window_bounds = array<i64: 1, 128>}, {transform_indices = @transform_14, window_bounds = array<i64: 16, 128>}]} {
    %c0 = arith.constant 0 : index
    %c0_0 = arith.constant 0 : index
    %0 = vector.load %arg1[%c0, %c0_0] : memref<16x128xbf16, #tpu.memory_space<vmem>>, vector<16x128xbf16>
    %c0_1 = arith.constant 0 : index
    %c0_2 = arith.constant 0 : index
    %1 = vector.load %arg2[%c0_1, %c0_2] : memref<128x256xbf16, #tpu.memory_space<vmem>>, vector<128x256xbf16>
    %cst = arith.constant dense<0.000000e+00> : vector<16x256xf32>
    %2 = tpu.matmul %0, %1, %cst {dimension_numbers = #tpu.dot_dimension_numbers<[1], [0], [0], [1], [0, 0, 1, 1], [], []>} : vector<16x128xbf16>, vector<128x256xbf16>, vector<16x256xf32> -> vector<16x256xf32>
    %c0_3 = arith.constant 0 : index
    %c0_4 = arith.constant 0 : index
    %3 = vector.load %arg3[%c0_3, %c0_4] : memref<1x256xf32, #tpu.memory_space<vmem>>, vector<1x256xf32>
    %4 = vector.broadcast %3 : vector<1x256xf32> to vector<16x256xf32>
    %5 = arith.addf %2, %4 : vector<16x256xf32>
    %cst_5 = arith.constant 0.000000e+00 : f32
    %6 = vector.broadcast %cst_5 : f32 to vector<16x256xf32>
    %7 = arith.maximumf %5, %6 : vector<16x256xf32>
    %8 = arith.truncf %7 : vector<16x256xf32> to vector<16x256xbf16>
    %c0_6 = arith.constant 0 : index
    %c0_7 = arith.constant 0 : index
    %9 = vector.load %arg4[%c0_6, %c0_7] : memref<256x256xbf16, #tpu.memory_space<vmem>>, vector<256x256xbf16>
    %cst_8 = arith.constant dense<0.000000e+00> : vector<16x256xf32>
    %10 = tpu.matmul %8, %9, %cst_8 {dimension_numbers = #tpu.dot_dimension_numbers<[1], [0], [0], [1], [0, 0, 1, 1], [], []>} : vector<16x256xbf16>, vector<256x256xbf16>, vector<16x256xf32> -> vector<16x256xf32>
    %c0_9 = arith.constant 0 : index
    %c0_10 = arith.constant 0 : index
    %11 = vector.load %arg5[%c0_9, %c0_10] : memref<1x256xf32, #tpu.memory_space<vmem>>, vector<1x256xf32>
    %12 = vector.broadcast %11 : vector<1x256xf32> to vector<16x256xf32>
    %13 = arith.addf %10, %12 : vector<16x256xf32>
    %cst_11 = arith.constant 0.000000e+00 : f32
    %14 = vector.broadcast %cst_11 : f32 to vector<16x256xf32>
    %15 = arith.maximumf %13, %14 : vector<16x256xf32>
    %16 = arith.truncf %15 : vector<16x256xf32> to vector<16x256xbf16>
    %c0_12 = arith.constant 0 : index
    %c0_13 = arith.constant 0 : index
    %17 = vector.load %arg6[%c0_12, %c0_13] : memref<256x256xbf16, #tpu.memory_space<vmem>>, vector<256x256xbf16>
    %cst_14 = arith.constant dense<0.000000e+00> : vector<16x256xf32>
    %18 = tpu.matmul %16, %17, %cst_14 {dimension_numbers = #tpu.dot_dimension_numbers<[1], [0], [0], [1], [0, 0, 1, 1], [], []>} : vector<16x256xbf16>, vector<256x256xbf16>, vector<16x256xf32> -> vector<16x256xf32>
    %c0_15 = arith.constant 0 : index
    %c0_16 = arith.constant 0 : index
    %19 = vector.load %arg7[%c0_15, %c0_16] : memref<1x256xf32, #tpu.memory_space<vmem>>, vector<1x256xf32>
    %20 = vector.broadcast %19 : vector<1x256xf32> to vector<16x256xf32>
    %21 = arith.addf %18, %20 : vector<16x256xf32>
    %cst_17 = arith.constant 0.000000e+00 : f32
    %22 = vector.broadcast %cst_17 : f32 to vector<16x256xf32>
    %23 = arith.maximumf %21, %22 : vector<16x256xf32>
    %24 = arith.truncf %23 : vector<16x256xf32> to vector<16x256xbf16>
    %c0_18 = arith.constant 0 : index
    %c0_19 = arith.constant 0 : index
    %25 = vector.load %arg8[%c0_18, %c0_19] : memref<256x256xbf16, #tpu.memory_space<vmem>>, vector<256x256xbf16>
    %cst_20 = arith.constant dense<0.000000e+00> : vector<16x256xf32>
    %26 = tpu.matmul %24, %25, %cst_20 {dimension_numbers = #tpu.dot_dimension_numbers<[1], [0], [0], [1], [0, 0, 1, 1], [], []>} : vector<16x256xbf16>, vector<256x256xbf16>, vector<16x256xf32> -> vector<16x256xf32>
    %c0_21 = arith.constant 0 : index
    %c0_22 = arith.constant 0 : index
    %27 = vector.load %arg9[%c0_21, %c0_22] : memref<1x256xf32, #tpu.memory_space<vmem>>, vector<1x256xf32>
    %28 = vector.broadcast %27 : vector<1x256xf32> to vector<16x256xf32>
    %29 = arith.addf %26, %28 : vector<16x256xf32>
    %cst_23 = arith.constant 0.000000e+00 : f32
    %30 = vector.broadcast %cst_23 : f32 to vector<16x256xf32>
    %31 = arith.maximumf %29, %30 : vector<16x256xf32>
    %32 = arith.truncf %31 : vector<16x256xf32> to vector<16x256xbf16>
    %c0_24 = arith.constant 0 : index
    %c0_25 = arith.constant 0 : index
    %33 = vector.load %arg10[%c0_24, %c0_25] : memref<256x2304xbf16, #tpu.memory_space<vmem>>, vector<256x2304xbf16>
    %cst_26 = arith.constant dense<0.000000e+00> : vector<16x2304xf32>
    %34 = tpu.matmul %32, %33, %cst_26 {dimension_numbers = #tpu.dot_dimension_numbers<[1], [0], [0], [1], [0, 0, 1, 1], [], []>} : vector<16x256xbf16>, vector<256x2304xbf16>, vector<16x2304xf32> -> vector<16x2304xf32>
    %c0_27 = arith.constant 0 : index
    %c0_28 = arith.constant 0 : index
    %35 = vector.load %arg11[%c0_27, %c0_28] : memref<1x2304xf32, #tpu.memory_space<vmem>>, vector<1x2304xf32>
    %36 = vector.broadcast %35 : vector<1x2304xf32> to vector<16x2304xf32>
    %37 = arith.addf %34, %36 : vector<16x2304xf32>
    %cst_29 = arith.constant 0.000000e+00 : f32
    %38 = vector.broadcast %cst_29 : f32 to vector<16x2304xf32>
    %39 = arith.maximumf %37, %38 : vector<16x2304xf32>
    %40 = arith.truncf %39 : vector<16x2304xf32> to vector<16x2304xbf16>
    %c0_30 = arith.constant 0 : index
    %c0_31 = arith.constant 0 : index
    %41 = vector.load %arg12[%c0_30, %c0_31] : memref<2304x128xbf16, #tpu.memory_space<vmem>>, vector<2304x128xbf16>
    %cst_32 = arith.constant dense<0.000000e+00> : vector<16x128xf32>
    %42 = tpu.matmul %40, %41, %cst_32 {dimension_numbers = #tpu.dot_dimension_numbers<[1], [0], [0], [1], [0, 0, 1, 1], [], []>} : vector<16x2304xbf16>, vector<2304x128xbf16>, vector<16x128xf32> -> vector<16x128xf32>
    %c0_33 = arith.constant 0 : index
    %c0_34 = arith.constant 0 : index
    %43 = vector.load %arg13[%c0_33, %c0_34] : memref<1x128xf32, #tpu.memory_space<vmem>>, vector<1x128xf32>
    %44 = vector.broadcast %43 : vector<1x128xf32> to vector<16x128xf32>
    %45 = arith.addf %42, %44 : vector<16x128xf32>
    %c0_35 = arith.constant 0 : index
    %c0_36 = arith.constant 0 : index
    %46 = vector.load %arg14[%c0_35, %c0_36] : memref<1x128xf32, #tpu.memory_space<vmem>>, vector<1x128xf32>
    %47 = vector.shape_cast %46 : vector<1x128xf32> to vector<1x128xf32>
    %48 = vector.broadcast %47 : vector<1x128xf32> to vector<16x128xf32>
    %c1_i32 = arith.constant 1 : i32
    %49 = tpu.dynamic_rotate %48 by %c1_i32 dim 1 : vector<16x128xf32>, i32 -> vector<16x128xf32>
    %50 = arith.cmpf oeq, %49, %48 : vector<16x128xf32>
    %c1_i32_37 = arith.constant 1 : i32
    %51 = tpu.dynamic_rotate %45 by %c1_i32_37 dim 1 : vector<16x128xf32>, i32 -> vector<16x128xf32>
    %52 = arith.maximumf %45, %51 : vector<16x128xf32>
    %53 = arith.select %50, %52, %45 : vector<16x128xi1>, vector<16x128xf32>
    %c2_i32 = arith.constant 2 : i32
    %54 = tpu.dynamic_rotate %48 by %c2_i32 dim 1 : vector<16x128xf32>, i32 -> vector<16x128xf32>
    %55 = arith.cmpf oeq, %54, %48 : vector<16x128xf32>
    %c2_i32_38 = arith.constant 2 : i32
    %56 = tpu.dynamic_rotate %45 by %c2_i32_38 dim 1 : vector<16x128xf32>, i32 -> vector<16x128xf32>
    %57 = arith.maximumf %53, %56 : vector<16x128xf32>
    %58 = arith.select %55, %57, %53 : vector<16x128xi1>, vector<16x128xf32>
    %c126_i32 = arith.constant 126 : i32
    %59 = tpu.dynamic_rotate %48 by %c126_i32 dim 1 : vector<16x128xf32>, i32 -> vector<16x128xf32>
    %60 = arith.cmpf oeq, %59, %48 : vector<16x128xf32>
    %c126_i32_39 = arith.constant 126 : i32
    %61 = tpu.dynamic_rotate %45 by %c126_i32_39 dim 1 : vector<16x128xf32>, i32 -> vector<16x128xf32>
    %62 = arith.maximumf %58, %61 : vector<16x128xf32>
    %63 = arith.select %60, %62, %58 : vector<16x128xi1>, vector<16x128xf32>
    %c127_i32 = arith.constant 127 : i32
    %64 = tpu.dynamic_rotate %48 by %c127_i32 dim 1 : vector<16x128xf32>, i32 -> vector<16x128xf32>
    %65 = arith.cmpf oeq, %64, %48 : vector<16x128xf32>
    %c127_i32_40 = arith.constant 127 : i32
    %66 = tpu.dynamic_rotate %45 by %c127_i32_40 dim 1 : vector<16x128xf32>, i32 -> vector<16x128xf32>
    %67 = arith.maximumf %63, %66 : vector<16x128xf32>
    %68 = arith.select %65, %67, %63 : vector<16x128xi1>, vector<16x128xf32>
    %69 = arith.subf %45, %68 : vector<16x128xf32>
    %70 = math.exp %69 : vector<16x128xf32>
    %c1_i32_41 = arith.constant 1 : i32
    %71 = tpu.dynamic_rotate %70 by %c1_i32_41 dim 1 : vector<16x128xf32>, i32 -> vector<16x128xf32>
    %cst_42 = arith.constant 0.000000e+00 : f32
    %72 = vector.broadcast %cst_42 : f32 to vector<16x128xf32>
    %73 = arith.select %50, %71, %72 : vector<16x128xi1>, vector<16x128xf32>
    %74 = arith.addf %70, %73 : vector<16x128xf32>
    %c2_i32_43 = arith.constant 2 : i32
    %75 = tpu.dynamic_rotate %70 by %c2_i32_43 dim 1 : vector<16x128xf32>, i32 -> vector<16x128xf32>
    %cst_44 = arith.constant 0.000000e+00 : f32
    %76 = vector.broadcast %cst_44 : f32 to vector<16x128xf32>
    %77 = arith.select %55, %75, %76 : vector<16x128xi1>, vector<16x128xf32>
    %78 = arith.addf %74, %77 : vector<16x128xf32>
    %c126_i32_45 = arith.constant 126 : i32
    %79 = tpu.dynamic_rotate %70 by %c126_i32_45 dim 1 : vector<16x128xf32>, i32 -> vector<16x128xf32>
    %cst_46 = arith.constant 0.000000e+00 : f32
    %80 = vector.broadcast %cst_46 : f32 to vector<16x128xf32>
    %81 = arith.select %60, %79, %80 : vector<16x128xi1>, vector<16x128xf32>
    %82 = arith.addf %78, %81 : vector<16x128xf32>
    %c127_i32_47 = arith.constant 127 : i32
    %83 = tpu.dynamic_rotate %70 by %c127_i32_47 dim 1 : vector<16x128xf32>, i32 -> vector<16x128xf32>
    %cst_48 = arith.constant 0.000000e+00 : f32
    %84 = vector.broadcast %cst_48 : f32 to vector<16x128xf32>
    %85 = arith.select %65, %83, %84 : vector<16x128xi1>, vector<16x128xf32>
    %86 = arith.addf %82, %85 : vector<16x128xf32>
    %87 = math.log %86 : vector<16x128xf32>
    %88 = arith.subf %69, %87 : vector<16x128xf32>
    %c0_49 = arith.constant 0 : index
    %c0_50 = arith.constant 0 : index
    %89 = vector.load %arg15[%c0_49, %c0_50] : memref<16x128xf32, #tpu.memory_space<vmem>>, vector<16x128xf32>
    tpu.vector_store %arg15[%c0_49, %c0_50], %88 {strides = array<i32>} : memref<16x128xf32, #tpu.memory_space<vmem>>, vector<16x128xf32>,
    return
  }
  func.func @transform_0(%arg0: i32) -> (i32, i32) {
    %c0_i32 = arith.constant 0 : i32
    %c0_i32_0 = arith.constant 0 : i32
    return %arg0, %c0_i32 : i32, i32
  }
  func.func @transform_1(%arg0: i32) -> (i32, i32) {
    %c0_i32 = arith.constant 0 : i32
    %c0_i32_0 = arith.constant 0 : i32
    %c0_i32_1 = arith.constant 0 : i32
    return %c0_i32, %c0_i32_0 : i32, i32
  }
  func.func @transform_2(%arg0: i32) -> (i32, i32) {
    %c0_i32 = arith.constant 0 : i32
    %c0_i32_0 = arith.constant 0 : i32
    %c0_i32_1 = arith.constant 0 : i32
    return %c0_i32, %c0_i32_0 : i32, i32
  }
  func.func @transform_3(%arg0: i32) -> (i32, i32) {
    %c0_i32 = arith.constant 0 : i32
    %c0_i32_0 = arith.constant 0 : i32
    %c0_i32_1 = arith.constant 0 : i32
    return %c0_i32, %c0_i32_0 : i32, i32
  }
  func.func @transform_4(%arg0: i32) -> (i32, i32) {
    %c0_i32 = arith.constant 0 : i32
    %c0_i32_0 = arith.constant 0 : i32
    %c0_i32_1 = arith.constant 0 : i32
    return %c0_i32, %c0_i32_0 : i32, i32
  }
  func.func @transform_5(%arg0: i32) -> (i32, i32) {
    %c0_i32 = arith.constant 0 : i32
    %c0_i32_0 = arith.constant 0 : i32
    %c0_i32_1 = arith.constant 0 : i32
    return %c0_i32, %c0_i32_0 : i32, i32
  }
  func.func @transform_6(%arg0: i32) -> (i32, i32) {
    %c0_i32 = arith.constant 0 : i32
    %c0_i32_0 = arith.constant 0 : i32
    %c0_i32_1 = arith.constant 0 : i32
    return %c0_i32, %c0_i32_0 : i32, i32
  }
  func.func @transform_7(%arg0: i32) -> (i32, i32) {
    %c0_i32 = arith.constant 0 : i32
    %c0_i32_0 = arith.constant 0 : i32
    %c0_i32_1 = arith.constant 0 : i32
    return %c0_i32, %c0_i32_0 : i32, i32
  }
  func.func @transform_8(%arg0: i32) -> (i32, i32) {
    %c0_i32 = arith.constant 0 : i32
    %c0_i32_0 = arith.constant 0 : i32
    %c0_i32_1 = arith.constant 0 : i32
    return %c0_i32, %c0_i32_0 : i32, i32
  }
  func.func @transform_9(%arg0: i32) -> (i32, i32) {
    %c0_i32 = arith.constant 0 : i32
    %c0_i32_0 = arith.constant 0 : i32
    %c0_i32_1 = arith.constant 0 : i32
    return %c0_i32, %c0_i32_0 : i32, i32
  }
  func.func @transform_10(%arg0: i32) -> (i32, i32) {
    %c0_i32 = arith.constant 0 : i32
    %c0_i32_0 = arith.constant 0 : i32
    %c0_i32_1 = arith.constant 0 : i32
    return %c0_i32, %c0_i32_0 : i32, i32
  }
  func.func @transform_11(%arg0: i32) -> (i32, i32) {
    %c0_i32 = arith.constant 0 : i32
    %c0_i32_0 = arith.constant 0 : i32
    %c0_i32_1 = arith.constant 0 : i32
    return %c0_i32, %c0_i32_0 : i32, i32
  }
  func.func @transform_12(%arg0: i32) -> (i32, i32) {
    %c0_i32 = arith.constant 0 : i32
    %c0_i32_0 = arith.constant 0 : i32
    %c0_i32_1 = arith.constant 0 : i32
    return %c0_i32, %c0_i32_0 : i32, i32
  }
  func.func @transform_13(%arg0: i32) -> (i32, i32) {
    %c0_i32 = arith.constant 0 : i32
    %c0_i32_0 = arith.constant 0 : i32
    %c0_i32_1 = arith.constant 0 : i32
    return %c0_i32, %c0_i32_0 : i32, i32
  }
  func.func @transform_14(%arg0: i32) -> (i32, i32) {
    %c0_i32 = arith.constant 0 : i32
    %c0_i32_0 = arith.constant 0 : i32
    return %arg0, %c0_i32 : i32, i32
  }
}

</mosaic_0001>

<bundles_post_ra>
// kernel: fully_connected_forward.1
= control target key start
LH: loop header
LB: loop body
LE: loop exit
PB: predicated region body
PF: predicated region fallthrough
CT: control target
= control target key end

     0   :  { %19 = vsyncpa [#allocation3], 0  ;;  %s7164_s0 = inlined_call_operand.vmem [shape: bf16[16,128], index: 0, kind: input, shape index: {}]   ;;  %s7165_s1 = inlined_call_operand.hbm [shape: bf16[128,256], index: 1, kind: input, shape index: {}]   ;;  %s7166_s2 = inlined_call_operand.hbm [shape: f32[1,256], index: 2, kind: input, shape index: {}]   ;;  %s7167_s3 = inlined_call_operand.hbm [shape: bf16[256,256], index: 3, kind: input, shape index: {}]   ;;  %s7168_s4 = inlined_call_operand.hbm [shape: f32[1,256], index: 4, kind: input, shape index: {}]   ;;  %s7169_s5 = inlined_call_operand.hbm [shape: bf16[256,256], index: 5, kind: input, shape index: {}]   ;;  %s7170_s6 = inlined_call_operand.hbm [shape: f32[1,256], index: 6, kind: input, shape index: {}]   ;;  %s7171_s7 = inlined_call_operand.hbm [shape: bf16[256,256], index: 7, kind: input, shape index: {}]   ;;  %s7172_s8 = inlined_call_operand.hbm [shape: f32[1,256], index: 8, kind: input, shape index: {}]   ;;  %s7173_s9 = inlined_call_operand.hbm [shape: bf16[256,2304], index: 9, kind: input, shape index: {}]   ;;  %s7174_s10 = inlined_call_operand.hbm [shape: f32[1,2304], index: 10, kind: input, shape index: {}]   ;;  %s7175_s11 = inlined_call_operand.hbm [shape: bf16[2304,128], index: 11, kind: input, shape index: {}]   ;;  %s7176_s12 = inlined_call_operand.hbm [shape: f32[1,128], index: 12, kind: input, shape index: {}]   ;;  %s7177_s13 = inlined_call_operand.hbm [shape: f32[1,128], index: 13, kind: input, shape index: {}]   ;;  %s7178_s14 = inlined_call_operand.vmem [shape: f32[16,128], index: 14, kind: output, shape index: {}]  }
   0x1   :  { %20 = vsyncpa [#allocation5], 0 }
   0x2   :  { %21 = vsyncpa [#allocation8], 0 }
   0x3   :  { %22 = vsyncpa [#allocation11], 0 }
   0x4   :  { %23 = vsyncpa [#allocation14], 0 }
   0x5   :  { %24 = vsyncpa [#allocation17], 0 }
   0x6   :  { %25 = vsyncpa [#allocation20], 0  ;;  %s6831_s29 = smov [#allocation4]   ;;  %s6832_s15 = smov [#allocation7]  }
   0x7   :  { %s46_s30 = sshll.u32 %s6831_s29, 4  ;;  %s68_s16 = sshll.u32 %s6832_s15, 4  ;;  %s47_s30 = int_to_ptr.vmem [resolvable:$true] %s46_s30  ;;  %s69_s16 = int_to_ptr.vmem [resolvable:$true] %s68_s16 }
   0x8   :  { %s6565_s17 = scalar_lea.vmem %s47_s30, 32  ;;  %p6570_p1 = scmp.lt.s32.totalorder %s47_s30, %s47_s30 }
   0x9   :  { %p6566_p0 = scmp.ne.s32.totalorder %s47_s30, %s6565_s17  ;;  %p6571_p2 = scmp.lt.s32.totalorder %s6565_s17, %s6565_s17 }
   0xb   :  { %p6572_p3 = por %p6571_p2, %p6570_p1 }
   0xd   :  { %p6573_p4 = pnand %p6572_p3, %p6566_p0 }
   0xf   :  { %6576 = shalt.err (!%p6573_p4)
}
  0x10   :  { %49 = dma.hbm_to_vmem [thread:$0]  %s7166_s2, 32, %s47_s30, [#allocation5]  }
  0x11   :  { %s6585_s20 = scalar_lea.vmem %s69_s16, 32  ;;  %p6590_p6 = scmp.lt.s32.totalorder %s69_s16, %s69_s16 }
  0x12   :  { %p6586_p5 = scmp.ne.s32.totalorder %s69_s16, %s6585_s20  ;;  %p6591_p7 = scmp.lt.s32.totalorder %s6585_s20, %s6585_s20 }
  0x14   :  { %p6592_p8 = por %p6591_p7, %p6590_p6 }
  0x16   :  { %p6593_p9 = pnand %p6592_p8, %p6586_p5 }
  0x18   :  { %6596 = shalt.err (!%p6593_p9)
}
  0x19   :  { %71 = dma.hbm_to_vmem [thread:$0]  %s7168_s4, 32, %s69_s16, [#allocation8]  }
  0x1a   :  { %s6833_s23 = smov [#allocation10]   ;;  %s6834_s25 = smov [#allocation13]  }
  0x1b   :  { %s90_s24 = sshll.u32 %s6833_s23, 4  ;;  %s112_s26 = sshll.u32 %s6834_s25, 4  ;;  %s91_s24 = int_to_ptr.vmem [resolvable:$true] %s90_s24  ;;  %s113_s26 = int_to_ptr.vmem [resolvable:$true] %s112_s26 }
  0x1c   :  { %s6605_s27 = scalar_lea.vmem %s91_s24, 32  ;;  %p6610_p11 = scmp.lt.s32.totalorder %s91_s24, %s91_s24 }
  0x1d   :  { %p6606_p10 = scmp.ne.s32.totalorder %s91_s24, %s6605_s27  ;;  %p6611_p12 = scmp.lt.s32.totalorder %s6605_s27, %s6605_s27 }
  0x1f   :  { %p6612_p13 = por %p6611_p12, %p6610_p11 }
  0x21   :  { %p6613_p0 = pnand %p6612_p13, %p6606_p10 }
  0x23   :  { %6616 = shalt.err (!%p6613_p0)
}
  0x24   :  { %93 = dma.hbm_to_vmem [thread:$0]  %s7170_s6, 32, %s91_s24, [#allocation11]  }
  0x25   :  { %s6625_s29 = scalar_lea.vmem %s113_s26, 32  ;;  %p6630_p2 = scmp.lt.s32.totalorder %s113_s26, %s113_s26 }
  0x26   :  { %p6626_p1 = scmp.ne.s32.totalorder %s113_s26, %s6625_s29  ;;  %p6631_p3 = scmp.lt.s32.totalorder %s6625_s29, %s6625_s29 }
  0x28   :  { %p6632_p4 = por %p6631_p3, %p6630_p2 }
  0x2a   :  { %p6633_p5 = pnand %p6632_p4, %p6626_p1 }
  0x2c   :  { %6636 = shalt.err (!%p6633_p5)
}
  0x2d   :  { %115 = dma.hbm_to_vmem [thread:$0]  %s7172_s8, 32, %s113_s26, [#allocation14]  }
  0x2e   :  { %s6835_s15 = smov [#allocation16]   ;;  %s6836_s17 = smov [#allocation19]  }
  0x2f   :  { %s134_s16 = sshll.u32 %s6835_s15, 4  ;;  %s156_s18 = sshll.u32 %s6836_s17, 4  ;;  %s135_s16 = int_to_ptr.vmem [resolvable:$true] %s134_s16  ;;  %s157_s18 = int_to_ptr.vmem [resolvable:$true] %s156_s18 }
  0x30   :  { %s6645_s19 = scalar_lea.vmem %s135_s16, 288  ;;  %p6650_p7 = scmp.lt.s32.totalorder %s135_s16, %s135_s16 }
  0x31   :  { %p6646_p6 = scmp.ne.s32.totalorder %s135_s16, %s6645_s19  ;;  %p6651_p8 = scmp.lt.s32.totalorder %s6645_s19, %s6645_s19 }
  0x33   :  { %p6652_p9 = por %p6651_p8, %p6650_p7 }
  0x35   :  { %p6653_p10 = pnand %p6652_p9, %p6646_p6 }
  0x37   :  { %6656 = shalt.err (!%p6653_p10)
}
  0x38   :  { %137 = dma.hbm_to_vmem [thread:$0]  %s7174_s10, 288, %s135_s16, [#allocation17]  }
  0x39   :  { %s6665_s21 = scalar_lea.vmem %s157_s18, 16  ;;  %s6669_s8 = scalar_lea.vmem %s157_s18, 32 }
  0x3a   :  { %p6666_p11 = scmp.ne.s32.totalorder %s157_s18, %s6665_s21  ;;  %p6670_p12 = scmp.lt.s32.totalorder %s157_s18, %s157_s18 }
  0x3b   :  { %p6671_p13 = scmp.lt.s32.totalorder %s6669_s8, %s6665_s21 }
  0x3d   :  { %p6672_p0 = por %p6671_p13, %p6670_p12 }
  0x3f   :  { %p6673_p1 = pnand %p6672_p0, %p6666_p11 }
  0x41   :  { %6676 = shalt.err (!%p6673_p1)
}
  0x42   :  { %159 = dma.hbm_to_vmem [thread:$0]  %s7176_s12, 16, %s157_s18, [#allocation20]  }
  0x43   :  { %s6837_s24 = smov [#allocation2]  }
  0x44   :  { %s33_s25 = sshll.u32 %s6837_s24, 4  ;;  %s34_s25 = int_to_ptr.vmem [resolvable:$true] %s33_s25 }
  0x45   :  { %s6685_s26 = scalar_lea.vmem %s34_s25, 2048  ;;  %p6690_p3 = scmp.lt.s32.totalorder %s34_s25, %s34_s25 }
  0x46   :  { %p6686_p2 = scmp.ne.s32.totalorder %s34_s25, %s6685_s26  ;;  %p6691_p4 = scmp.lt.s32.totalorder %s6685_s26, %s6685_s26 }
  0x48   :  { %p6692_p5 = por %p6691_p4, %p6690_p3 }
  0x4a   :  { %p6693_p6 = pnand %p6692_p5, %p6686_p2 }
  0x4c   :  { %6696 = shalt.err (!%p6693_p6)
}
  0x4d   :  { %s6838_s10 = smov 128   ;;  %s6839_s27 = smov 8  }
  0x4e   :  { %39 = dma.hbm_to_vmem [thread:$0]  %s7165_s1, 2048, %s34_s25, [#allocation3], %s6838_s10, %s6838_s10, %s6839_s27  }
  0x4f   :  { %s6840_s12 = smov [#allocation6]   ;;  %s6841_s4 = smov [#allocation9]  }
  0x50   :  { %s55_s29 = sshll.u32 %s6840_s12, 4  ;;  %s77_s30 = sshll.u32 %s6841_s4, 4  ;;  %s56_s29 = int_to_ptr.vmem [resolvable:$true] %s55_s29  ;;  %s78_s30 = int_to_ptr.vmem [resolvable:$true] %s77_s30 }
  0x51   :  { %s6705_s15 = scalar_lea.vmem %s56_s29, 4096  ;;  %p6710_p8 = scmp.lt.s32.totalorder %s56_s29, %s56_s29 }
  0x52   :  { %p6706_p7 = scmp.ne.s32.totalorder %s56_s29, %s6705_s15  ;;  %p6711_p9 = scmp.lt.s32.totalorder %s6705_s15, %s6705_s15 }
  0x54   :  { %p6712_p10 = por %p6711_p9, %p6710_p8 }
  0x56   :  { %p6713_p11 = pnand %p6712_p10, %p6706_p7 }
  0x58   :  { %6716 = shalt.err (!%p6713_p11)
}
  0x59   :  { %61 = dma.hbm_to_vmem [thread:$0]  %s7167_s3, 4096, %s56_s29, [#allocation5], %s6838_s10, %s6838_s10, %s6839_s27  }
  0x5a   :  { %s6725_s1 = scalar_lea.vmem %s78_s30, 4096  ;;  %p6730_p13 = scmp.lt.s32.totalorder %s78_s30, %s78_s30 }
  0x5b   :  { %p6726_p12 = scmp.ne.s32.totalorder %s78_s30, %s6725_s1  ;;  %p6731_p0 = scmp.lt.s32.totalorder %s6725_s1, %s6725_s1 }
  0x5d   :  { %p6732_p1 = por %p6731_p0, %p6730_p13 }
  0x5f   :  { %p6733_p2 = pnand %p6732_p1, %p6726_p12 }
  0x61   :  { %6736 = shalt.err (!%p6733_p2)
}
  0x62   :  { %83 = dma.hbm_to_vmem [thread:$0]  %s7169_s5, 4096, %s78_s30, [#allocation8], %s6838_s10, %s6838_s10, %s6839_s27  }
  0x63   :  { %s6842_s6 = smov [#allocation12]   ;;  %s6843_s21 = smov [#allocation15]  }
  0x64   :  { %s99_s20 = sshll.u32 %s6842_s6, 4  ;;  %s121_s3 = sshll.u32 %s6843_s21, 4  ;;  %s100_s20 = int_to_ptr.vmem [resolvable:$true] %s99_s20  ;;  %s122_s3 = int_to_ptr.vmem [resolvable:$true] %s121_s3 }
  0x65   :  { %s6745_s8 = scalar_lea.vmem %s100_s20, 4096  ;;  %p6750_p4 = scmp.lt.s32.totalorder %s100_s20, %s100_s20 }
  0x66   :  { %p6746_p3 = scmp.ne.s32.totalorder %s100_s20, %s6745_s8  ;;  %p6751_p5 = scmp.lt.s32.totalorder %s6745_s8, %s6745_s8 }
  0x68   :  { %p6752_p6 = por %p6751_p5, %p6750_p4 }
  0x6a   :  { %p6753_p7 = pnand %p6752_p6, %p6746_p3 }
  0x6c   :  { %6756 = shalt.err (!%p6753_p7)
}
  0x6d   :  { %105 = dma.hbm_to_vmem [thread:$0]  %s7171_s7, 4096, %s100_s20, [#allocation11], %s6838_s10, %s6838_s10, %s6839_s27  }
  0x6e   :  { %s6765_s5 = scalar_lea.vmem %s122_s3, 36864  ;;  %p6770_p9 = scmp.lt.s32.totalorder %s122_s3, %s122_s3 }
  0x6f   :  { %p6766_p8 = scmp.ne.s32.totalorder %s122_s3, %s6765_s5  ;;  %p6771_p10 = scmp.lt.s32.totalorder %s6765_s5, %s6765_s5 }
  0x71   :  { %p6772_p11 = por %p6771_p10, %p6770_p9 }
  0x73   :  { %p6773_p12 = pnand %p6772_p11, %p6766_p8 }
  0x75   :  { %6776 = shalt.err (!%p6773_p12)
}
  0x76   :  { %s6844_s24 = smov 1152   ;;  %s6845_s25 = smov 72  }
  0x77   :  { %127 = dma.hbm_to_vmem [thread:$0]  %s7173_s9, 36864, %s122_s3, [#allocation14], %s6844_s24, %s6844_s24, %s6845_s25  }
  0x78   :  { %s6846_s28 = smov [#allocation18]  }
  0x79   :  { %s143_s12 = sshll.u32 %s6846_s28, 4  ;;  %s144_s12 = int_to_ptr.vmem [resolvable:$true] %s143_s12 }
  0x7a   :  { %s6785_s29 = scalar_lea.vmem %s144_s12, 18432  ;;  %p6790_p0 = scmp.lt.s32.totalorder %s144_s12, %s144_s12 }
  0x7b   :  { %p6786_p13 = scmp.ne.s32.totalorder %s144_s12, %s6785_s29  ;;  %p6791_p1 = scmp.lt.s32.totalorder %s6785_s29, %s6785_s29 }
  0x7d   :  { %p6792_p2 = por %p6791_p1, %p6790_p0 }
  0x7f   :  { %p6793_p3 = pnand %p6792_p2, %p6786_p13 }
  0x81   :  { %6796 = shalt.err (!%p6793_p3)
}
  0x82   :  { %s6847_s7 = smov 64   ;;  %s6848_s10 = smov 4  }
  0x83   :  { %149 = dma.hbm_to_vmem [thread:$0]  %s7175_s11, 18432, %s144_s12, [#allocation17], %s6847_s7, %s6847_s7, %s6848_s10  }
  0x84   :  { %s6849_s30 = smov [#allocation21]  }
  0x85   :  { %s166_s15 = sshll.u32 %s6849_s30, 4  ;;  %s167_s15 = int_to_ptr.vmem [resolvable:$true] %s166_s15 }
  0x86   :  { %s6805_s9 = scalar_lea.vmem %s167_s15, 16  ;;  %s6809_s16 = scalar_lea.vmem %s167_s15, 32 }
  0x87   :  { %p6806_p4 = scmp.ne.s32.totalorder %s167_s15, %s6805_s9  ;;  %p6810_p5 = scmp.lt.s32.totalorder %s167_s15, %s167_s15 }
  0x88   :  { %p6811_p6 = scmp.lt.s32.totalorder %s6809_s16, %s6805_s9 }
  0x8a   :  { %p6812_p7 = por %p6811_p6, %p6810_p5 }
  0x8c   :  { %p6813_p8 = pnand %p6812_p7, %p6806_p4 }
  0x8e   :  { %6816 = shalt.err (!%p6813_p8)
}
  0x8f   :  { %169 = dma.hbm_to_vmem [thread:$0]  %s7177_s13, 16, %s167_s15, [#allocation20]  }
  0x90   :  { %6817 = dma.done.wait [#allocation3], 2048  }
  0x91   :  { %6818 = vsyncadd [#allocation3], 4294965248 }
  0x92   :  { %6819 = dma.done.wait [#allocation5], 4128  }
  0x93   :  { %6820 = vsyncadd [#allocation5], 4294963168 }
  0x94   :  { %6821 = dma.done.wait [#allocation8], 4128  }
  0x95   :  { %6822 = vsyncadd [#allocation8], 4294963168 }
  0x96   :  { %6823 = dma.done.wait [#allocation11], 4128  }
  0x97   :  { %6824 = vsyncadd [#allocation11], 4294963168 }
  0x98   :  { %6825 = dma.done.wait [#allocation14], 36896  }
  0x99   :  { %6826 = vsyncadd [#allocation14], 4294930400 }
  0x9a   :  { %6827 = dma.done.wait [#allocation17], 18720  }
  0x9b   :  { %6828 = vsyncadd [#allocation17], 4294948576 }
  0x9c   :  { %6829 = dma.done.wait [#allocation20], 32  }
  0x9d   :  { %6830 = vsyncadd [#allocation20], 4294967264  ;;  %v6850_v0 = vmov 0   ;;  %v5804_v1 = vld [vmem:[#allocation2 + $0x74] ss:$8 sps:$4 sm:$0xff]   ;;  %v5828_v27 = vld [vmem:[%s7164_s0] sm:$0xff]  }
  0x9e   :  { %358 = vmatprep.mubr.bf16.mxu0 %v6850_v0  ;;  %v5806_v2 = vld [vmem:[#allocation2 + $0x70] ss:$8 sps:$4 sm:$0xff]   ;;  %326 = vmatprep.subr.bf16.mxu0 %v5804_v1  ;;  %v5807_v3 = vld [vmem:[#allocation2 + $0x64] ss:$8 sps:$4 sm:$0xff]   ;;  %v5809_v4 = vld [vmem:[#allocation2 + $0x60] ss:$8 sps:$4 sm:$0xff]  }
  0x9f   :  { %327 = vmatpush1.bf16.msra.mxu0 %v5806_v2  ;;  %v5810_v5 = vld [vmem:[#allocation2 + $0x54] ss:$8 sps:$4 sm:$0xff]   ;;  %v5812_v6 = vld [vmem:[#allocation2 + $0x50] ss:$8 sps:$4 sm:$0xff]   ;;  %v5813_v7 = vld [vmem:[#allocation2 + $0x44] ss:$8 sps:$4 sm:$0xff]  }
  0xa0   :  { %328 = vmatprep.subr.bf16.mxu0 %v5807_v3  ;;  %v5815_v8 = vld [vmem:[#allocation2 + $0x40] ss:$8 sps:$4 sm:$0xff]   ;;  %v5816_v9 = vld [vmem:[#allocation2 + $0x34] ss:$8 sps:$4 sm:$0xff]   ;;  %v5818_v13 = vld [vmem:[#allocation2 + $0x30] ss:$8 sps:$4 sm:$0xff]  }
  0xa1   :  { %v5829_v10 = vld [vmem:[#allocation6 + $0x74] ss:$8 sps:$4 sm:$0xff]   ;;  %v5831_v11 = vld [vmem:[#allocation6 + $0x70] ss:$8 sps:$4 sm:$0xff]   ;;  %v5832_v12 = vld [vmem:[#allocation6 + $0x64] ss:$8 sps:$4 sm:$0xff]  }
  0xa2   :  { %579 = vmatprep.subr.bf16.mxu1 %v5829_v10  ;;  %v5834_v14 = vld [vmem:[#allocation6 + $0x60] ss:$8 sps:$4 sm:$0xff]   ;;  %v5835_v16 = vld [vmem:[#allocation6 + $0x54] ss:$8 sps:$4 sm:$0xff]   ;;  %v5837_v18 = vld [vmem:[#allocation6 + $0x50] ss:$8 sps:$4 sm:$0xff]  }
  0xa3   :  { %329 = vmatpush1.bf16.msra.mxu0 %v5809_v4  ;;  %580 = vmatpush1.bf16.msra.mxu1 %v5831_v11  ;;  %v5819_v15 = vld [vmem:[#allocation2 + $0x24] ss:$8 sps:$4 sm:$0xff]   ;;  %v5821_v17 = vld [vmem:[#allocation2 + $0x20] ss:$8 sps:$4 sm:$0xff]   ;;  %v5822_v19 = vld [vmem:[#allocation2 + $0x14] ss:$8 sps:$4 sm:$0xff]  }
  0xa4   :  { %330 = vmatprep.subr.bf16.mxu0 %v5810_v5  ;;  %581 = vmatprep.subr.bf16.mxu1 %v5832_v12  ;;  %v5838_v20 = vld [vmem:[#allocation6 + $0x44] ss:$8 sps:$4 sm:$0xff]   ;;  %v5840_v22 = vld [vmem:[#allocation6 + $0x40] ss:$8 sps:$4 sm:$0xff]   ;;  %v5841_v24 = vld [vmem:[#allocation6 + $0x34] ss:$8 sps:$4 sm:$0xff]   ;;  %v230_v12 = vlaneseq }
  0xa5   :  { %v5824_v21 = vld [vmem:[#allocation2 + $0x10] ss:$8 sps:$4 sm:$0xff]   ;;  %v5825_v23 = vld [vmem:[#allocation2 + $0x4] ss:$8 sps:$4 sm:$0xff]   ;;  %v5827_v25 = vld [vmem:[#allocation2] ss:$8 sps:$4 sm:$0xff]  }
  0xa6   :  { %v5843_v26 = vld [vmem:[#allocation6 + $0x30] ss:$8 sps:$4 sm:$0xff]   ;;  %v5844_v28 = vld [vmem:[#allocation6 + $0x24] ss:$8 sps:$4 sm:$0xff]   ;;  %v5846_v29 = vld [vmem:[#allocation6 + $0x20] ss:$8 sps:$4 sm:$0xff]  }
  0xa7   :  { %331 = vmatpush1.bf16.msra.mxu0 %v5812_v6  ;;  %582 = vmatpush1.bf16.msra.mxu1 %v5834_v14  ;;  %v5847_v30 = vld [vmem:[#allocation6 + $0x14] ss:$8 sps:$4 sm:$0xff]   ;;  %v5849_v31 = vld [vmem:[#allocation6 + $0x10] ss:$8 sps:$4 sm:$0xff]   ;;  %v5850_v32 = vld [vmem:[#allocation6 + $0x4] ss:$8 sps:$4 sm:$0xff]  }
  0xa8   :  { %332 = vmatprep.subr.bf16.mxu0 %v5813_v7  ;;  %583 = vmatprep.subr.bf16.mxu1 %v5835_v16  ;;  %v5852_v33 = vld [vmem:[#allocation6] ss:$8 sps:$4 sm:$0xff]   ;;  %v5853_v34 = vld [vmem:[#allocation6 + $0xf4] ss:$8 sps:$4 sm:$0xff]   ;;  %v5855_v35 = vld [vmem:[#allocation6 + $0xf0] ss:$8 sps:$4 sm:$0xff]  }
  0xa9   :  { %v5856_v36 = vld [vmem:[#allocation6 + $0xe4] ss:$8 sps:$4 sm:$0xff]   ;;  %v5858_v37 = vld [vmem:[#allocation6 + $0xe0] ss:$8 sps:$4 sm:$0xff]   ;;  %v5859_v38 = vld [vmem:[#allocation6 + $0xd4] ss:$8 sps:$4 sm:$0xff]  }
  0xaa   :  { %v5861_v39 = vld [vmem:[#allocation6 + $0xd0] ss:$8 sps:$4 sm:$0xff]   ;;  %v5862_v40 = vld [vmem:[#allocation6 + $0xc4] ss:$8 sps:$4 sm:$0xff]   ;;  %v5864_v41 = vld [vmem:[#allocation6 + $0xc0] ss:$8 sps:$4 sm:$0xff]  }
  0xab   :  { %333 = vmatpush1.bf16.msra.mxu0 %v5815_v8  ;;  %584 = vmatpush1.bf16.msra.mxu1 %v5837_v18  ;;  %v5865_v42 = vld [vmem:[#allocation6 + $0xb4] ss:$8 sps:$4 sm:$0xff]   ;;  %v5867_v43 = vld [vmem:[#allocation6 + $0xb0] ss:$8 sps:$4 sm:$0xff]   ;;  %v5868_v44 = vld [vmem:[#allocation6 + $0xa4] ss:$8 sps:$4 sm:$0xff]  }
  0xac   :  { %334 = vmatprep.subr.bf16.mxu0 %v5816_v9  ;;  %585 = vmatprep.subr.bf16.mxu1 %v5838_v20  ;;  %v5870_v45 = vld [vmem:[#allocation6 + $0xa0] ss:$8 sps:$4 sm:$0xff]   ;;  %v5871_v46 = vld [vmem:[#allocation6 + $0x94] ss:$8 sps:$4 sm:$0xff]   ;;  %v5873_v47 = vld [vmem:[#allocation6 + $0x90] ss:$8 sps:$4 sm:$0xff]  }
  0xad   :  { %v5874_v48 = vld [vmem:[#allocation6 + $0x84] ss:$8 sps:$4 sm:$0xff]   ;;  %v5876_v49 = vld [vmem:[#allocation6 + $0x80] ss:$8 sps:$4 sm:$0xff]   ;;  %v5877_v50 = vld [vmem:[#allocation9 + $0x70] ss:$8 sps:$4 sm:$0xff]  }
  0xae   :  { %v5879_v51 = vld [vmem:[#allocation9 + $0x74] ss:$8 sps:$4 sm:$0xff]   ;;  %v5882_v52 = vld [vmem:[#allocation9 + $0x64] ss:$8 sps:$4 sm:$0xff]   ;;  %v5880_v53 = vld [vmem:[#allocation9 + $0x60] ss:$8 sps:$4 sm:$0xff]  }
  0xaf   :  { %335 = vmatpush1.bf16.msra.mxu0 %v5818_v13  ;;  %586 = vmatpush1.bf16.msra.mxu1 %v5840_v22  ;;  %v5885_v54 = vld [vmem:[#allocation9 + $0x54] ss:$8 sps:$4 sm:$0xff]   ;;  %v5883_v55 = vld [vmem:[#allocation9 + $0x50] ss:$8 sps:$4 sm:$0xff]   ;;  %v5888_v56 = vld [vmem:[#allocation9 + $0x44] ss:$8 sps:$4 sm:$0xff]  }
  0xb0   :  { %336 = vmatprep.subr.bf16.mxu0 %v5819_v15  ;;  %587 = vmatprep.subr.bf16.mxu1 %v5841_v24  ;;  %v5886_v57 = vld [vmem:[#allocation9 + $0x40] ss:$8 sps:$4 sm:$0xff]   ;;  %v5891_v58 = vld [vmem:[#allocation9 + $0x34] ss:$8 sps:$4 sm:$0xff]   ;;  %v5889_v59 = vld [vmem:[#allocation9 + $0x30] ss:$8 sps:$4 sm:$0xff]  }
  0xb1   :  { %v5894_v60 = vld [vmem:[#allocation9 + $0x24] ss:$8 sps:$4 sm:$0xff]   ;;  %v5892_v61 = vld [vmem:[#allocation9 + $0x20] ss:$8 sps:$4 sm:$0xff]   ;;  %v5897_v62 = vld [vmem:[#allocation9 + $0x14] ss:$8 sps:$4 sm:$0xff]  }
  0xb2   :  { %v5895_v63 = vld [vmem:[#allocation9 + $0x10] ss:$8 sps:$4 sm:$0xff]   ;;  %v5900_v0 = vld [vmem:[#allocation9 + $0x4] ss:$8 sps:$4 sm:$0xff]   ;;  %v5898_v1 = vld [vmem:[#allocation9] ss:$8 sps:$4 sm:$0xff]  }
  0xb3   :  { %337 = vmatpush1.bf16.msra.mxu0 %v5821_v17  ;;  %588 = vmatpush1.bf16.msra.mxu1 %v5843_v26  ;;  %v5903_v2 = vld [vmem:[#allocation9 + $0xf4] ss:$8 sps:$4 sm:$0xff]   ;;  %v5901_v3 = vld [vmem:[#allocation9 + $0xf0] ss:$8 sps:$4 sm:$0xff]   ;;  %v5906_v4 = vld [vmem:[#allocation9 + $0xe4] ss:$8 sps:$4 sm:$0xff]  }
  0xb4   :  { %338 = vmatprep.subr.bf16.mxu0 %v5822_v19  ;;  %589 = vmatprep.subr.bf16.mxu1 %v5844_v28  ;;  %v5904_v5 = vld [vmem:[#allocation9 + $0xe0] ss:$8 sps:$4 sm:$0xff]   ;;  %v5909_v6 = vld [vmem:[#allocation9 + $0xd4] ss:$8 sps:$4 sm:$0xff]   ;;  %v5907_v7 = vld [vmem:[#allocation9 + $0xd0] ss:$8 sps:$4 sm:$0xff]  }
  0xb5   :  { %v5912_v8 = vld [vmem:[#allocation9 + $0xc4] ss:$8 sps:$4 sm:$0xff]   ;;  %v5910_v9 = vld [vmem:[#allocation9 + $0xc0] ss:$8 sps:$4 sm:$0xff]   ;;  %v5915_v10 = vld [vmem:[#allocation9 + $0xb4] ss:$8 sps:$4 sm:$0xff]  }
  0xb6   :  { %v5913_v11 = vld [vmem:[#allocation9 + $0xb0] ss:$8 sps:$4 sm:$0xff]   ;;  %v6984_v13 = vshrl.u32 %v230_v12, 7  ;;  %v228_v16 = vld [vmem:[#allocation4] sm:$0x3]  ;;  %s6851_s0 = smov 1  }
  0xb7   :  { %339 = vmatpush1.bf16.msra.mxu0 %v5824_v21  ;;  %590 = vmatpush1.bf16.msra.mxu1 %v5846_v29  ;;  %s6852_s18 = smov 2   ;;  %s6853_s19 = smov 127  }
  0xb8   :  { %340 = vmatprep.subr.bf16.mxu0 %v5825_v23  ;;  %591 = vmatprep.subr.bf16.mxu1 %v5847_v30  ;;  %v6987_v14 = vsub.s32 0, %v6984_v13  ;;  %v6990_v15 = vsub.s32 1, %v6984_v13  ;;  %s6854_s6 = smov 126  }
  0xba   :  { %v233_v17 = vrot.slane %v228_v16, %v6987_v14  ;;  %v237_v19 = vrot.slane %v228_v16, %v6990_v15 }
  0xbb   :  { %341 = vmatpush1.bf16.msra.mxu0 %v5827_v25  ;;  %592 = vmatpush1.bf16.msra.mxu1 %v5849_v31 }
  0xbc   :  { %593 = vmatprep.subr.bf16.mxu1 %v5850_v32  ;;  %832 = vmatprep.subr.bf16.mxu0 %v5879_v51  ;;  %v5945_v51 = vld [vmem:[#allocation12 + $0x14] ss:$8 sps:$4 sm:$0xff]  }
  0xbe   :  { %359 = vmatmul.mubr.bf16.vlgmr.msra.gmra.mxu0 %v5828_v27 }
  0xbf   :  { %594 = vmatpush1.bf16.msra.mxu1 %v5852_v33  ;;  %833 = vmatpush1.bf16.msra.mxu0 %v5877_v50  ;;  %v5918_v33 = vld [vmem:[#allocation9 + $0xa4] ss:$8 sps:$4 sm:$0xff]  }
  0xc0   :  { %595 = vmatprep.subr.bf16.mxu1 %v5853_v34  ;;  %834 = vmatprep.subr.bf16.mxu0 %v5882_v52  ;;  %v5916_v34 = vld [vmem:[#allocation9 + $0xa0] ss:$8 sps:$4 sm:$0xff]   ;;  %v5943_v52 = vld [vmem:[#allocation12 + $0x10] ss:$8 sps:$4 sm:$0xff]  }
  0xc1   :  { %v5940_v50 = vld [vmem:[#allocation12 + $0x20] ss:$8 sps:$4 sm:$0xff]  }
  0xc3   :  { %596 = vmatpush2.bf16.msra.mxu1 %v5855_v35  ;;  %835 = vmatpush1.bf16.msra.mxu0 %v5880_v53  ;;  %v5921_v35 = vld [vmem:[#allocation9 + $0x94] ss:$8 sps:$4 sm:$0xff]   ;;  %v5948_v53 = vld [vmem:[#allocation12 + $0x4] ss:$8 sps:$4 sm:$0xff]  }
  0xc4   :  { %597 = vmatprep.subr.bf16.mxu1 %v5856_v36  ;;  %836 = vmatprep.subr.bf16.mxu0 %v5885_v54  ;;  %v5919_v36 = vld [vmem:[#allocation9 + $0x90] ss:$8 sps:$4 sm:$0xff]   ;;  %v5946_v54 = vld [vmem:[#allocation12] ss:$8 sps:$4 sm:$0xff]  }
  0xc7   :  { %598 = vmatpush2.bf16.msra.mxu1 %v5858_v37  ;;  %837 = vmatpush1.bf16.msra.mxu0 %v5883_v55  ;;  %v5924_v37 = vld [vmem:[#allocation9 + $0x84] ss:$8 sps:$4 sm:$0xff]   ;;  %v5951_v55 = vld [vmem:[#allocation12 + $0xf4] ss:$8 sps:$4 sm:$0xff]  }
  0xc8   :  { %599 = vmatprep.subr.bf16.mxu1 %v5859_v38  ;;  %838 = vmatprep.subr.bf16.mxu0 %v5888_v56  ;;  %v5922_v38 = vld [vmem:[#allocation9 + $0x80] ss:$8 sps:$4 sm:$0xff]   ;;  %v5949_v56 = vld [vmem:[#allocation12 + $0xf0] ss:$8 sps:$4 sm:$0xff]  }
  0xcb   :  { %600 = vmatpush2.bf16.msra.mxu1 %v5861_v39  ;;  %839 = vmatpush1.bf16.msra.mxu0 %v5886_v57  ;;  %v5925_v39 = vld [vmem:[#allocation12 + $0x70] ss:$8 sps:$4 sm:$0xff]   ;;  %v5954_v57 = vld [vmem:[#allocation12 + $0xe4] ss:$8 sps:$4 sm:$0xff]  }
  0xcc   :  { %601 = vmatprep.subr.bf16.mxu1 %v5862_v40  ;;  %840 = vmatprep.subr.bf16.mxu0 %v5891_v58  ;;  %v5927_v40 = vld [vmem:[#allocation12 + $0x74] ss:$8 sps:$4 sm:$0xff]   ;;  %v5952_v58 = vld [vmem:[#allocation12 + $0xe0] ss:$8 sps:$4 sm:$0xff]  }
  0xcf   :  { %602 = vmatpush2.bf16.msra.mxu1 %v5864_v41  ;;  %841 = vmatpush1.bf16.msra.mxu0 %v5889_v59  ;;  %v5930_v41 = vld [vmem:[#allocation12 + $0x64] ss:$8 sps:$4 sm:$0xff]   ;;  %v5957_v59 = vld [vmem:[#allocation12 + $0xd4] ss:$8 sps:$4 sm:$0xff]  }
  0xd0   :  { %603 = vmatprep.subr.bf16.mxu1 %v5865_v42  ;;  %842 = vmatprep.subr.bf16.mxu0 %v5894_v60  ;;  %v5928_v42 = vld [vmem:[#allocation12 + $0x60] ss:$8 sps:$4 sm:$0xff]   ;;  %v5955_v60 = vld [vmem:[#allocation12 + $0xd0] ss:$8 sps:$4 sm:$0xff]  }
  0xd3   :  { %604 = vmatpush2.bf16.msra.mxu1 %v5867_v43  ;;  %843 = vmatpush1.bf16.msra.mxu0 %v5892_v61  ;;  %v5933_v43 = vld [vmem:[#allocation12 + $0x54] ss:$8 sps:$4 sm:$0xff]   ;;  %v5960_v61 = vld [vmem:[#allocation12 + $0xc4] ss:$8 sps:$4 sm:$0xff]  }
  0xd4   :  { %605 = vmatprep.subr.bf16.mxu1 %v5868_v44  ;;  %844 = vmatprep.subr.bf16.mxu0 %v5897_v62  ;;  %v5931_v44 = vld [vmem:[#allocation12 + $0x50] ss:$8 sps:$4 sm:$0xff]   ;;  %v5958_v62 = vld [vmem:[#allocation12 + $0xc0] ss:$8 sps:$4 sm:$0xff]  }
  0xd7   :  { %606 = vmatpush2.bf16.msra.mxu1 %v5870_v45  ;;  %845 = vmatpush1.bf16.msra.mxu0 %v5895_v63  ;;  %v5936_v45 = vld [vmem:[#allocation12 + $0x44] ss:$8 sps:$4 sm:$0xff]   ;;  %v5963_v63 = vld [vmem:[#allocation12 + $0xb4] ss:$8 sps:$4 sm:$0xff]  }
  0xd8   :  { %607 = vmatprep.subr.bf16.mxu1 %v5871_v46  ;;  %846 = vmatprep.subr.bf16.mxu0 %v5900_v0  ;;  %v5934_v46 = vld [vmem:[#allocation12 + $0x40] ss:$8 sps:$4 sm:$0xff]   ;;  %v5961_v0 = vld [vmem:[#allocation12 + $0xb0] ss:$8 sps:$4 sm:$0xff]  }
  0xdb   :  { %608 = vmatpush2.bf16.msra.mxu1 %v5873_v47  ;;  %847 = vmatpush1.bf16.msra.mxu0 %v5898_v1  ;;  %v5939_v47 = vld [vmem:[#allocation12 + $0x34] ss:$8 sps:$4 sm:$0xff]  }
  0xdc   :  { %609 = vmatprep.subr.bf16.mxu1 %v5874_v48  ;;  %848 = vmatprep.subr.bf16.mxu0 %v5903_v2  ;;  %v5937_v48 = vld [vmem:[#allocation12 + $0x30] ss:$8 sps:$4 sm:$0xff]   ;;  %v407_v1 = vld [vmem:[#allocation7] sm:$0x3] }
  0xdf   :  { %610 = vmatpush2.bf16.msra.mxu1 %v5876_v49  ;;  %849 = vmatpush2.bf16.msra.mxu0 %v5901_v3  ;;  %v5942_v49 = vld [vmem:[#allocation12 + $0x24] ss:$8 sps:$4 sm:$0xff]   ;;  %v416_v3 = vrot.slane %v407_v1, %v6990_v15 }
  0xe0   :  { %850 = vmatprep.subr.bf16.mxu0 %v5906_v4  ;;  %1085 = vmatprep.subr.bf16.mxu1 %v5927_v40  ;;  %v412_v4 = vrot.slane %v407_v1, %v6987_v14  ;;  %v6011_v40 = vld [vmem:[#allocation15 + $0x94] ss:$72 sps:$4 sm:$0xff]  }
  0xe3   :  { %851 = vmatpush2.bf16.msra.mxu0 %v5904_v5 }
  0xe4   :  { %852 = vmatprep.subr.bf16.mxu0 %v5909_v6 }
  0xe7   :  { %853 = vmatpush2.bf16.msra.mxu0 %v5907_v7 }
  0xe8   :  { %854 = vmatprep.subr.bf16.mxu0 %v5912_v8 }
  0xeb   :  { %855 = vmatpush2.bf16.msra.mxu0 %v5910_v9 }
  0xec   :  { %856 = vmatprep.subr.bf16.mxu0 %v5915_v10 }
  0xef   :  { %857 = vmatpush2.bf16.msra.mxu0 %v5913_v11 }
  0xf0   :  { %858 = vmatprep.subr.bf16.mxu0 %v5918_v33  ;;  %v5985_v33 = vld [vmem:[#allocation15 + $0x2d0] ss:$72 sps:$4 sm:$0xff]  }
  0xf3   :  { %859 = vmatpush2.bf16.msra.mxu0 %v5916_v34  ;;  %v5993_v34 = vld [vmem:[#allocation15 + $0x244] ss:$72 sps:$4 sm:$0xff]  }
  0xf4   :  { %860 = vmatprep.subr.bf16.mxu0 %v5921_v35  ;;  %v5991_v35 = vld [vmem:[#allocation15 + $0x240] ss:$72 sps:$4 sm:$0xff]  }
  0xf7   :  { %861 = vmatpush2.bf16.msra.mxu0 %v5919_v36  ;;  %v5999_v36 = vld [vmem:[#allocation15 + $0x1b4] ss:$72 sps:$4 sm:$0xff]  }
  0xf8   :  { %862 = vmatprep.subr.bf16.mxu0 %v5924_v37  ;;  %v5997_v37 = vld [vmem:[#allocation15 + $0x1b0] ss:$72 sps:$4 sm:$0xff]  }
  0xfb   :  { %863 = vmatpush2.bf16.msra.mxu0 %v5922_v38  ;;  %v6005_v38 = vld [vmem:[#allocation15 + $0x124] ss:$72 sps:$4 sm:$0xff]  }
 0x17e   :  { %v360_v18 = vpop.f32.mrf.mxu0 }
 0x17f   :  { %v361_v21 = vadd.f32 %v360_v18, %v233_v17 }
 0x180   :  { %v362_v20 = vpop.f32.mrf.mxu0 }
 0x181   :  { %v363_v23 = vadd.f32 %v362_v20, %v237_v19  ;;  %v369_v26 = vmax.f32 %v361_v21, 0.0  ;;  %v5966_v21 = vld [vmem:[#allocation12 + $0xa4] ss:$8 sps:$4 sm:$0xff]  }
 0x182   :  { %v364_v22 = vpop.f32.mrf.mxu0 }
 0x183   :  { %v365_v24 = vadd.f32 %v364_v22, %v233_v17  ;;  %v370_v29 = vmax.f32 %v363_v23, 0.0  ;;  %v5964_v22 = vld [vmem:[#allocation12 + $0xa0] ss:$8 sps:$4 sm:$0xff]   ;;  %v5969_v23 = vld [vmem:[#allocation12 + $0x94] ss:$8 sps:$4 sm:$0xff]  }
 0x184   :  { %v366_v25 = vpop.f32.mrf.mxu0 }
 0x185   :  { %v371_v27 = vmax.f32 %v365_v24, 0.0  ;;  %v367_v28 = vadd.f32 %v366_v25, %v237_v19  ;;  %v5967_v24 = vld [vmem:[#allocation12 + $0x90] ss:$8 sps:$4 sm:$0xff]   ;;  %v5972_v25 = vld [vmem:[#allocation12 + $0x84] ss:$8 sps:$4 sm:$0xff]  }
 0x187   :  { %v372_v30 = vmax.f32 %v367_v28, 0.0  ;;  %v373_v32 = vpack.c.bf16 %v371_v27, %v369_v26  ;;  %v5970_v26 = vld [vmem:[#allocation12 + $0x80] ss:$8 sps:$4 sm:$0xff]   ;;  %v5973_v27 = vld [vmem:[#allocation15 + $0x3f0] ss:$72 sps:$4 sm:$0xff]  }
 0x188   :  { %v5975_v28 = vld [vmem:[#allocation15 + $0x3f4] ss:$72 sps:$4 sm:$0xff]  }
 0x189   :  { %v374_v31 = vpack.c.bf16 %v372_v30, %v370_v29  ;;  %v5978_v29 = vld [vmem:[#allocation15 + $0x3fc] ss:$72 sps:$4 sm:$0xff]   ;;  %2958 = vmatprep.subr.bf16.mxu0 %v5975_v28  ;;  %v6030_v28 = vld [vmem:[#allocation15 + $0x7e8] ss:$72 sps:$4 sm:$0xff]  }
 0x18a   :  { %v5981_v30 = vld [vmem:[#allocation15 + $0x364] ss:$72 sps:$4 sm:$0xff]  }
 0x18b   :  { %611 = vmatprep.mubr.bf16.mxu1 %v374_v31  ;;  %v5979_v31 = vld [vmem:[#allocation15 + $0x360] ss:$72 sps:$4 sm:$0xff]  }
 0x18c   :  { %612 = vmatmul.mubr.bf16.vlgmr.msra.gmra.mxu1 %v373_v32  ;;  %v5987_v32 = vld [vmem:[#allocation15 + $0x2d4] ss:$72 sps:$4 sm:$0xff]  }
 0x18d   :  { %1086 = vmatpush1.bf16.msra.mxu1 %v5925_v39  ;;  %v6003_v39 = vld [vmem:[#allocation15 + $0x120] ss:$72 sps:$4 sm:$0xff]  }
 0x18e   :  { %1087 = vmatprep.subr.bf16.mxu1 %v5930_v41  ;;  %v6009_v41 = vld [vmem:[#allocation15 + $0x90] ss:$72 sps:$4 sm:$0xff]  }
 0x191   :  { %1088 = vmatpush1.bf16.msra.mxu1 %v5928_v42  ;;  %v6017_v42 = vld [vmem:[#allocation15 + $0x4] ss:$72 sps:$4 sm:$0xff]  }
 0x192   :  { %1089 = vmatprep.subr.bf16.mxu1 %v5933_v43  ;;  %v6015_v43 = vld [vmem:[#allocation15] ss:$72 sps:$4 sm:$0xff]  }
 0x195   :  { %1090 = vmatpush1.bf16.msra.mxu1 %v5931_v44  ;;  %v6023_v44 = vld [vmem:[#allocation15 + $0x874] ss:$72 sps:$4 sm:$0xff]  }
 0x196   :  { %1091 = vmatprep.subr.bf16.mxu1 %v5936_v45  ;;  %v6021_v45 = vld [vmem:[#allocation15 + $0x870] ss:$72 sps:$4 sm:$0xff]  }
 0x199   :  { %1092 = vmatpush1.bf16.msra.mxu1 %v5934_v46  ;;  %v6029_v46 = vld [vmem:[#allocation15 + $0x7e4] ss:$72 sps:$4 sm:$0xff]  }
 0x19a   :  { %1093 = vmatprep.subr.bf16.mxu1 %v5939_v47  ;;  %v6027_v47 = vld [vmem:[#allocation15 + $0x7e0] ss:$72 sps:$4 sm:$0xff]  }
 0x19d   :  { %1094 = vmatpush1.bf16.msra.mxu1 %v5937_v48  ;;  %v6035_v48 = vld [vmem:[#allocation15 + $0x754] ss:$72 sps:$4 sm:$0xff]  }
 0x19e   :  { %1095 = vmatprep.subr.bf16.mxu1 %v5942_v49  ;;  %v6033_v49 = vld [vmem:[#allocation15 + $0x750] ss:$72 sps:$4 sm:$0xff]  }
 0x1a1   :  { %1096 = vmatpush1.bf16.msra.mxu1 %v5940_v50  ;;  %v6041_v50 = vld [vmem:[#allocation15 + $0x6c4] ss:$72 sps:$4 sm:$0xff]  }
 0x1a2   :  { %1097 = vmatprep.subr.bf16.mxu1 %v5945_v51  ;;  %v6039_v51 = vld [vmem:[#allocation15 + $0x6c0] ss:$72 sps:$4 sm:$0xff]  }
 0x1a5   :  { %1098 = vmatpush1.bf16.msra.mxu1 %v5943_v52  ;;  %v6047_v52 = vld [vmem:[#allocation15 + $0x634] ss:$72 sps:$4 sm:$0xff]  }
 0x1a6   :  { %1099 = vmatprep.subr.bf16.mxu1 %v5948_v53  ;;  %v6045_v53 = vld [vmem:[#allocation15 + $0x630] ss:$72 sps:$4 sm:$0xff]  }
 0x1a9   :  { %1100 = vmatpush1.bf16.msra.mxu1 %v5946_v54  ;;  %v660_v54 = vld [vmem:[#allocation10] sm:$0x3] }
 0x1aa   :  { %1101 = vmatprep.subr.bf16.mxu1 %v5951_v55 }
 0x1ad   :  { %1102 = vmatpush2.bf16.msra.mxu1 %v5949_v56  ;;  %v669_v56 = vrot.slane %v660_v54, %v6990_v15 }
 0x1ae   :  { %1103 = vmatprep.subr.bf16.mxu1 %v5954_v57  ;;  %v665_v57 = vrot.slane %v660_v54, %v6987_v14 }
 0x1b1   :  { %1104 = vmatpush2.bf16.msra.mxu1 %v5952_v58 }
 0x1b2   :  { %1105 = vmatprep.subr.bf16.mxu1 %v5957_v59 }
 0x1b5   :  { %1106 = vmatpush2.bf16.msra.mxu1 %v5955_v60 }
 0x1b6   :  { %1107 = vmatprep.subr.bf16.mxu1 %v5960_v61 }
 0x1b9   :  { %1108 = vmatpush2.bf16.msra.mxu1 %v5958_v62 }
 0x1ba   :  { %1109 = vmatprep.subr.bf16.mxu1 %v5963_v63 }
 0x1bd   :  { %1110 = vmatpush2.bf16.msra.mxu1 %v5961_v0 }
 0x1be   :  { %1111 = vmatprep.subr.bf16.mxu1 %v5966_v21  ;;  %v6014_v21 = vld [vmem:[#allocation15 + $0x9c] ss:$72 sps:$4 sm:$0xff]  }
 0x1c1   :  { %1112 = vmatpush2.bf16.msra.mxu1 %v5964_v22  ;;  %v6012_v22 = vld [vmem:[#allocation15 + $0x98] ss:$72 sps:$4 sm:$0xff]  }
 0x1c2   :  { %1113 = vmatprep.subr.bf16.mxu1 %v5969_v23  ;;  %v6020_v23 = vld [vmem:[#allocation15 + $0xc] ss:$72 sps:$4 sm:$0xff]  }
 0x1c5   :  { %1114 = vmatpush2.bf16.msra.mxu1 %v5967_v24  ;;  %v6018_v24 = vld [vmem:[#allocation15 + $0x8] ss:$72 sps:$4 sm:$0xff]  }
 0x1c6   :  { %1115 = vmatprep.subr.bf16.mxu1 %v5972_v25  ;;  %v6026_v25 = vld [vmem:[#allocation15 + $0x87c] ss:$72 sps:$4 sm:$0xff]  }
 0x1c9   :  { %1116 = vmatpush2.bf16.msra.mxu1 %v5970_v26  ;;  %v6024_v26 = vld [vmem:[#allocation15 + $0x878] ss:$72 sps:$4 sm:$0xff]  }
 0x1ca   :  { %3001 = vmatprep.subr.bf16.mxu1 %v5978_v29  ;;  %v6038_v29 = vld [vmem:[#allocation15 + $0x75c] ss:$72 sps:$4 sm:$0xff]  }
 0x24c   :  { %v613_v2 = vpop.f32.mrf.mxu1 }
 0x24d   :  { %v614_v9 = vadd.f32 %v613_v2, %v412_v4 }
 0x24e   :  { %v615_v5 = vpop.f32.mrf.mxu1 }
 0x24f   :  { %v616_v7 = vadd.f32 %v615_v5, %v416_v3  ;;  %v622_v18 = vmax.f32 %v614_v9, 0.0  ;;  %v5982_v9 = vld [vmem:[#allocation15 + $0x368] ss:$72 sps:$4 sm:$0xff]  }
 0x250   :  { %v617_v6 = vpop.f32.mrf.mxu1 }
 0x251   :  { %v618_v8 = vadd.f32 %v617_v6, %v412_v4  ;;  %v623_v16 = vmax.f32 %v616_v7, 0.0  ;;  %v5976_v6 = vld [vmem:[#allocation15 + $0x3f8] ss:$72 sps:$4 sm:$0xff]  }
 0x252   :  { %v619_v10 = vpop.f32.mrf.mxu1 }
 0x253   :  { %v620_v11 = vadd.f32 %v619_v10, %v416_v3  ;;  %v624_v12 = vmax.f32 %v618_v8, 0.0  ;;  %v5984_v8 = vld [vmem:[#allocation15 + $0x36c] ss:$72 sps:$4 sm:$0xff]   ;;  %v5990_v10 = vld [vmem:[#allocation15 + $0x2dc] ss:$72 sps:$4 sm:$0xff]  }
 0x255   :  { %v625_v17 = vmax.f32 %v620_v11, 0.0  ;;  %v626_v20 = vpack.c.bf16 %v624_v12, %v622_v18  ;;  %v5988_v11 = vld [vmem:[#allocation15 + $0x2d8] ss:$72 sps:$4 sm:$0xff]   ;;  %v5996_v12 = vld [vmem:[#allocation15 + $0x24c] ss:$72 sps:$4 sm:$0xff]  }
 0x256   :  { %v6000_v18 = vld [vmem:[#allocation15 + $0x1b8] ss:$72 sps:$4 sm:$0xff]  }
 0x257   :  { %v627_v19 = vpack.c.bf16 %v625_v17, %v623_v16  ;;  %v5994_v16 = vld [vmem:[#allocation15 + $0x248] ss:$72 sps:$4 sm:$0xff]   ;;  %v6002_v17 = vld [vmem:[#allocation15 + $0x1bc] ss:$72 sps:$4 sm:$0xff]  }
 0x259   :  { %864 = vmatprep.mubr.bf16.mxu0 %v627_v19  ;;  %v6008_v19 = vld [vmem:[#allocation15 + $0x12c] ss:$72 sps:$4 sm:$0xff]  }
 0x25a   :  { %865 = vmatmul.mubr.bf16.vlgmr.msra.gmra.mxu0 %v626_v20  ;;  %v6006_v20 = vld [vmem:[#allocation15 + $0x128] ss:$72 sps:$4 sm:$0xff]  }
 0x25b   :  { %2959 = vmatpush1.bf16.msra.mxu0 %v5973_v27  ;;  %v6032_v27 = vld [vmem:[#allocation15 + $0x7ec] ss:$72 sps:$4 sm:$0xff]  }
 0x25c   :  { %2960 = vmatprep.subr.bf16.mxu0 %v5981_v30  ;;  %v6036_v30 = vld [vmem:[#allocation15 + $0x758] ss:$72 sps:$4 sm:$0xff]  }
 0x25f   :  { %2961 = vmatpush1.bf16.msra.mxu0 %v5979_v31  ;;  %v6044_v31 = vld [vmem:[#allocation15 + $0x6cc] ss:$72 sps:$4 sm:$0xff]  }
 0x260   :  { %2962 = vmatprep.subr.bf16.mxu0 %v5987_v32  ;;  %v6042_v32 = vld [vmem:[#allocation15 + $0x6c8] ss:$72 sps:$4 sm:$0xff]  }
 0x263   :  { %2963 = vmatpush1.bf16.msra.mxu0 %v5985_v33  ;;  %v6050_v33 = vld [vmem:[#allocation15 + $0x63c] ss:$72 sps:$4 sm:$0xff]  }
 0x264   :  { %2964 = vmatprep.subr.bf16.mxu0 %v5993_v34  ;;  %v6048_v34 = vld [vmem:[#allocation15 + $0x638] ss:$72 sps:$4 sm:$0xff]  }
 0x267   :  { %2965 = vmatpush1.bf16.msra.mxu0 %v5991_v35  ;;  %v6053_v35 = vld [vmem:[#allocation15 + $0x5a4] ss:$72 sps:$4 sm:$0xff]  }
 0x268   :  { %2966 = vmatprep.subr.bf16.mxu0 %v5999_v36  ;;  %v6056_v36 = vld [vmem:[#allocation15 + $0x5ac] ss:$72 sps:$4 sm:$0xff]  }
 0x26b   :  { %2967 = vmatpush1.bf16.msra.mxu0 %v5997_v37  ;;  %v6051_v37 = vld [vmem:[#allocation15 + $0x5a0] ss:$72 sps:$4 sm:$0xff]  }
 0x26c   :  { %2968 = vmatprep.subr.bf16.mxu0 %v6005_v38  ;;  %v6054_v38 = vld [vmem:[#allocation15 + $0x5a8] ss:$72 sps:$4 sm:$0xff]  }
 0x26f   :  { %2969 = vmatpush1.bf16.msra.mxu0 %v6003_v39  ;;  %v6059_v39 = vld [vmem:[#allocation15 + $0x514] ss:$72 sps:$4 sm:$0xff]  }
 0x270   :  { %2970 = vmatprep.subr.bf16.mxu0 %v6011_v40  ;;  %v6062_v40 = vld [vmem:[#allocation15 + $0x51c] ss:$72 sps:$4 sm:$0xff]  }
 0x273   :  { %2971 = vmatpush1.bf16.msra.mxu0 %v6009_v41  ;;  %v6057_v41 = vld [vmem:[#allocation15 + $0x510] ss:$72 sps:$4 sm:$0xff]  }
 0x274   :  { %2972 = vmatprep.subr.bf16.mxu0 %v6017_v42  ;;  %v6060_v42 = vld [vmem:[#allocation15 + $0x518] ss:$72 sps:$4 sm:$0xff]  }
 0x277   :  { %2973 = vmatpush1.bf16.msra.mxu0 %v6015_v43  ;;  %v6065_v43 = vld [vmem:[#allocation15 + $0x484] ss:$72 sps:$4 sm:$0xff]  }
 0x278   :  { %2974 = vmatprep.subr.bf16.mxu0 %v6023_v44  ;;  %v6068_v44 = vld [vmem:[#allocation15 + $0x48c] ss:$72 sps:$4 sm:$0xff]  }
 0x27b   :  { %2975 = vmatpush2.bf16.msra.mxu0 %v6021_v45  ;;  %v6063_v45 = vld [vmem:[#allocation15 + $0x480] ss:$72 sps:$4 sm:$0xff]  }
 0x27c   :  { %2976 = vmatprep.subr.bf16.mxu0 %v6029_v46  ;;  %v6066_v46 = vld [vmem:[#allocation15 + $0x488] ss:$72 sps:$4 sm:$0xff]  }
 0x27f   :  { %2977 = vmatpush2.bf16.msra.mxu0 %v6027_v47  ;;  %v6071_v47 = vld [vmem:[#allocation15 + $0x404] ss:$72 sps:$4 sm:$0xff]  }
 0x280   :  { %2978 = vmatprep.subr.bf16.mxu0 %v6035_v48  ;;  %v6074_v48 = vld [vmem:[#allocation15 + $0x40c] ss:$72 sps:$4 sm:$0xff]  }
 0x283   :  { %2979 = vmatpush2.bf16.msra.mxu0 %v6033_v49  ;;  %v913_v49 = vld [vmem:[#allocation13] sm:$0x3] }
 0x284   :  { %2980 = vmatprep.subr.bf16.mxu0 %v6041_v50 }
 0x287   :  { %2981 = vmatpush2.bf16.msra.mxu0 %v6039_v51  ;;  %v922_v51 = vrot.slane %v913_v49, %v6990_v15 }
 0x288   :  { %2982 = vmatprep.subr.bf16.mxu0 %v6047_v52  ;;  %v918_v52 = vrot.slane %v913_v49, %v6987_v14  ;;  %v6135_v49 = vld [vmem:[#allocation15 + $0x6d0] ss:$72 sps:$4 sm:$0xff]  }
 0x28b   :  { %2983 = vmatpush2.bf16.msra.mxu0 %v6045_v53 }
 0x28c   :  { %2984 = vmatprep.subr.bf16.mxu0 %v6053_v35  ;;  %v6119_v35 = vld [vmem:[#allocation15 + $0x884] ss:$72 sps:$4 sm:$0xff]  }
 0x28f   :  { %2985 = vmatpush2.bf16.msra.mxu0 %v6051_v37  ;;  %v6117_v37 = vld [vmem:[#allocation15 + $0x880] ss:$72 sps:$4 sm:$0xff]  }
 0x290   :  { %2986 = vmatprep.subr.bf16.mxu0 %v6059_v39  ;;  %v6125_v39 = vld [vmem:[#allocation15 + $0x7f4] ss:$72 sps:$4 sm:$0xff]  }
 0x293   :  { %2987 = vmatpush2.bf16.msra.mxu0 %v6057_v41  ;;  %v6123_v41 = vld [vmem:[#allocation15 + $0x7f0] ss:$72 sps:$4 sm:$0xff]  }
 0x294   :  { %2988 = vmatprep.subr.bf16.mxu0 %v6065_v43  ;;  %v6131_v43 = vld [vmem:[#allocation15 + $0x764] ss:$72 sps:$4 sm:$0xff]  }
 0x297   :  { %2989 = vmatpush2.bf16.msra.mxu0 %v6063_v45  ;;  %v6129_v45 = vld [vmem:[#allocation15 + $0x760] ss:$72 sps:$4 sm:$0xff]  }
 0x298   :  { %3044 = vmatprep.subr.bf16.mxu0 %v6071_v47  ;;  %v6137_v47 = vld [vmem:[#allocation15 + $0x6d4] ss:$72 sps:$4 sm:$0xff]  }
 0x31a   :  { %v866_v55 = vpop.f32.mrf.mxu0 }
 0x31b   :  { %v867_v62 = vadd.f32 %v866_v55, %v665_v57 }
 0x31c   :  { %v868_v58 = vpop.f32.mrf.mxu0 }
 0x31d   :  { %v869_v60 = vadd.f32 %v868_v58, %v669_v56  ;;  %v875_v4 = vmax.f32 %v867_v62, 0.0 }
 0x31e   :  { %v870_v59 = vpop.f32.mrf.mxu0 }
 0x31f   :  { %v871_v61 = vadd.f32 %v870_v59, %v665_v57  ;;  %v876_v2 = vmax.f32 %v869_v60, 0.0 }
 0x320   :  { %v872_v63 = vpop.f32.mrf.mxu0 }
 0x321   :  { %v873_v0 = vadd.f32 %v872_v63, %v669_v56  ;;  %v877_v1 = vmax.f32 %v871_v61, 0.0 }
 0x323   :  { %v878_v3 = vmax.f32 %v873_v0, 0.0  ;;  %v879_v7 = vpack.c.bf16 %v877_v1, %v875_v4  ;;  %v6069_v1 = vld [vmem:[#allocation15 + $0x400] ss:$72 sps:$4 sm:$0xff]   ;;  %v6077_v4 = vld [vmem:[#allocation15 + $0x374] ss:$72 sps:$4 sm:$0xff]  }
 0x325   :  { %v880_v5 = vpack.c.bf16 %v878_v3, %v876_v2  ;;  %v6072_v2 = vld [vmem:[#allocation15 + $0x408] ss:$72 sps:$4 sm:$0xff]  }
 0x327   :  { %1117 = vmatprep.mubr.bf16.mxu1 %v880_v5  ;;  %v6080_v5 = vld [vmem:[#allocation15 + $0x37c] ss:$72 sps:$4 sm:$0xff]  }
 0x328   :  { %1118 = vmatmul.mubr.bf16.vlgmr.msra.gmra.mxu1 %v879_v7  ;;  %v6078_v7 = vld [vmem:[#allocation15 + $0x378] ss:$72 sps:$4 sm:$0xff]  }
 0x329   :  { %3002 = vmatpush1.bf16.msra.mxu1 %v5976_v6  ;;  %v6075_v6 = vld [vmem:[#allocation15 + $0x370] ss:$72 sps:$4 sm:$0xff]  }
 0x32a   :  { %3003 = vmatprep.subr.bf16.mxu1 %v5984_v8  ;;  %v6083_v8 = vld [vmem:[#allocation15 + $0x2e4] ss:$72 sps:$4 sm:$0xff]  }
 0x32d   :  { %3004 = vmatpush1.bf16.msra.mxu1 %v5982_v9  ;;  %v6086_v9 = vld [vmem:[#allocation15 + $0x2ec] ss:$72 sps:$4 sm:$0xff]  }
 0x32e   :  { %3005 = vmatprep.subr.bf16.mxu1 %v5990_v10  ;;  %v6081_v10 = vld [vmem:[#allocation15 + $0x2e0] ss:$72 sps:$4 sm:$0xff]  }
 0x331   :  { %3006 = vmatpush1.bf16.msra.mxu1 %v5988_v11  ;;  %v6084_v11 = vld [vmem:[#allocation15 + $0x2e8] ss:$72 sps:$4 sm:$0xff]  }
 0x332   :  { %3007 = vmatprep.subr.bf16.mxu1 %v5996_v12  ;;  %v6089_v12 = vld [vmem:[#allocation15 + $0x254] ss:$72 sps:$4 sm:$0xff]  }
 0x335   :  { %3008 = vmatpush1.bf16.msra.mxu1 %v5994_v16  ;;  %v6092_v16 = vld [vmem:[#allocation15 + $0x25c] ss:$72 sps:$4 sm:$0xff]  }
 0x336   :  { %3009 = vmatprep.subr.bf16.mxu1 %v6002_v17  ;;  %v6087_v17 = vld [vmem:[#allocation15 + $0x250] ss:$72 sps:$4 sm:$0xff]  }
 0x339   :  { %3010 = vmatpush1.bf16.msra.mxu1 %v6000_v18  ;;  %v6090_v18 = vld [vmem:[#allocation15 + $0x258] ss:$72 sps:$4 sm:$0xff]  }
 0x33a   :  { %3011 = vmatprep.subr.bf16.mxu1 %v6008_v19  ;;  %v6095_v19 = vld [vmem:[#allocation15 + $0x1c4] ss:$72 sps:$4 sm:$0xff]  }
 0x33d   :  { %3012 = vmatpush1.bf16.msra.mxu1 %v6006_v20  ;;  %v6098_v20 = vld [vmem:[#allocation15 + $0x1cc] ss:$72 sps:$4 sm:$0xff]  }
 0x33e   :  { %3013 = vmatprep.subr.bf16.mxu1 %v6014_v21  ;;  %v6093_v21 = vld [vmem:[#allocation15 + $0x1c0] ss:$72 sps:$4 sm:$0xff]  }
 0x341   :  { %3014 = vmatpush1.bf16.msra.mxu1 %v6012_v22  ;;  %v6096_v22 = vld [vmem:[#allocation15 + $0x1c8] ss:$72 sps:$4 sm:$0xff]  }
 0x342   :  { %3015 = vmatprep.subr.bf16.mxu1 %v6020_v23  ;;  %v6101_v23 = vld [vmem:[#allocation15 + $0x134] ss:$72 sps:$4 sm:$0xff]  }
 0x345   :  { %3016 = vmatpush1.bf16.msra.mxu1 %v6018_v24  ;;  %v6104_v24 = vld [vmem:[#allocation15 + $0x13c] ss:$72 sps:$4 sm:$0xff]  }
 0x346   :  { %3017 = vmatprep.subr.bf16.mxu1 %v6026_v25  ;;  %v6099_v25 = vld [vmem:[#allocation15 + $0x130] ss:$72 sps:$4 sm:$0xff]  }
 0x349   :  { %3018 = vmatpush2.bf16.msra.mxu1 %v6024_v26  ;;  %v6102_v26 = vld [vmem:[#allocation15 + $0x138] ss:$72 sps:$4 sm:$0xff]  }
 0x34a   :  { %3019 = vmatprep.subr.bf16.mxu1 %v6032_v27  ;;  %v6107_v27 = vld [vmem:[#allocation15 + $0xa4] ss:$72 sps:$4 sm:$0xff]  }
 0x34d   :  { %3020 = vmatpush2.bf16.msra.mxu1 %v6030_v28  ;;  %v6110_v28 = vld [vmem:[#allocation15 + $0xac] ss:$72 sps:$4 sm:$0xff]  }
 0x34e   :  { %3021 = vmatprep.subr.bf16.mxu1 %v6038_v29  ;;  %v6105_v29 = vld [vmem:[#allocation15 + $0xa0] ss:$72 sps:$4 sm:$0xff]  }
 0x351   :  { %3022 = vmatpush2.bf16.msra.mxu1 %v6036_v30  ;;  %v6108_v30 = vld [vmem:[#allocation15 + $0xa8] ss:$72 sps:$4 sm:$0xff]  }
 0x352   :  { %3023 = vmatprep.subr.bf16.mxu1 %v6044_v31  ;;  %v6113_v31 = vld [vmem:[#allocation15 + $0x14] ss:$72 sps:$4 sm:$0xff]  }
 0x355   :  { %3024 = vmatpush2.bf16.msra.mxu1 %v6042_v32  ;;  %v6116_v32 = vld [vmem:[#allocation15 + $0x1c] ss:$72 sps:$4 sm:$0xff]  }
 0x356   :  { %3025 = vmatprep.subr.bf16.mxu1 %v6050_v33  ;;  %v6111_v33 = vld [vmem:[#allocation15 + $0x10] ss:$72 sps:$4 sm:$0xff]  }
 0x359   :  { %3026 = vmatpush2.bf16.msra.mxu1 %v6048_v34  ;;  %v6114_v34 = vld [vmem:[#allocation15 + $0x18] ss:$72 sps:$4 sm:$0xff]  }
 0x35a   :  { %3027 = vmatprep.subr.bf16.mxu1 %v6056_v36  ;;  %v6122_v36 = vld [vmem:[#allocation15 + $0x88c] ss:$72 sps:$4 sm:$0xff]  }
 0x35d   :  { %3028 = vmatpush2.bf16.msra.mxu1 %v6054_v38  ;;  %v6120_v38 = vld [vmem:[#allocation15 + $0x888] ss:$72 sps:$4 sm:$0xff]  }
 0x35e   :  { %3029 = vmatprep.subr.bf16.mxu1 %v6062_v40  ;;  %v6128_v40 = vld [vmem:[#allocation15 + $0x7fc] ss:$72 sps:$4 sm:$0xff]  }
 0x361   :  { %3030 = vmatpush2.bf16.msra.mxu1 %v6060_v42  ;;  %v6126_v42 = vld [vmem:[#allocation15 + $0x7f8] ss:$72 sps:$4 sm:$0xff]  }
 0x362   :  { %3031 = vmatprep.subr.bf16.mxu1 %v6068_v44  ;;  %v6134_v44 = vld [vmem:[#allocation15 + $0x76c] ss:$72 sps:$4 sm:$0xff]  }
 0x365   :  { %3032 = vmatpush2.bf16.msra.mxu1 %v6066_v46  ;;  %v6132_v46 = vld [vmem:[#allocation15 + $0x768] ss:$72 sps:$4 sm:$0xff]  }
 0x366   :  { %3087 = vmatprep.subr.bf16.mxu1 %v6074_v48  ;;  %v6140_v48 = vld [vmem:[#allocation15 + $0x6dc] ss:$72 sps:$4 sm:$0xff]  }
 0x3e8   :  { %v1119_v50 = vpop.f32.mrf.mxu1 }
 0x3e9   :  { %v1120_v57 = vadd.f32 %v1119_v50, %v918_v52  ;;  %v6138_v50 = vld [vmem:[#allocation15 + $0x6d8] ss:$72 sps:$4 sm:$0xff]  }
 0x3ea   :  { %v1121_v53 = vpop.f32.mrf.mxu1 }
 0x3eb   :  { %v1122_v55 = vadd.f32 %v1121_v53, %v922_v51  ;;  %v1128_v63 = vmax.f32 %v1120_v57, 0.0  ;;  %v6141_v53 = vld [vmem:[#allocation15 + $0x640] ss:$72 sps:$4 sm:$0xff]   ;;  %v6147_v57 = vld [vmem:[#allocation15 + $0x5b0] ss:$72 sps:$4 sm:$0xff]  }
 0x3ec   :  { %v1123_v54 = vpop.f32.mrf.mxu1 }
 0x3ed   :  { %v1124_v56 = vadd.f32 %v1123_v54, %v918_v52  ;;  %v1129_v61 = vmax.f32 %v1122_v55, 0.0  ;;  %v6146_v52 = vld [vmem:[#allocation15 + $0x64c] ss:$72 sps:$4 sm:$0xff]   ;;  %v6144_v54 = vld [vmem:[#allocation15 + $0x648] ss:$72 sps:$4 sm:$0xff]  }
 0x3ee   :  { %v1125_v58 = vpop.f32.mrf.mxu1  ;;  %v6149_v55 = vld [vmem:[#allocation15 + $0x5b4] ss:$72 sps:$4 sm:$0xff]  }
 0x3ef   :  { %v1126_v59 = vadd.f32 %v1125_v58, %v922_v51  ;;  %v1130_v60 = vmax.f32 %v1124_v56, 0.0  ;;  %v6143_v51 = vld [vmem:[#allocation15 + $0x644] ss:$72 sps:$4 sm:$0xff]   ;;  %v6150_v58 = vld [vmem:[#allocation15 + $0x5b8] ss:$72 sps:$4 sm:$0xff]  }
 0x3f0   :  { %v6152_v56 = vld [vmem:[#allocation15 + $0x5bc] ss:$72 sps:$4 sm:$0xff]  }
 0x3f1   :  { %v1131_v62 = vmax.f32 %v1126_v59, 0.0  ;;  %v7002_v3 = vpack.c.bf16 %v1130_v60, %v1128_v63  ;;  %v6155_v59 = vld [vmem:[#allocation15 + $0x524] ss:$72 sps:$4 sm:$0xff]   ;;  %v6161_v63 = vld [vmem:[#allocation15 + $0x494] ss:$72 sps:$4 sm:$0xff]  }
 0x3f2   :  { %v6158_v60 = vld [vmem:[#allocation15 + $0x52c] ss:$72 sps:$4 sm:$0xff]  }
 0x3f3   :  { %v7000_v0 = vpack.c.bf16 %v1131_v62, %v1129_v61  ;;  %v6153_v61 = vld [vmem:[#allocation15 + $0x520] ss:$72 sps:$4 sm:$0xff]  }
 0x3f4   :  { %v6156_v62 = vld [vmem:[#allocation15 + $0x528] ss:$72 sps:$4 sm:$0xff]  }
 0x3f5   :  { %2990 = vmatprep.mubr.bf16.mxu0 %v7000_v0  ;;  %3033 = vmatprep.mubr.bf16.mxu1 %v7000_v0 }
 0x3f6   :  { %2991 = vmatmul.mubr.bf16.vlgmr.msra.gmra.mxu0 %v7002_v3  ;;  %3034 = vmatmul.mubr.bf16.vlgmr.msra.gmra.mxu1 %v7002_v3 }
 0x3f7   :  { %3045 = vmatpush1.bf16.msra.mxu0 %v6069_v1  ;;  %3088 = vmatpush1.bf16.msra.mxu1 %v6072_v2  ;;  %v6164_v1 = vld [vmem:[#allocation15 + $0x49c] ss:$72 sps:$4 sm:$0xff]   ;;  %v6159_v2 = vld [vmem:[#allocation15 + $0x490] ss:$72 sps:$4 sm:$0xff]  }
 0x3f8   :  { %3076 = vmatprep.mubr.bf16.mxu0 %v7000_v0  ;;  %3119 = vmatprep.mubr.bf16.mxu1 %v7000_v0 }
 0x3f9   :  { %3046 = vmatprep.subr.bf16.mxu0 %v6077_v4  ;;  %3089 = vmatprep.subr.bf16.mxu1 %v6080_v5  ;;  %v6162_v4 = vld [vmem:[#allocation15 + $0x498] ss:$72 sps:$4 sm:$0xff]   ;;  %v6167_v5 = vld [vmem:[#allocation15 + $0x414] ss:$72 sps:$4 sm:$0xff]  }
 0x3fb   :  { %3047 = vmatpush1.bf16.msra.mxu0 %v6075_v6  ;;  %3090 = vmatpush1.bf16.msra.mxu1 %v6078_v7  ;;  %v6170_v6 = vld [vmem:[#allocation15 + $0x41c] ss:$72 sps:$4 sm:$0xff]   ;;  %v6165_v7 = vld [vmem:[#allocation15 + $0x410] ss:$72 sps:$4 sm:$0xff]  }
 0x3fc   :  { %3048 = vmatprep.subr.bf16.mxu0 %v6083_v8  ;;  %3091 = vmatprep.subr.bf16.mxu1 %v6086_v9  ;;  %v6168_v8 = vld [vmem:[#allocation15 + $0x418] ss:$72 sps:$4 sm:$0xff]   ;;  %v6173_v9 = vld [vmem:[#allocation15 + $0x384] ss:$72 sps:$4 sm:$0xff]  }
 0x3ff   :  { %3049 = vmatpush1.bf16.msra.mxu0 %v6081_v10  ;;  %3092 = vmatpush1.bf16.msra.mxu1 %v6084_v11  ;;  %v6176_v10 = vld [vmem:[#allocation15 + $0x38c] ss:$72 sps:$4 sm:$0xff]   ;;  %v6171_v11 = vld [vmem:[#allocation15 + $0x380] ss:$72 sps:$4 sm:$0xff]  }
 0x400   :  { %3050 = vmatprep.subr.bf16.mxu0 %v6089_v12  ;;  %3093 = vmatprep.subr.bf16.mxu1 %v6092_v16  ;;  %v6174_v12 = vld [vmem:[#allocation15 + $0x388] ss:$72 sps:$4 sm:$0xff]   ;;  %v6179_v16 = vld [vmem:[#allocation15 + $0x2f4] ss:$72 sps:$4 sm:$0xff]  }
 0x403   :  { %3051 = vmatpush1.bf16.msra.mxu0 %v6087_v17  ;;  %3094 = vmatpush1.bf16.msra.mxu1 %v6090_v18  ;;  %v6182_v17 = vld [vmem:[#allocation15 + $0x2fc] ss:$72 sps:$4 sm:$0xff]   ;;  %v6177_v18 = vld [vmem:[#allocation15 + $0x2f0] ss:$72 sps:$4 sm:$0xff]  }
 0x404   :  { %3052 = vmatprep.subr.bf16.mxu0 %v6095_v19  ;;  %3095 = vmatprep.subr.bf16.mxu1 %v6098_v20  ;;  %v6180_v19 = vld [vmem:[#allocation15 + $0x2f8] ss:$72 sps:$4 sm:$0xff]   ;;  %v6185_v20 = vld [vmem:[#allocation15 + $0x264] ss:$72 sps:$4 sm:$0xff]  }
 0x407   :  { %3053 = vmatpush1.bf16.msra.mxu0 %v6093_v21  ;;  %3096 = vmatpush1.bf16.msra.mxu1 %v6096_v22  ;;  %v6188_v21 = vld [vmem:[#allocation15 + $0x26c] ss:$72 sps:$4 sm:$0xff]   ;;  %v6183_v22 = vld [vmem:[#allocation15 + $0x260] ss:$72 sps:$4 sm:$0xff]  }
 0x408   :  { %3054 = vmatprep.subr.bf16.mxu0 %v6101_v23  ;;  %3097 = vmatprep.subr.bf16.mxu1 %v6104_v24  ;;  %v6186_v23 = vld [vmem:[#allocation15 + $0x268] ss:$72 sps:$4 sm:$0xff]   ;;  %v6191_v24 = vld [vmem:[#allocation15 + $0x1d4] ss:$72 sps:$4 sm:$0xff]  }
 0x40b   :  { %3055 = vmatpush1.bf16.msra.mxu0 %v6099_v25  ;;  %3098 = vmatpush1.bf16.msra.mxu1 %v6102_v26  ;;  %v6194_v25 = vld [vmem:[#allocation15 + $0x1dc] ss:$72 sps:$4 sm:$0xff]   ;;  %v6189_v26 = vld [vmem:[#allocation15 + $0x1d0] ss:$72 sps:$4 sm:$0xff]  }
 0x40c   :  { %3056 = vmatprep.subr.bf16.mxu0 %v6107_v27  ;;  %3099 = vmatprep.subr.bf16.mxu1 %v6110_v28  ;;  %v6192_v27 = vld [vmem:[#allocation15 + $0x1d8] ss:$72 sps:$4 sm:$0xff]   ;;  %v6197_v28 = vld [vmem:[#allocation15 + $0x144] ss:$72 sps:$4 sm:$0xff]  }
 0x40f   :  { %3057 = vmatpush1.bf16.msra.mxu0 %v6105_v29  ;;  %3100 = vmatpush1.bf16.msra.mxu1 %v6108_v30  ;;  %v6200_v29 = vld [vmem:[#allocation15 + $0x14c] ss:$72 sps:$4 sm:$0xff]   ;;  %v6195_v30 = vld [vmem:[#allocation15 + $0x140] ss:$72 sps:$4 sm:$0xff]  }
 0x410   :  { %3058 = vmatprep.subr.bf16.mxu0 %v6113_v31  ;;  %3101 = vmatprep.subr.bf16.mxu1 %v6116_v32  ;;  %v6198_v31 = vld [vmem:[#allocation15 + $0x148] ss:$72 sps:$4 sm:$0xff]   ;;  %v6203_v32 = vld [vmem:[#allocation15 + $0xb4] ss:$72 sps:$4 sm:$0xff]  }
 0x413   :  { %3059 = vmatpush1.bf16.msra.mxu0 %v6111_v33  ;;  %3102 = vmatpush1.bf16.msra.mxu1 %v6114_v34  ;;  %v6206_v33 = vld [vmem:[#allocation15 + $0xbc] ss:$72 sps:$4 sm:$0xff]   ;;  %v6201_v34 = vld [vmem:[#allocation15 + $0xb0] ss:$72 sps:$4 sm:$0xff]  }
 0x414   :  { %3060 = vmatprep.subr.bf16.mxu0 %v6119_v35  ;;  %3103 = vmatprep.subr.bf16.mxu1 %v6122_v36  ;;  %v6204_v35 = vld [vmem:[#allocation15 + $0xb8] ss:$72 sps:$4 sm:$0xff]   ;;  %v6209_v36 = vld [vmem:[#allocation15 + $0x24] ss:$72 sps:$4 sm:$0xff]  }
 0x417   :  { %3061 = vmatpush2.bf16.msra.mxu0 %v6117_v37  ;;  %3104 = vmatpush2.bf16.msra.mxu1 %v6120_v38  ;;  %v6212_v37 = vld [vmem:[#allocation15 + $0x2c] ss:$72 sps:$4 sm:$0xff]   ;;  %v6207_v38 = vld [vmem:[#allocation15 + $0x20] ss:$72 sps:$4 sm:$0xff]  }
 0x418   :  { %3062 = vmatprep.subr.bf16.mxu0 %v6125_v39  ;;  %3105 = vmatprep.subr.bf16.mxu1 %v6128_v40  ;;  %v6210_v39 = vld [vmem:[#allocation15 + $0x28] ss:$72 sps:$4 sm:$0xff]   ;;  %v6215_v40 = vld [vmem:[#allocation15 + $0x894] ss:$72 sps:$4 sm:$0xff]  }
 0x41b   :  { %3063 = vmatpush2.bf16.msra.mxu0 %v6123_v41  ;;  %3106 = vmatpush2.bf16.msra.mxu1 %v6126_v42  ;;  %v6218_v41 = vld [vmem:[#allocation15 + $0x89c] ss:$72 sps:$4 sm:$0xff]   ;;  %v6213_v42 = vld [vmem:[#allocation15 + $0x890] ss:$72 sps:$4 sm:$0xff]  }
 0x41c   :  { %3064 = vmatprep.subr.bf16.mxu0 %v6131_v43  ;;  %3107 = vmatprep.subr.bf16.mxu1 %v6134_v44  ;;  %v6216_v43 = vld [vmem:[#allocation15 + $0x898] ss:$72 sps:$4 sm:$0xff]   ;;  %v6221_v44 = vld [vmem:[#allocation15 + $0x804] ss:$72 sps:$4 sm:$0xff]  }
 0x41f   :  { %3065 = vmatpush2.bf16.msra.mxu0 %v6129_v45  ;;  %3108 = vmatpush2.bf16.msra.mxu1 %v6132_v46  ;;  %v6224_v45 = vld [vmem:[#allocation15 + $0x80c] ss:$72 sps:$4 sm:$0xff]   ;;  %v6219_v46 = vld [vmem:[#allocation15 + $0x800] ss:$72 sps:$4 sm:$0xff]  }
 0x420   :  { %3066 = vmatprep.subr.bf16.mxu0 %v6137_v47  ;;  %3109 = vmatprep.subr.bf16.mxu1 %v6140_v48  ;;  %v6222_v47 = vld [vmem:[#allocation15 + $0x808] ss:$72 sps:$4 sm:$0xff]   ;;  %v6227_v48 = vld [vmem:[#allocation15 + $0x774] ss:$72 sps:$4 sm:$0xff]  }
 0x423   :  { %3067 = vmatpush2.bf16.msra.mxu0 %v6135_v49  ;;  %3110 = vmatpush2.bf16.msra.mxu1 %v6138_v50  ;;  %v6230_v49 = vld [vmem:[#allocation15 + $0x77c] ss:$72 sps:$4 sm:$0xff]   ;;  %v6225_v50 = vld [vmem:[#allocation15 + $0x770] ss:$72 sps:$4 sm:$0xff]  }
 0x424   :  { %3068 = vmatprep.subr.bf16.mxu0 %v6143_v51  ;;  %3111 = vmatprep.subr.bf16.mxu1 %v6146_v52  ;;  %v6228_v51 = vld [vmem:[#allocation15 + $0x778] ss:$72 sps:$4 sm:$0xff]   ;;  %v6233_v52 = vld [vmem:[#allocation15 + $0x6e4] ss:$72 sps:$4 sm:$0xff]  }
 0x427   :  { %3069 = vmatpush2.bf16.msra.mxu0 %v6141_v53  ;;  %3112 = vmatpush2.bf16.msra.mxu1 %v6144_v54  ;;  %v6236_v53 = vld [vmem:[#allocation15 + $0x6ec] ss:$72 sps:$4 sm:$0xff]   ;;  %v6231_v54 = vld [vmem:[#allocation15 + $0x6e0] ss:$72 sps:$4 sm:$0xff]  }
 0x428   :  { %3070 = vmatprep.subr.bf16.mxu0 %v6149_v55  ;;  %3113 = vmatprep.subr.bf16.mxu1 %v6152_v56  ;;  %v6234_v55 = vld [vmem:[#allocation15 + $0x6e8] ss:$72 sps:$4 sm:$0xff]   ;;  %v6239_v56 = vld [vmem:[#allocation15 + $0x654] ss:$72 sps:$4 sm:$0xff]  }
 0x42b   :  { %3071 = vmatpush2.bf16.msra.mxu0 %v6147_v57  ;;  %3114 = vmatpush2.bf16.msra.mxu1 %v6150_v58  ;;  %v6242_v57 = vld [vmem:[#allocation15 + $0x65c] ss:$72 sps:$4 sm:$0xff]   ;;  %v6237_v58 = vld [vmem:[#allocation15 + $0x650] ss:$72 sps:$4 sm:$0xff]  }
 0x42c   :  { %3072 = vmatprep.subr.bf16.mxu0 %v6155_v59  ;;  %3115 = vmatprep.subr.bf16.mxu1 %v6158_v60  ;;  %v6240_v59 = vld [vmem:[#allocation15 + $0x658] ss:$72 sps:$4 sm:$0xff]   ;;  %v6245_v60 = vld [vmem:[#allocation15 + $0x5c4] ss:$72 sps:$4 sm:$0xff]  }
 0x42f   :  { %3073 = vmatpush2.bf16.msra.mxu0 %v6153_v61  ;;  %3116 = vmatpush2.bf16.msra.mxu1 %v6156_v62  ;;  %v6248_v61 = vld [vmem:[#allocation15 + $0x5cc] ss:$72 sps:$4 sm:$0xff]   ;;  %v6243_v62 = vld [vmem:[#allocation15 + $0x5c0] ss:$72 sps:$4 sm:$0xff]  }
 0x430   :  { %3074 = vmatprep.subr.bf16.mxu0 %v6161_v63  ;;  %3117 = vmatprep.subr.bf16.mxu1 %v6164_v1  ;;  %v6246_v63 = vld [vmem:[#allocation15 + $0x5c8] ss:$72 sps:$4 sm:$0xff]   ;;  %v6251_v1 = vld [vmem:[#allocation15 + $0x534] ss:$72 sps:$4 sm:$0xff]  }
 0x433   :  { %3075 = vmatpush2.bf16.msra.mxu0 %v6159_v2  ;;  %3118 = vmatpush2.bf16.msra.mxu1 %v6162_v4  ;;  %v6254_v2 = vld [vmem:[#allocation15 + $0x53c] ss:$72 sps:$4 sm:$0xff]   ;;  %v6249_v4 = vld [vmem:[#allocation15 + $0x530] ss:$72 sps:$4 sm:$0xff]  }
 0x434   :  { %3130 = vmatprep.subr.bf16.mxu0 %v6167_v5  ;;  %3173 = vmatprep.subr.bf16.mxu1 %v6170_v6  ;;  %v6252_v5 = vld [vmem:[#allocation15 + $0x538] ss:$72 sps:$4 sm:$0xff]   ;;  %v6257_v6 = vld [vmem:[#allocation15 + $0x4a4] ss:$72 sps:$4 sm:$0xff]  }
 0x436   :  { %3077 = vmatmul.mubr.bf16.vlgmr.msra.gmra.mxu0 %v7002_v3  ;;  %3120 = vmatmul.mubr.bf16.vlgmr.msra.gmra.mxu1 %v7002_v3 }
 0x437   :  { %3131 = vmatpush1.bf16.msra.mxu0 %v6165_v7  ;;  %3162 = vmatprep.mubr.bf16.mxu0 %v7000_v0  ;;  %v6260_v7 = vld [vmem:[#allocation15 + $0x4ac] ss:$72 sps:$4 sm:$0xff]  }
 0x438   :  { %3174 = vmatpush1.bf16.msra.mxu1 %v6168_v8  ;;  %3205 = vmatprep.mubr.bf16.mxu1 %v7000_v0  ;;  %v6255_v8 = vld [vmem:[#allocation15 + $0x4a0] ss:$72 sps:$4 sm:$0xff]  }
 0x439   :  { %3132 = vmatprep.subr.bf16.mxu0 %v6173_v9  ;;  %3175 = vmatprep.subr.bf16.mxu1 %v6176_v10  ;;  %v6258_v9 = vld [vmem:[#allocation15 + $0x4a8] ss:$72 sps:$4 sm:$0xff]   ;;  %v6263_v10 = vld [vmem:[#allocation15 + $0x424] ss:$72 sps:$4 sm:$0xff]  }
 0x43b   :  { %3133 = vmatpush1.bf16.msra.mxu0 %v6171_v11  ;;  %v6266_v11 = vld [vmem:[#allocation15 + $0x42c] ss:$72 sps:$4 sm:$0xff]  }
 0x43c   :  { %3176 = vmatpush1.bf16.msra.mxu1 %v6174_v12  ;;  %3134 = vmatprep.subr.bf16.mxu0 %v6179_v16  ;;  %v6261_v12 = vld [vmem:[#allocation15 + $0x420] ss:$72 sps:$4 sm:$0xff]  }
 0x43d   :  { %3177 = vmatprep.subr.bf16.mxu1 %v6182_v17  ;;  %v6264_v16 = vld [vmem:[#allocation15 + $0x428] ss:$72 sps:$4 sm:$0xff]   ;;  %v6269_v17 = vld [vmem:[#allocation15 + $0x394] ss:$72 sps:$4 sm:$0xff]  }
 0x43f   :  { %3135 = vmatpush1.bf16.msra.mxu0 %v6177_v18  ;;  %v6272_v18 = vld [vmem:[#allocation15 + $0x39c] ss:$72 sps:$4 sm:$0xff]  }
 0x440   :  { %3178 = vmatpush1.bf16.msra.mxu1 %v6180_v19  ;;  %3136 = vmatprep.subr.bf16.mxu0 %v6185_v20  ;;  %v6267_v19 = vld [vmem:[#allocation15 + $0x390] ss:$72 sps:$4 sm:$0xff]  }
 0x441   :  { %3179 = vmatprep.subr.bf16.mxu1 %v6188_v21  ;;  %v6270_v20 = vld [vmem:[#allocation15 + $0x398] ss:$72 sps:$4 sm:$0xff]   ;;  %v6275_v21 = vld [vmem:[#allocation15 + $0x304] ss:$72 sps:$4 sm:$0xff]  }
 0x443   :  { %3137 = vmatpush1.bf16.msra.mxu0 %v6183_v22  ;;  %v6278_v22 = vld [vmem:[#allocation15 + $0x30c] ss:$72 sps:$4 sm:$0xff]  }
 0x444   :  { %3180 = vmatpush1.bf16.msra.mxu1 %v6186_v23  ;;  %3138 = vmatprep.subr.bf16.mxu0 %v6191_v24  ;;  %v6273_v23 = vld [vmem:[#allocation15 + $0x300] ss:$72 sps:$4 sm:$0xff]  }
 0x445   :  { %3181 = vmatprep.subr.bf16.mxu1 %v6194_v25  ;;  %v6276_v24 = vld [vmem:[#allocation15 + $0x308] ss:$72 sps:$4 sm:$0xff]   ;;  %v6281_v25 = vld [vmem:[#allocation15 + $0x274] ss:$72 sps:$4 sm:$0xff]  }
 0x447   :  { %3139 = vmatpush1.bf16.msra.mxu0 %v6189_v26  ;;  %v6284_v26 = vld [vmem:[#allocation15 + $0x27c] ss:$72 sps:$4 sm:$0xff]  }
 0x448   :  { %3182 = vmatpush1.bf16.msra.mxu1 %v6192_v27  ;;  %3140 = vmatprep.subr.bf16.mxu0 %v6197_v28  ;;  %v6279_v27 = vld [vmem:[#allocation15 + $0x270] ss:$72 sps:$4 sm:$0xff]  }
 0x449   :  { %3183 = vmatprep.subr.bf16.mxu1 %v6200_v29  ;;  %v6282_v28 = vld [vmem:[#allocation15 + $0x278] ss:$72 sps:$4 sm:$0xff]   ;;  %v6287_v29 = vld [vmem:[#allocation15 + $0x1e4] ss:$72 sps:$4 sm:$0xff]  }
 0x44b   :  { %3141 = vmatpush1.bf16.msra.mxu0 %v6195_v30  ;;  %v6290_v30 = vld [vmem:[#allocation15 + $0x1ec] ss:$72 sps:$4 sm:$0xff]  }
 0x44c   :  { %3184 = vmatpush1.bf16.msra.mxu1 %v6198_v31  ;;  %3142 = vmatprep.subr.bf16.mxu0 %v6203_v32  ;;  %v6285_v31 = vld [vmem:[#allocation15 + $0x1e0] ss:$72 sps:$4 sm:$0xff]  }
 0x44d   :  { %3185 = vmatprep.subr.bf16.mxu1 %v6206_v33  ;;  %v6288_v32 = vld [vmem:[#allocation15 + $0x1e8] ss:$72 sps:$4 sm:$0xff]   ;;  %v6293_v33 = vld [vmem:[#allocation15 + $0x154] ss:$72 sps:$4 sm:$0xff]  }
 0x44f   :  { %3143 = vmatpush1.bf16.msra.mxu0 %v6201_v34  ;;  %v6296_v34 = vld [vmem:[#allocation15 + $0x15c] ss:$72 sps:$4 sm:$0xff]  }
 0x450   :  { %3186 = vmatpush1.bf16.msra.mxu1 %v6204_v35  ;;  %3144 = vmatprep.subr.bf16.mxu0 %v6209_v36  ;;  %v6291_v35 = vld [vmem:[#allocation15 + $0x150] ss:$72 sps:$4 sm:$0xff]  }
 0x451   :  { %3187 = vmatprep.subr.bf16.mxu1 %v6212_v37  ;;  %v6294_v36 = vld [vmem:[#allocation15 + $0x158] ss:$72 sps:$4 sm:$0xff]   ;;  %v6299_v37 = vld [vmem:[#allocation15 + $0xc4] ss:$72 sps:$4 sm:$0xff]  }
 0x453   :  { %3145 = vmatpush1.bf16.msra.mxu0 %v6207_v38  ;;  %v6302_v38 = vld [vmem:[#allocation15 + $0xcc] ss:$72 sps:$4 sm:$0xff]  }
 0x454   :  { %3188 = vmatpush1.bf16.msra.mxu1 %v6210_v39  ;;  %3146 = vmatprep.subr.bf16.mxu0 %v6215_v40  ;;  %v6297_v39 = vld [vmem:[#allocation15 + $0xc0] ss:$72 sps:$4 sm:$0xff]  }
 0x455   :  { %3189 = vmatprep.subr.bf16.mxu1 %v6218_v41  ;;  %v6300_v40 = vld [vmem:[#allocation15 + $0xc8] ss:$72 sps:$4 sm:$0xff]   ;;  %v6305_v41 = vld [vmem:[#allocation15 + $0x34] ss:$72 sps:$4 sm:$0xff]  }
 0x457   :  { %3147 = vmatpush2.bf16.msra.mxu0 %v6213_v42  ;;  %v6308_v42 = vld [vmem:[#allocation15 + $0x3c] ss:$72 sps:$4 sm:$0xff]  }
 0x458   :  { %3190 = vmatpush2.bf16.msra.mxu1 %v6216_v43  ;;  %3148 = vmatprep.subr.bf16.mxu0 %v6221_v44  ;;  %v6303_v43 = vld [vmem:[#allocation15 + $0x30] ss:$72 sps:$4 sm:$0xff]  }
 0x459   :  { %3191 = vmatprep.subr.bf16.mxu1 %v6224_v45  ;;  %v6306_v44 = vld [vmem:[#allocation15 + $0x38] ss:$72 sps:$4 sm:$0xff]   ;;  %v6311_v45 = vld [vmem:[#allocation15 + $0x8a4] ss:$72 sps:$4 sm:$0xff]  }
 0x45b   :  { %3149 = vmatpush2.bf16.msra.mxu0 %v6219_v46  ;;  %v6314_v46 = vld [vmem:[#allocation15 + $0x8ac] ss:$72 sps:$4 sm:$0xff]  }
 0x45c   :  { %3192 = vmatpush2.bf16.msra.mxu1 %v6222_v47  ;;  %3150 = vmatprep.subr.bf16.mxu0 %v6227_v48  ;;  %v6309_v47 = vld [vmem:[#allocation15 + $0x8a0] ss:$72 sps:$4 sm:$0xff]  }
 0x45d   :  { %3193 = vmatprep.subr.bf16.mxu1 %v6230_v49  ;;  %v6312_v48 = vld [vmem:[#allocation15 + $0x8a8] ss:$72 sps:$4 sm:$0xff]   ;;  %v6317_v49 = vld [vmem:[#allocation15 + $0x814] ss:$72 sps:$4 sm:$0xff]  }
 0x45f   :  { %3151 = vmatpush2.bf16.msra.mxu0 %v6225_v50  ;;  %v6320_v50 = vld [vmem:[#allocation15 + $0x81c] ss:$72 sps:$4 sm:$0xff]  }
 0x460   :  { %3194 = vmatpush2.bf16.msra.mxu1 %v6228_v51  ;;  %3152 = vmatprep.subr.bf16.mxu0 %v6233_v52  ;;  %v6315_v51 = vld [vmem:[#allocation15 + $0x810] ss:$72 sps:$4 sm:$0xff]  }
 0x461   :  { %3195 = vmatprep.subr.bf16.mxu1 %v6236_v53  ;;  %v6318_v52 = vld [vmem:[#allocation15 + $0x818] ss:$72 sps:$4 sm:$0xff]   ;;  %v6323_v53 = vld [vmem:[#allocation15 + $0x784] ss:$72 sps:$4 sm:$0xff]  }
 0x463   :  { %3153 = vmatpush2.bf16.msra.mxu0 %v6231_v54  ;;  %v6326_v54 = vld [vmem:[#allocation15 + $0x78c] ss:$72 sps:$4 sm:$0xff]  }
 0x464   :  { %3196 = vmatpush2.bf16.msra.mxu1 %v6234_v55  ;;  %3154 = vmatprep.subr.bf16.mxu0 %v6239_v56  ;;  %v6321_v55 = vld [vmem:[#allocation15 + $0x780] ss:$72 sps:$4 sm:$0xff]  }
 0x465   :  { %3197 = vmatprep.subr.bf16.mxu1 %v6242_v57  ;;  %v6324_v56 = vld [vmem:[#allocation15 + $0x788] ss:$72 sps:$4 sm:$0xff]   ;;  %v6329_v57 = vld [vmem:[#allocation15 + $0x6f4] ss:$72 sps:$4 sm:$0xff]  }
 0x467   :  { %3155 = vmatpush2.bf16.msra.mxu0 %v6237_v58  ;;  %v6332_v58 = vld [vmem:[#allocation15 + $0x6fc] ss:$72 sps:$4 sm:$0xff]  }
 0x468   :  { %3198 = vmatpush2.bf16.msra.mxu1 %v6240_v59  ;;  %3156 = vmatprep.subr.bf16.mxu0 %v6245_v60  ;;  %v6327_v59 = vld [vmem:[#allocation15 + $0x6f0] ss:$72 sps:$4 sm:$0xff]  }
 0x469   :  { %3199 = vmatprep.subr.bf16.mxu1 %v6248_v61  ;;  %v6330_v60 = vld [vmem:[#allocation15 + $0x6f8] ss:$72 sps:$4 sm:$0xff]   ;;  %v6335_v61 = vld [vmem:[#allocation15 + $0x664] ss:$72 sps:$4 sm:$0xff]  }
 0x46b   :  { %3157 = vmatpush2.bf16.msra.mxu0 %v6243_v62  ;;  %v6338_v62 = vld [vmem:[#allocation15 + $0x66c] ss:$72 sps:$4 sm:$0xff]  }
 0x46c   :  { %3200 = vmatpush2.bf16.msra.mxu1 %v6246_v63  ;;  %3158 = vmatprep.subr.bf16.mxu0 %v6251_v1  ;;  %v6333_v63 = vld [vmem:[#allocation15 + $0x660] ss:$72 sps:$4 sm:$0xff]  }
 0x46d   :  { %3201 = vmatprep.subr.bf16.mxu1 %v6254_v2  ;;  %v6336_v1 = vld [vmem:[#allocation15 + $0x668] ss:$72 sps:$4 sm:$0xff]   ;;  %v6341_v2 = vld [vmem:[#allocation15 + $0x5d4] ss:$72 sps:$4 sm:$0xff]  }
 0x46f   :  { %3159 = vmatpush2.bf16.msra.mxu0 %v6249_v4  ;;  %v6344_v4 = vld [vmem:[#allocation15 + $0x5dc] ss:$72 sps:$4 sm:$0xff]  }
 0x470   :  { %3202 = vmatpush2.bf16.msra.mxu1 %v6252_v5  ;;  %3160 = vmatprep.subr.bf16.mxu0 %v6257_v6  ;;  %v6339_v5 = vld [vmem:[#allocation15 + $0x5d0] ss:$72 sps:$4 sm:$0xff]  }
 0x471   :  { %3203 = vmatprep.subr.bf16.mxu1 %v6260_v7  ;;  %v6342_v6 = vld [vmem:[#allocation15 + $0x5d8] ss:$72 sps:$4 sm:$0xff]   ;;  %v6347_v7 = vld [vmem:[#allocation15 + $0x544] ss:$72 sps:$4 sm:$0xff]  }
 0x473   :  { %3161 = vmatpush2.bf16.msra.mxu0 %v6255_v8  ;;  %v6350_v8 = vld [vmem:[#allocation15 + $0x54c] ss:$72 sps:$4 sm:$0xff]  }
 0x474   :  { %3204 = vmatpush2.bf16.msra.mxu1 %v6258_v9  ;;  %3216 = vmatprep.subr.bf16.mxu0 %v6263_v10  ;;  %v6345_v9 = vld [vmem:[#allocation15 + $0x540] ss:$72 sps:$4 sm:$0xff]  }
 0x475   :  { %3259 = vmatprep.subr.bf16.mxu1 %v6266_v11  ;;  %v6348_v10 = vld [vmem:[#allocation15 + $0x548] ss:$72 sps:$4 sm:$0xff]   ;;  %v6353_v11 = vld [vmem:[#allocation15 + $0x4b4] ss:$72 sps:$4 sm:$0xff]  }
 0x476   :  { %3163 = vmatmul.mubr.bf16.vlgmr.msra.gmra.mxu0 %v7002_v3 }
 0x477   :  { %3206 = vmatmul.mubr.bf16.vlgmr.msra.gmra.mxu1 %v7002_v3  ;;  %3217 = vmatpush1.bf16.msra.mxu0 %v6261_v12  ;;  %v6356_v12 = vld [vmem:[#allocation15 + $0x4bc] ss:$72 sps:$4 sm:$0xff]  }
 0x478   :  { %3248 = vmatprep.mubr.bf16.mxu0 %v7000_v0  ;;  %3260 = vmatpush1.bf16.msra.mxu1 %v6264_v16  ;;  %v6351_v16 = vld [vmem:[#allocation15 + $0x4b0] ss:$72 sps:$4 sm:$0xff]  }
 0x479   :  { %3291 = vmatprep.mubr.bf16.mxu1 %v7000_v0  ;;  %3218 = vmatprep.subr.bf16.mxu0 %v6269_v17  ;;  %v6354_v17 = vld [vmem:[#allocation15 + $0x4b8] ss:$72 sps:$4 sm:$0xff]  }
 0x47a   :  { %3261 = vmatprep.subr.bf16.mxu1 %v6272_v18  ;;  %v6359_v18 = vld [vmem:[#allocation15 + $0x434] ss:$72 sps:$4 sm:$0xff]  }
 0x47b   :  { %3219 = vmatpush1.bf16.msra.mxu0 %v6267_v19  ;;  %v6360_v19 = vld [vmem:[#allocation18 + $0x78] sm:$0xff]  }
 0x47c   :  { %3262 = vmatpush1.bf16.msra.mxu1 %v6270_v20  ;;  %3220 = vmatprep.subr.bf16.mxu0 %v6275_v21  ;;  %v6357_v20 = vld [vmem:[#allocation15 + $0x430] ss:$72 sps:$4 sm:$0xff]  }
 0x47d   :  { %3263 = vmatprep.subr.bf16.mxu1 %v6278_v22  ;;  %v6361_v21 = vld [vmem:[#allocation18 + $0x38] sm:$0xff]  }
 0x47e   :  { %v6364_v22 = vld [vmem:[#allocation15 + $0x3a4] ss:$72 sps:$4 sm:$0xff]  }
 0x47f   :  { %3221 = vmatpush1.bf16.msra.mxu0 %v6273_v23  ;;  %v6365_v23 = vld [vmem:[#allocation18 + $0x70] sm:$0xff]  }
 0x480   :  { %3264 = vmatpush1.bf16.msra.mxu1 %v6276_v24  ;;  %3222 = vmatprep.subr.bf16.mxu0 %v6281_v25  ;;  %v7019_v24 = vld [vmem:[#allocation16] sm:$0xff] }
 0x481   :  { %3265 = vmatprep.subr.bf16.mxu1 %v6284_v26  ;;  %v1435_v26 = vrot.slane %v7019_v24, %v6990_v15 }
 0x483   :  { %3223 = vmatpush1.bf16.msra.mxu0 %v6279_v27  ;;  %v6362_v27 = vld [vmem:[#allocation15 + $0x3a0] ss:$72 sps:$4 sm:$0xff]  }
 0x484   :  { %3266 = vmatpush1.bf16.msra.mxu1 %v6282_v28  ;;  %3224 = vmatprep.subr.bf16.mxu0 %v6287_v29  ;;  %v6366_v29 = vld [vmem:[#allocation18 + $0x30] sm:$0xff]  }
 0x485   :  { %3267 = vmatprep.subr.bf16.mxu1 %v6290_v30  ;;  %v6369_v30 = vld [vmem:[#allocation15 + $0x314] ss:$72 sps:$4 sm:$0xff]  }
 0x487   :  { %3225 = vmatpush1.bf16.msra.mxu0 %v6285_v31  ;;  %v6370_v31 = vld [vmem:[#allocation18 + $0x68] sm:$0xff]  }
 0x488   :  { %3268 = vmatpush1.bf16.msra.mxu1 %v6288_v32  ;;  %3226 = vmatprep.subr.bf16.mxu0 %v6293_v33 }
 0x489   :  { %3269 = vmatprep.subr.bf16.mxu1 %v6296_v34  ;;  %v6367_v34 = vld [vmem:[#allocation15 + $0x310] ss:$72 sps:$4 sm:$0xff]  }
 0x48b   :  { %3227 = vmatpush1.bf16.msra.mxu0 %v6291_v35 }
 0x48c   :  { %3270 = vmatpush1.bf16.msra.mxu1 %v6294_v36  ;;  %3228 = vmatprep.subr.bf16.mxu0 %v6299_v37  ;;  %v6371_v36 = vld [vmem:[#allocation18 + $0x28] sm:$0xff]   ;;  %v6374_v37 = vld [vmem:[#allocation15 + $0x284] ss:$72 sps:$4 sm:$0xff]  }
 0x48d   :  { %3271 = vmatprep.subr.bf16.mxu1 %v6302_v38 }
 0x48f   :  { %3229 = vmatpush1.bf16.msra.mxu0 %v6297_v39  ;;  %v6375_v39 = vld [vmem:[#allocation18 + $0x60] sm:$0xff]  }
 0x490   :  { %3272 = vmatpush1.bf16.msra.mxu1 %v6300_v40  ;;  %3230 = vmatprep.subr.bf16.mxu0 %v6305_v41  ;;  %v6372_v41 = vld [vmem:[#allocation15 + $0x280] ss:$72 sps:$4 sm:$0xff]  }
 0x491   :  { %3273 = vmatprep.subr.bf16.mxu1 %v6308_v42  ;;  %v6376_v42 = vld [vmem:[#allocation18 + $0x20] sm:$0xff]  }
 0x493   :  { %3231 = vmatpush1.bf16.msra.mxu0 %v6303_v43  ;;  %v6379_v43 = vld [vmem:[#allocation15 + $0x1f4] ss:$72 sps:$4 sm:$0xff]  }
 0x494   :  { %3274 = vmatpush1.bf16.msra.mxu1 %v6306_v44  ;;  %3232 = vmatprep.subr.bf16.mxu0 %v6311_v45  ;;  %v6380_v45 = vld [vmem:[#allocation18 + $0x58] sm:$0xff]  }
 0x495   :  { %3275 = vmatprep.subr.bf16.mxu1 %v6314_v46  ;;  %v6377_v46 = vld [vmem:[#allocation15 + $0x1f0] ss:$72 sps:$4 sm:$0xff]  }
 0x497   :  { %3233 = vmatpush2.bf16.msra.mxu0 %v6309_v47  ;;  %v6381_v47 = vld [vmem:[#allocation18 + $0x18] sm:$0xff]  }
 0x498   :  { %3276 = vmatpush2.bf16.msra.mxu1 %v6312_v48  ;;  %3234 = vmatprep.subr.bf16.mxu0 %v6317_v49  ;;  %v6384_v48 = vld [vmem:[#allocation15 + $0x164] ss:$72 sps:$4 sm:$0xff]  }
 0x499   :  { %3277 = vmatprep.subr.bf16.mxu1 %v6320_v50  ;;  %v6385_v49 = vld [vmem:[#allocation18 + $0x50] sm:$0xff]  }
 0x49a   :  { %v6382_v50 = vld [vmem:[#allocation15 + $0x160] ss:$72 sps:$4 sm:$0xff]  }
 0x49b   :  { %3235 = vmatpush2.bf16.msra.mxu0 %v6315_v51  ;;  %v6386_v51 = vld [vmem:[#allocation18 + $0x10] sm:$0xff]  }
 0x49c   :  { %3278 = vmatpush2.bf16.msra.mxu1 %v6318_v52  ;;  %3236 = vmatprep.subr.bf16.mxu0 %v6323_v53  ;;  %v6389_v52 = vld [vmem:[#allocation15 + $0xd4] ss:$72 sps:$4 sm:$0xff]  }
 0x49d   :  { %3279 = vmatprep.subr.bf16.mxu1 %v6326_v54  ;;  %v6390_v53 = vld [vmem:[#allocation18 + $0x48] sm:$0xff]   ;;  %v1431_v54 = vrot.slane %v7019_v24, %v6987_v14 }
 0x49f   :  { %3237 = vmatpush2.bf16.msra.mxu0 %v6321_v55  ;;  %v6387_v55 = vld [vmem:[#allocation15 + $0xd0] ss:$72 sps:$4 sm:$0xff]  }
 0x4a0   :  { %3280 = vmatpush2.bf16.msra.mxu1 %v6324_v56  ;;  %3238 = vmatprep.subr.bf16.mxu0 %v6329_v57  ;;  %v6391_v56 = vld [vmem:[#allocation18 + $0x8] sm:$0xff]   ;;  %v6394_v57 = vld [vmem:[#allocation15 + $0x44] ss:$72 sps:$4 sm:$0xff]  }
 0x4a1   :  { %3281 = vmatprep.subr.bf16.mxu1 %v6332_v58 }
 0x4a3   :  { %3239 = vmatpush2.bf16.msra.mxu0 %v6327_v59  ;;  %v6395_v59 = vld [vmem:[#allocation18 + $0x40] sm:$0xff]  }
 0x4a4   :  { %3282 = vmatpush2.bf16.msra.mxu1 %v6330_v60  ;;  %3240 = vmatprep.subr.bf16.mxu0 %v6335_v61  ;;  %v6392_v61 = vld [vmem:[#allocation15 + $0x40] ss:$72 sps:$4 sm:$0xff]  }
 0x4a5   :  { %3283 = vmatprep.subr.bf16.mxu1 %v6338_v62  ;;  %v6396_v62 = vld [vmem:[#allocation18] sm:$0xff]  }
 0x4a7   :  { %3241 = vmatpush2.bf16.msra.mxu0 %v6333_v63  ;;  %v6399_v63 = vld [vmem:[#allocation15 + $0x8b4] ss:$72 sps:$4 sm:$0xff]  }
 0x4a8   :  { %3284 = vmatpush2.bf16.msra.mxu1 %v6336_v1  ;;  %3242 = vmatprep.subr.bf16.mxu0 %v6341_v2  ;;  %v6409_v2 = vld [vmem:[#allocation18 + $0x178] sm:$0xff]  }
 0x4a9   :  { %3285 = vmatprep.subr.bf16.mxu1 %v6344_v4 }
 0x4ab   :  { %3243 = vmatpush2.bf16.msra.mxu0 %v6339_v5  ;;  %v6397_v5 = vld [vmem:[#allocation15 + $0x8b0] ss:$72 sps:$4 sm:$0xff]  }
 0x4ac   :  { %3286 = vmatpush2.bf16.msra.mxu1 %v6342_v6  ;;  %3244 = vmatprep.subr.bf16.mxu0 %v6347_v7  ;;  %v6402_v6 = vld [vmem:[#allocation15 + $0x824] ss:$72 sps:$4 sm:$0xff]  }
 0x4ad   :  { %3287 = vmatprep.subr.bf16.mxu1 %v6350_v8  ;;  %v6410_v7 = vld [vmem:[#allocation18 + $0x138] sm:$0xff]  }
 0x4af   :  { %3245 = vmatpush2.bf16.msra.mxu0 %v6345_v9  ;;  %v6414_v9 = vld [vmem:[#allocation18 + $0x170] sm:$0xff]  }
 0x4b0   :  { %3288 = vmatpush2.bf16.msra.mxu1 %v6348_v10  ;;  %3246 = vmatprep.subr.bf16.mxu0 %v6353_v11  ;;  %v6400_v10 = vld [vmem:[#allocation15 + $0x820] ss:$72 sps:$4 sm:$0xff]   ;;  %v6405_v11 = vld [vmem:[#allocation15 + $0x794] ss:$72 sps:$4 sm:$0xff]  }
 0x4b1   :  { %3289 = vmatprep.subr.bf16.mxu1 %v6356_v12  ;;  %v6415_v12 = vld [vmem:[#allocation18 + $0x130] sm:$0xff]  }
 0x4b3   :  { %3247 = vmatpush2.bf16.msra.mxu0 %v6351_v16  ;;  %v6419_v16 = vld [vmem:[#allocation18 + $0x168] sm:$0xff]  }
 0x4b4   :  { %3290 = vmatpush2.bf16.msra.mxu1 %v6354_v17  ;;  %3302 = vmatprep.subr.bf16.mxu0 %v6359_v18  ;;  %v6403_v17 = vld [vmem:[#allocation15 + $0x790] ss:$72 sps:$4 sm:$0xff]   ;;  %v6408_v18 = vld [vmem:[#allocation15 + $0x704] ss:$72 sps:$4 sm:$0xff]  }
 0x4b5   :  { %5582 = vmatprep.subr.bf16.mxu1 %v6360_v19  ;;  %v6420_v19 = vld [vmem:[#allocation18 + $0x128] sm:$0xff]  }
 0x4b6   :  { %3249 = vmatmul.mubr.bf16.vlgmr.msra.gmra.mxu0 %v7002_v3  ;;  %v7021_v25 = vpop.f32.mrf.mxu0 }
 0x4b7   :  { %3292 = vmatmul.mubr.bf16.vlgmr.msra.gmra.mxu1 %v7002_v3  ;;  %3303 = vmatpush1.bf16.msra.mxu0 %v6357_v20  ;;  %v2993_v60 = vadd.f32 %v7021_v25, %v1431_v54  ;;  %v6424_v20 = vld [vmem:[#allocation18 + $0x160] sm:$0xff]  }
 0x4b8   :  { %3334 = vmatprep.mubr.bf16.mxu0 %v7000_v0  ;;  %5583 = vmatpush3.bf16.msra.mxu1 %v6361_v21  ;;  %v2994_v28 = vpop.f32.mrf.mxu0  ;;  %v7030_v21 = vpop.f32.mrf.mxu1  ;;  %v6425_v25 = vld [vmem:[#allocation18 + $0x120] sm:$0xff]  }
 0x4b9   :  { %3304 = vmatprep.subr.bf16.mxu0 %v6364_v22  ;;  %5584 = vmatprep.subr.bf16.mxu1 %v6365_v23  ;;  %v2995_v33 = vadd.f32 %v2994_v28, %v1435_v26  ;;  %v3345_v4 = vmax.f32 %v2993_v60, 0.0  ;;  %v6406_v22 = vld [vmem:[#allocation15 + $0x700] ss:$72 sps:$4 sm:$0xff]   ;;  %v6413_v23 = vld [vmem:[#allocation15 + $0x674] ss:$72 sps:$4 sm:$0xff]  }
 0x4ba   :  { %v2996_v32 = vpop.f32.mrf.mxu0  ;;  %v6411_v28 = vld [vmem:[#allocation15 + $0x670] ss:$72 sps:$4 sm:$0xff]  }
 0x4bb   :  { %3305 = vmatpush1.bf16.msra.mxu0 %v6362_v27  ;;  %v3346_v0 = vmax.f32 %v2995_v33, 0.0  ;;  %v2997_v58 = vadd.f32 %v2996_v32, %v1431_v54  ;;  %v3037_v27 = vpop.f32.mrf.mxu1  ;;  %v1442_v33 = vsub.s32 3, %v6984_v13  ;;  %v6435_v54 = vld [vmem:[#allocation18 + $0xf0] sm:$0xff]  }
 0x4bc   :  { %5585 = vmatpush3.bf16.msra.mxu1 %v6366_v29  ;;  %v2998_v35 = vpop.f32.mrf.mxu0  ;;  %3306 = vmatprep.subr.bf16.mxu0 %v6369_v30  ;;  %v6418_v29 = vld [vmem:[#allocation15 + $0x5e4] ss:$72 sps:$4 sm:$0xff]  }
 0x4bd   :  { %v2999_v38 = vadd.f32 %v2998_v35, %v1435_v26  ;;  %5586 = vmatprep.subr.bf16.mxu1 %v6370_v31  ;;  %v3363_v1 = vmax.f32 %v2997_v58, 0.0  ;;  %v6429_v26 = vld [vmem:[#allocation18 + $0x158] sm:$0xff]   ;;  %v6433_v31 = vld [vmem:[#allocation18 + $0x150] sm:$0xff]   ;;  %v7032_v32 = vpop.f32.mrf.mxu1  ;;  %v6423_v35 = vld [vmem:[#allocation15 + $0x554] ss:$72 sps:$4 sm:$0xff]  }
 0x4be   :  { %v6430_v30 = vld [vmem:[#allocation18 + $0x118] sm:$0xff]   ;;  %v6436_v58 = vld [vmem:[#allocation18 + $0xb0] sm:$0xff]  }
 0x4bf   :  { %v3364_v40 = vmax.f32 %v2999_v38, 0.0  ;;  %3307 = vmatpush1.bf16.msra.mxu0 %v6367_v34  ;;  %v3381_v8 = vpack.c.bf16 %v3363_v1, %v3345_v4  ;;  %v6416_v34 = vld [vmem:[#allocation15 + $0x5e0] ss:$72 sps:$4 sm:$0xff]   ;;  %v3041_v38 = vpop.f32.mrf.mxu1 }
 0x4c0   :  { %5587 = vmatpush3.bf16.msra.mxu1 %v6371_v36  ;;  %3308 = vmatprep.subr.bf16.mxu0 %v6374_v37  ;;  %v6434_v36 = vld [vmem:[#allocation18 + $0x110] sm:$0xff]   ;;  %v6437_v37 = vld [vmem:[#allocation18 + $0x148] sm:$0xff]  }
 0x4c1   :  { %v3382_v44 = vpack.c.bf16 %v3364_v40, %v3346_v0  ;;  %5588 = vmatprep.subr.bf16.mxu1 %v6375_v39  ;;  %v1443_v39 = vrot.slane %v7019_v24, %v1442_v33  ;;  %v6421_v0 = vld [vmem:[#allocation15 + $0x550] ss:$72 sps:$4 sm:$0xff]   ;;  %v6428_v40 = vld [vmem:[#allocation15 + $0x4c4] ss:$72 sps:$4 sm:$0xff]  }
 0x4c3   :  { %3309 = vmatpush1.bf16.msra.mxu0 %v6372_v41  ;;  %4590 = vmatprep.mubr.bf16.mxu1 %v3382_v44  ;;  %v6438_v41 = vld [vmem:[#allocation18 + $0x108] sm:$0xff]   ;;  %v3038_v44 = vadd.f32 %v3037_v27, %v1443_v39  ;;  %v1438_v27 = vsub.s32 2, %v6984_v13 }
 0x4c4   :  { %5589 = vmatpush3.bf16.msra.mxu1 %v6376_v42  ;;  %3310 = vmatprep.subr.bf16.mxu0 %v6379_v43  ;;  %v3042_v42 = vadd.f32 %v3041_v38, %v1443_v39  ;;  %v6441_v43 = vld [vmem:[#allocation18 + $0x140] sm:$0xff]  }
 0x4c5   :  { %5590 = vmatprep.subr.bf16.mxu1 %v6380_v45  ;;  %v6426_v45 = vld [vmem:[#allocation15 + $0x4c0] ss:$72 sps:$4 sm:$0xff]   ;;  %v6473_v38 = vld [vmem:[#allocation18 + $0x260] sm:$0xff]  }
 0x4c7   :  { %3311 = vmatpush1.bf16.msra.mxu0 %v6377_v46  ;;  %v6431_v46 = vld [vmem:[#allocation18 + $0xf8] sm:$0xff]  }
 0x4c8   :  { %5591 = vmatpush3.bf16.msra.mxu1 %v6381_v47  ;;  %3312 = vmatprep.subr.bf16.mxu0 %v6384_v48  ;;  %v6442_v47 = vld [vmem:[#allocation18 + $0x100] sm:$0xff]   ;;  %v3366_v48 = vmax.f32 %v3042_v42, 0.0 }
 0x4c9   :  { %5592 = vmatprep.subr.bf16.mxu1 %v6385_v49  ;;  %v6461_v49 = vld [vmem:[#allocation18 + $0x278] sm:$0xff]  }
 0x4cb   :  { %3313 = vmatpush1.bf16.msra.mxu0 %v6382_v50  ;;  %v3348_v50 = vmax.f32 %v3038_v44, 0.0 }
 0x4cc   :  { %5593 = vmatpush3.bf16.msra.mxu1 %v6386_v51  ;;  %3314 = vmatprep.subr.bf16.mxu0 %v6389_v52  ;;  %v6432_v51 = vld [vmem:[#allocation18 + $0xb8] sm:$0xff]   ;;  %v1450_v52 = vsub.s32 5, %v6984_v13 }
 0x4cd   :  { %5594 = vmatprep.subr.bf16.mxu1 %v6390_v53  ;;  %v1446_v53 = vsub.s32 4, %v6984_v13 }
 0x4cf   :  { %3315 = vmatpush1.bf16.msra.mxu0 %v6387_v55  ;;  %v3384_v55 = vpack.c.bf16 %v3366_v48, %v3348_v50 }
 0x4d0   :  { %5595 = vmatpush3.bf16.msra.mxu1 %v6391_v56  ;;  %3316 = vmatprep.subr.bf16.mxu0 %v6394_v57  ;;  %v1451_v57 = vrot.slane %v7019_v24, %v1450_v52 }
 0x4d1   :  { %5596 = vmatprep.subr.bf16.mxu1 %v6395_v59  ;;  %v1447_v59 = vrot.slane %v7019_v24, %v1446_v53 }
 0x4d3   :  { %3317 = vmatpush1.bf16.msra.mxu0 %v6392_v61  ;;  %v6439_v61 = vld [vmem:[#allocation18 + $0xe8] sm:$0xff]  }
 0x4d4   :  { %5597 = vmatpush3.bf16.msra.mxu1 %v6396_v62  ;;  %3318 = vmatprep.subr.bf16.mxu0 %v6399_v63 }
 0x4d5   :  { %5626 = vmatprep.subr.bf16.mxu1 %v6409_v2  ;;  %v6440_v2 = vld [vmem:[#allocation18 + $0xa8] sm:$0xff]  }
 0x4d7   :  { %4591 = vmatmul.mubr.bf16.vlgmr.msra.gmra.mxu1 %v3381_v8  ;;  %3319 = vmatpush2.bf16.msra.mxu0 %v6397_v5  ;;  %v6443_v5 = vld [vmem:[#allocation18 + $0xe0] sm:$0xff]  }
 0x4d8   :  { %3320 = vmatprep.subr.bf16.mxu0 %v6402_v6  ;;  %5627 = vmatpush3.bf16.msra.mxu1 %v6410_v7 }
 0x4d9   :  { %5628 = vmatprep.subr.bf16.mxu1 %v6414_v9 }
 0x4db   :  { %3321 = vmatpush2.bf16.msra.mxu0 %v6400_v10 }
 0x4dc   :  { %3322 = vmatprep.subr.bf16.mxu0 %v6405_v11  ;;  %5629 = vmatpush3.bf16.msra.mxu1 %v6415_v12  ;;  %v6444_v11 = vld [vmem:[#allocation18 + $0xa0] sm:$0xff]  }
 0x4dd   :  { %5630 = vmatprep.subr.bf16.mxu1 %v6419_v16  ;;  %v6445_v16 = vld [vmem:[#allocation18 + $0xd8] sm:$0xff]  }
 0x4df   :  { %3323 = vmatpush2.bf16.msra.mxu0 %v6403_v17 }
 0x4e0   :  { %3324 = vmatprep.subr.bf16.mxu0 %v6408_v18  ;;  %5631 = vmatpush3.bf16.msra.mxu1 %v6420_v19  ;;  %v6462_v18 = vld [vmem:[#allocation18 + $0x238] sm:$0xff]  }
 0x4e1   :  { %5632 = vmatprep.subr.bf16.mxu1 %v6424_v20 }
 0x4e3   :  { %3325 = vmatpush2.bf16.msra.mxu0 %v6406_v22  ;;  %v6465_v22 = vld [vmem:[#allocation18 + $0x270] sm:$0xff]  }
 0x4e4   :  { %3326 = vmatprep.subr.bf16.mxu0 %v6413_v23  ;;  %5633 = vmatpush3.bf16.msra.mxu1 %v6425_v25  ;;  %v6446_v23 = vld [vmem:[#allocation18 + $0x98] sm:$0xff]   ;;  %v6447_v25 = vld [vmem:[#allocation18 + $0xd0] sm:$0xff]  }
 0x4e5   :  { %5634 = vmatprep.subr.bf16.mxu1 %v6429_v26  ;;  %v6466_v26 = vld [vmem:[#allocation18 + $0x230] sm:$0xff]  }
 0x4e7   :  { %3327 = vmatpush2.bf16.msra.mxu0 %v6411_v28 }
 0x4e8   :  { %3328 = vmatprep.subr.bf16.mxu0 %v6418_v29  ;;  %5635 = vmatpush3.bf16.msra.mxu1 %v6430_v30  ;;  %v6469_v29 = vld [vmem:[#allocation18 + $0x268] sm:$0xff]   ;;  %v1458_v30 = vsub.s32 7, %v6984_v13 }
 0x4e9   :  { %5636 = vmatprep.subr.bf16.mxu1 %v6433_v31  ;;  %v6448_v31 = vld [vmem:[#allocation18 + $0x90] sm:$0xff]  }
 0x4ea   :  { %v1459_v39 = vrot.slane %v7019_v24, %v1458_v30 }
 0x4eb   :  { %3329 = vmatpush2.bf16.msra.mxu0 %v6416_v34  ;;  %v6449_v34 = vld [vmem:[#allocation18 + $0xc8] sm:$0xff]  }
 0x4ec   :  { %3330 = vmatprep.subr.bf16.mxu0 %v6423_v35  ;;  %5637 = vmatpush3.bf16.msra.mxu1 %v6434_v36  ;;  %v6470_v35 = vld [vmem:[#allocation18 + $0x228] sm:$0xff]   ;;  %v1439_v36 = vrot.slane %v7019_v24, %v1438_v27 }
 0x4ed   :  { %5638 = vmatprep.subr.bf16.mxu1 %v6437_v37 }
 0x4ee   :  { %v3036_v44 = vadd.f32 %v7030_v21, %v1439_v36  ;;  %v6455_v21 = vld [vmem:[#allocation18 + $0x1f0] sm:$0xff]  }
 0x4ef   :  { %3331 = vmatpush2.bf16.msra.mxu0 %v6421_v0  ;;  %v6450_v0 = vld [vmem:[#allocation18 + $0x88] sm:$0xff]  }
 0x4f0   :  { %3332 = vmatprep.subr.bf16.mxu0 %v6428_v40  ;;  %5639 = vmatpush3.bf16.msra.mxu1 %v6438_v41  ;;  %v3040_v40 = vadd.f32 %v7032_v32, %v1439_v36  ;;  %v6451_v41 = vld [vmem:[#allocation18 + $0xc0] sm:$0xff]   ;;  %v6481_v32 = vld [vmem:[#allocation18 + $0x250] sm:$0xff]  }
 0x4f1   :  { %5640 = vmatprep.subr.bf16.mxu1 %v6441_v43  ;;  %v6474_v43 = vld [vmem:[#allocation18 + $0x220] sm:$0xff]  }
 0x4f2   :  { %v3365_v48 = vmax.f32 %v3040_v40, 0.0  ;;  %v6487_v40 = vld [vmem:[#allocation18 + $0x2e8] sm:$0xff]  }
 0x4f3   :  { %3333 = vmatpush2.bf16.msra.mxu0 %v6426_v45  ;;  %v6477_v45 = vld [vmem:[#allocation18 + $0x258] sm:$0xff]  }
 0x4f4   :  { %5604 = vmatprep.subr.bf16.mxu0 %v6431_v46  ;;  %5641 = vmatpush3.bf16.msra.mxu1 %v6442_v47  ;;  %v6452_v47 = vld [vmem:[#allocation18 + $0x80] sm:$0xff]  }
 0x4f5   :  { %5670 = vmatprep.subr.bf16.mxu1 %v6461_v49  ;;  %v6453_v49 = vld [vmem:[#allocation18 + $0x1f8] sm:$0xff]  }
 0x4f6   :  { %v3078_v56 = vpop.f32.mrf.mxu0  ;;  %3335 = vmatmul.mubr.bf16.vlgmr.msra.gmra.mxu0 %v7002_v3  ;;  %v7047_v7 = vpop.f32.mrf.mxu1 }
 0x4f7   :  { %5605 = vmatpush3.bf16.msra.mxu0 %v6432_v51  ;;  %4631 = vmatprep.mubr.bf16.mxu0 %v3384_v55  ;;  %v3079_v3 = vadd.f32 %v3078_v56, %v1447_v59  ;;  %v6478_v51 = vld [vmem:[#allocation18 + $0x218] sm:$0xff]  }
 0x4f8   :  { %v3080_v60 = vpop.f32.mrf.mxu0  ;;  %5606 = vmatprep.subr.bf16.mxu0 %v6435_v54  ;;  %v3123_v19 = vpop.f32.mrf.mxu1  ;;  %v3347_v54 = vmax.f32 %v3036_v44, 0.0  ;;  %v6454_v56 = vld [vmem:[#allocation18 + $0x1b8] sm:$0xff]  }
 0x4f9   :  { %v3081_v63 = vadd.f32 %v3080_v60, %v1451_v57  ;;  %v3349_v12 = vmax.f32 %v3079_v3, 0.0  ;;  %v3124_v46 = vadd.f32 %v3123_v19, %v1459_v39  ;;  %v6485_v60 = vld [vmem:[#allocation18 + $0x248] sm:$0xff]   ;;  %v6459_v3 = vld [vmem:[#allocation18 + $0x1e0] sm:$0xff]  }
 0x4fa   :  { %v3082_v62 = vpop.f32.mrf.mxu0  ;;  %v7050_v28 = vpop.f32.mrf.mxu1 }
 0x4fb   :  { %v3083_v1 = vadd.f32 %v3082_v62, %v1447_v59  ;;  %5607 = vmatpush3.bf16.msra.mxu0 %v6436_v58  ;;  %v3350_v9 = vmax.f32 %v3081_v63, 0.0  ;;  %v3352_v55 = vmax.f32 %v3124_v46, 0.0  ;;  %v6482_v59 = vld [vmem:[#allocation18 + $0x210] sm:$0xff]   ;;  %v6457_v62 = vld [vmem:[#allocation18 + $0x1e8] sm:$0xff]  }
 0x4fc   :  { %v3084_v4 = vpop.f32.mrf.mxu0  ;;  %5608 = vmatprep.subr.bf16.mxu0 %v6439_v61  ;;  %v3127_v37 = vpop.f32.mrf.mxu1  ;;  %v6456_v61 = vld [vmem:[#allocation18 + $0x1b0] sm:$0xff]   ;;  %v6486_v63 = vld [vmem:[#allocation18 + $0x208] sm:$0xff]  }
 0x4fd   :  { %v3085_v6 = vadd.f32 %v3084_v4, %v1451_v57  ;;  %v3367_v8 = vmax.f32 %v3083_v1, 0.0  ;;  %v3128_v42 = vadd.f32 %v3127_v37, %v1459_v39  ;;  %v3383_v57 = vpack.c.bf16 %v3365_v48, %v3347_v54  ;;  %v6489_v1 = vld [vmem:[#allocation18 + $0x240] sm:$0xff]   ;;  %v6484_v37 = vld [vmem:[#allocation18 + $0x2b0] sm:$0xff]   ;;  %v6488_v46 = vld [vmem:[#allocation18 + $0x2a8] sm:$0xff]  }
 0x4fe   :  { %v6490_v4 = vld [vmem:[#allocation18 + $0x200] sm:$0xff]  }
 0x4ff   :  { %v3368_v10 = vmax.f32 %v3085_v6, 0.0  ;;  %5609 = vmatpush3.bf16.msra.mxu0 %v6440_v2  ;;  %v3385_v20 = vpack.c.bf16 %v3367_v8, %v3349_v12  ;;  %v3370_v50 = vmax.f32 %v3128_v42, 0.0  ;;  %v6458_v2 = vld [vmem:[#allocation18 + $0x1a8] sm:$0xff]   ;;  %v6460_v6 = vld [vmem:[#allocation18 + $0x1a0] sm:$0xff]   ;;  %v6463_v8 = vld [vmem:[#allocation18 + $0x1d8] sm:$0xff]  }
 0x500   :  { %5610 = vmatprep.subr.bf16.mxu0 %v6443_v5  ;;  %v6501_v5 = vld [vmem:[#allocation18 + $0x378] sm:$0xff]   ;;  %v6468_v12 = vld [vmem:[#allocation18 + $0x190] sm:$0xff]  }
 0x501   :  { %v3386_v17 = vpack.c.bf16 %v3368_v10, %v3350_v9  ;;  %v3388_v58 = vpack.c.bf16 %v3370_v50, %v3352_v55  ;;  %v6464_v9 = vld [vmem:[#allocation18 + $0x198] sm:$0xff]   ;;  %v6467_v10 = vld [vmem:[#allocation18 + $0x1d0] sm:$0xff]   ;;  %v6491_v50 = vld [vmem:[#allocation18 + $0x2e0] sm:$0xff]  }
 0x503   :  { %5611 = vmatpush3.bf16.msra.mxu0 %v6444_v11  ;;  %4672 = vmatprep.mubr.bf16.mxu1 %v3386_v17  ;;  %v1454_v11 = vsub.s32 6, %v6984_v13 }
 0x504   :  { %4673 = vmatmul.mubr.bf16.vlgmr.msra.gmra.mxu1 %v3385_v20  ;;  %5612 = vmatprep.subr.bf16.mxu0 %v6445_v16  ;;  %v6471_v16 = vld [vmem:[#allocation18 + $0x1c8] sm:$0xff]   ;;  %v6475_v20 = vld [vmem:[#allocation18 + $0x1c0] sm:$0xff]  }
 0x505   :  { %5671 = vmatpush3.bf16.msra.mxu1 %v6462_v18  ;;  %v1455_v17 = vrot.slane %v7019_v24, %v1454_v11  ;;  %v6472_v18 = vld [vmem:[#allocation18 + $0x188] sm:$0xff]   ;;  %v7067_v24 = vld [vmem:[#allocation16 + $0x8] sm:$0xff] }
 0x506   :  { %5672 = vmatprep.subr.bf16.mxu1 %v6465_v22 }
 0x507   :  { %5613 = vmatpush3.bf16.msra.mxu0 %v6446_v23  ;;  %v3126_v19 = vadd.f32 %v7050_v28, %v1455_v17  ;;  %v3122_v22 = vadd.f32 %v7047_v7, %v1455_v17  ;;  %v6476_v23 = vld [vmem:[#allocation18 + $0x180] sm:$0xff]   ;;  %v1467_v7 = vrot.slane %v7067_v24, %v6990_v15  ;;  %v6498_v17 = vld [vmem:[#allocation18 + $0x288] sm:$0xff]  }
 0x508   :  { %5614 = vmatprep.subr.bf16.mxu0 %v6447_v25 }
 0x509   :  { %5673 = vmatpush3.bf16.msra.mxu1 %v6466_v26  ;;  %v3369_v25 = vmax.f32 %v3126_v19, 0.0  ;;  %v6479_v26 = vld [vmem:[#allocation18 + $0x2f8] sm:$0xff]   ;;  %v6499_v19 = vld [vmem:[#allocation18 + $0x2c0] sm:$0xff]  }
 0x50a   :  { %5674 = vmatprep.subr.bf16.mxu1 %v6469_v29  ;;  %v3351_v29 = vmax.f32 %v3122_v22, 0.0 }
 0x50b   :  { %5615 = vmatpush3.bf16.msra.mxu0 %v6448_v31  ;;  %v6480_v31 = vld [vmem:[#allocation18 + $0x2b8] sm:$0xff]  }
 0x50c   :  { %5616 = vmatprep.subr.bf16.mxu0 %v6449_v34  ;;  %v3387_v34 = vpack.c.bf16 %v3369_v25, %v3351_v29  ;;  %v6500_v25 = vld [vmem:[#allocation18 + $0x280] sm:$0xff]   ;;  %v6502_v29 = vld [vmem:[#allocation18 + $0x3f8] sm:$0xff]  }
 0x50d   :  { %5675 = vmatpush3.bf16.msra.mxu1 %v6470_v35  ;;  %v6483_v35 = vld [vmem:[#allocation18 + $0x2f0] sm:$0xff]  }
 0x50e   :  { %5676 = vmatprep.subr.bf16.mxu1 %v6473_v38  ;;  %v1463_v38 = vrot.slane %v7067_v24, %v6987_v14 }
 0x50f   :  { %5617 = vmatpush3.bf16.msra.mxu0 %v6450_v0  ;;  %v1475_v0 = vrot.slane %v7067_v24, %v1442_v33 }
 0x510   :  { %5618 = vmatprep.subr.bf16.mxu0 %v6451_v41 }
 0x511   :  { %5677 = vmatpush3.bf16.msra.mxu1 %v6474_v43 }
 0x512   :  { %5678 = vmatprep.subr.bf16.mxu1 %v6477_v45 }
 0x513   :  { %5619 = vmatpush3.bf16.msra.mxu0 %v6452_v47 }
 0x514   :  { %5648 = vmatprep.subr.bf16.mxu0 %v6453_v49 }
 0x515   :  { %5679 = vmatpush3.bf16.msra.mxu1 %v6478_v51 }
 0x516   :  { %4632 = vmatmul.mubr.bf16.vlgmr.msra.gmra.mxu0 %v3383_v57  ;;  %5680 = vmatprep.subr.bf16.mxu1 %v6481_v32  ;;  %v6492_v57 = vld [vmem:[#allocation18 + $0x2a0] sm:$0xff]  }
 0x517   :  { %5649 = vmatpush3.bf16.msra.mxu0 %v6454_v56  ;;  %4713 = vmatprep.mubr.bf16.mxu0 %v3388_v58 }
 0x518   :  { %5650 = vmatprep.subr.bf16.mxu0 %v6455_v21 }
 0x519   :  { %5681 = vmatpush3.bf16.msra.mxu1 %v6482_v59 }
 0x51a   :  { %5682 = vmatprep.subr.bf16.mxu1 %v6485_v60 }
 0x51b   :  { %5651 = vmatpush3.bf16.msra.mxu0 %v6456_v61  ;;  %v6493_v61 = vld [vmem:[#allocation18 + $0x2d8] sm:$0xff]  }
 0x51c   :  { %5652 = vmatprep.subr.bf16.mxu0 %v6457_v62  ;;  %v6503_v62 = vld [vmem:[#allocation18 + $0x338] sm:$0xff]  }
 0x51d   :  { %5683 = vmatpush3.bf16.msra.mxu1 %v6486_v63 }
 0x51e   :  { %5684 = vmatprep.subr.bf16.mxu1 %v6489_v1 }
 0x51f   :  { %5653 = vmatpush3.bf16.msra.mxu0 %v6458_v2  ;;  %v6505_v2 = vld [vmem:[#allocation18 + $0x370] sm:$0xff]  }
 0x520   :  { %5654 = vmatprep.subr.bf16.mxu0 %v6459_v3  ;;  %v6494_v3 = vld [vmem:[#allocation18 + $0x298] sm:$0xff]  }
 0x521   :  { %5685 = vmatpush3.bf16.msra.mxu1 %v6490_v4  ;;  %v6495_v4 = vld [vmem:[#allocation18 + $0x2d0] sm:$0xff]  }
 0x522   :  { %5714 = vmatprep.subr.bf16.mxu1 %v6501_v5  ;;  %v6507_v5 = vld [vmem:[#allocation18 + $0x330] sm:$0xff]  }
 0x523   :  { %5655 = vmatpush3.bf16.msra.mxu0 %v6460_v6  ;;  %v6509_v6 = vld [vmem:[#allocation18 + $0x368] sm:$0xff]  }
 0x524   :  { %5656 = vmatprep.subr.bf16.mxu0 %v6463_v8  ;;  %v6496_v8 = vld [vmem:[#allocation18 + $0x290] sm:$0xff]  }
 0x527   :  { %5657 = vmatpush3.bf16.msra.mxu0 %v6464_v9  ;;  %v6497_v9 = vld [vmem:[#allocation18 + $0x2c8] sm:$0xff]  }
 0x528   :  { %5658 = vmatprep.subr.bf16.mxu0 %v6467_v10  ;;  %v6511_v10 = vld [vmem:[#allocation18 + $0x328] sm:$0xff]  }
 0x52b   :  { %5659 = vmatpush3.bf16.msra.mxu0 %v6468_v12  ;;  %v1471_v12 = vrot.slane %v7067_v24, %v1438_v27  ;;  %v6519_v27 = vld [vmem:[#allocation18 + $0x318] sm:$0xff]  }
 0x52c   :  { %5660 = vmatprep.subr.bf16.mxu0 %v6471_v16  ;;  %v6513_v16 = vld [vmem:[#allocation18 + $0x360] sm:$0xff]  }
 0x52f   :  { %5661 = vmatpush3.bf16.msra.mxu0 %v6472_v18 }
 0x530   :  { %5662 = vmatprep.subr.bf16.mxu0 %v6475_v20  ;;  %v6515_v20 = vld [vmem:[#allocation18 + $0x320] sm:$0xff]  }
 0x533   :  { %5663 = vmatpush3.bf16.msra.mxu0 %v6476_v23  ;;  %v6517_v23 = vld [vmem:[#allocation18 + $0x358] sm:$0xff]  }
 0x534   :  { %5692 = vmatprep.subr.bf16.mxu0 %v6479_v26 }
 0x536   :  { %v3164_v36 = vpop.f32.mrf.mxu0  ;;  %4714 = vmatmul.mubr.bf16.vlgmr.msra.gmra.mxu0 %v3387_v34  ;;  %v6521_v34 = vld [vmem:[#allocation18 + $0x350] sm:$0xff]  }
 0x537   :  { %v7069_v28 = vpop.f32.mrf.mxu1  ;;  %5693 = vmatpush3.bf16.msra.mxu0 %v6480_v31  ;;  %v3165_v47 = vadd.f32 %v3164_v36, %v1463_v38 }
 0x538   :  { %v3166_v39 = vpop.f32.mrf.mxu0  ;;  %5694 = vmatprep.subr.bf16.mxu0 %v6483_v35  ;;  %v3208_v22 = vadd.f32 %v7069_v28, %v1471_v12  ;;  %v6504_v35 = vld [vmem:[#allocation18 + $0x3b8] sm:$0xff]   ;;  %v6525_v28 = vld [vmem:[#allocation18 + $0x348] sm:$0xff]  }
 0x539   :  { %v3209_v41 = vpop.f32.mrf.mxu1  ;;  %v3167_v43 = vadd.f32 %v3166_v39, %v1467_v7  ;;  %v3353_v21 = vmax.f32 %v3165_v47, 0.0  ;;  %v6510_v39 = vld [vmem:[#allocation18 + $0x3e8] sm:$0xff]   ;;  %v6520_v47 = vld [vmem:[#allocation18 + $0x398] sm:$0xff]  }
 0x53a   :  { %v3168_v42 = vpop.f32.mrf.mxu0  ;;  %v3210_v48 = vadd.f32 %v3209_v41, %v1475_v0  ;;  %v3355_v31 = vmax.f32 %v3208_v22, 0.0  ;;  %v6512_v41 = vld [vmem:[#allocation18 + $0x3a8] sm:$0xff]   ;;  %v6535_v22 = vld [vmem:[#allocation18 + $0x470] sm:$0xff]  }
 0x53b   :  { %v3169_v44 = vadd.f32 %v3168_v42, %v1463_v38  ;;  %v3211_v45 = vpop.f32.mrf.mxu1  ;;  %5695 = vmatpush3.bf16.msra.mxu0 %v6484_v37  ;;  %v3354_v56 = vmax.f32 %v3167_v43, 0.0  ;;  %v6523_v37 = vld [vmem:[#allocation18 + $0x310] sm:$0xff]   ;;  %v6514_v42 = vld [vmem:[#allocation18 + $0x3e0] sm:$0xff]  }
 0x53c   :  { %v3170_v49 = vpop.f32.mrf.mxu0  ;;  %5696 = vmatprep.subr.bf16.mxu0 %v6487_v40  ;;  %v3356_v58 = vmax.f32 %v3210_v48, 0.0  ;;  %v3212_v18 = vadd.f32 %v3211_v45, %v1471_v12  ;;  %v6508_v38 = vld [vmem:[#allocation18 + $0x3b0] sm:$0xff]   ;;  %v6529_v40 = vld [vmem:[#allocation18 + $0x340] sm:$0xff]  }
 0x53d   :  { %v3171_v51 = vadd.f32 %v3170_v49, %v1467_v7  ;;  %v3213_v54 = vpop.f32.mrf.mxu1  ;;  %v3371_v32 = vmax.f32 %v3169_v44, 0.0  ;;  %v6506_v7 = vld [vmem:[#allocation18 + $0x3f0] sm:$0xff]   ;;  %v6531_v43 = vld [vmem:[#allocation18 + $0x300] sm:$0xff]   ;;  %v6533_v44 = vld [vmem:[#allocation18 + $0x478] sm:$0xff]  }
 0x53e   :  { %v3214_v55 = vadd.f32 %v3213_v54, %v1475_v0  ;;  %v3373_v26 = vmax.f32 %v3212_v18, 0.0  ;;  %v6527_v0 = vld [vmem:[#allocation18 + $0x308] sm:$0xff]   ;;  %v6516_v45 = vld [vmem:[#allocation18 + $0x3a0] sm:$0xff]   ;;  %v6522_v48 = vld [vmem:[#allocation18 + $0x3d0] sm:$0xff]  }
 0x53f   :  { %v3372_v33 = vmax.f32 %v3171_v51, 0.0  ;;  %5697 = vmatpush3.bf16.msra.mxu0 %v6488_v46  ;;  %v3389_v63 = vpack.c.bf16 %v3371_v32, %v3353_v21  ;;  %v6518_v46 = vld [vmem:[#allocation18 + $0x3d8] sm:$0xff]   ;;  %v6524_v49 = vld [vmem:[#allocation18 + $0x390] sm:$0xff]   ;;  %v6528_v51 = vld [vmem:[#allocation18 + $0x388] sm:$0xff]  }
 0x540   :  { %v3374_v59 = vmax.f32 %v3214_v55, 0.0  ;;  %5698 = vmatprep.subr.bf16.mxu0 %v6491_v50  ;;  %v3391_v36 = vpack.c.bf16 %v3373_v26, %v3355_v31  ;;  %v6526_v50 = vld [vmem:[#allocation18 + $0x3c8] sm:$0xff]   ;;  %v6530_v54 = vld [vmem:[#allocation18 + $0x3c0] sm:$0xff]   ;;  %v6534_v18 = vld [vmem:[#allocation18 + $0x438] sm:$0xff]  }
 0x541   :  { %v3390_v60 = vpack.c.bf16 %v3372_v33, %v3354_v56  ;;  %v6532_v32 = vld [vmem:[#allocation18 + $0x380] sm:$0xff]   ;;  %v1483_v33 = vrot.slane %v7067_v24, %v1450_v52  ;;  %v6537_v26 = vld [vmem:[#allocation18 + $0x468] sm:$0xff]  }
 0x542   :  { %v3392_v1 = vpack.c.bf16 %v3374_v59, %v3356_v58  ;;  %v1491_v58 = vrot.slane %v7067_v24, %v1458_v30  ;;  %v1487_v59 = vrot.slane %v7067_v24, %v1454_v11  ;;  %v6540_v31 = vld [vmem:[#allocation18 + $0x420] sm:$0xff]  }
 0x543   :  { %4754 = vmatprep.mubr.bf16.mxu1 %v3390_v60  ;;  %5699 = vmatpush3.bf16.msra.mxu0 %v6492_v57  ;;  %v1479_v57 = vrot.slane %v7067_v24, %v1446_v53 }
 0x544   :  { %4795 = vmatprep.mubr.bf16.mxu0 %v3392_v1  ;;  %4755 = vmatmul.mubr.bf16.vlgmr.msra.gmra.mxu1 %v3389_v63 }
 0x545   :  { %5700 = vmatprep.subr.bf16.mxu0 %v6493_v61  ;;  %5715 = vmatpush3.bf16.msra.mxu1 %v6503_v62 }
 0x546   :  { %5716 = vmatprep.subr.bf16.mxu1 %v6505_v2 }
 0x547   :  { %5701 = vmatpush3.bf16.msra.mxu0 %v6494_v3 }
 0x548   :  { %5702 = vmatprep.subr.bf16.mxu0 %v6495_v4 }
 0x549   :  { %5717 = vmatpush3.bf16.msra.mxu1 %v6507_v5 }
 0x54a   :  { %5718 = vmatprep.subr.bf16.mxu1 %v6509_v6 }
 0x54b   :  { %5703 = vmatpush3.bf16.msra.mxu0 %v6496_v8 }
 0x54c   :  { %5704 = vmatprep.subr.bf16.mxu0 %v6497_v9 }
 0x54d   :  { %5719 = vmatpush3.bf16.msra.mxu1 %v6511_v10 }
 0x54e   :  { %5720 = vmatprep.subr.bf16.mxu1 %v6513_v16 }
 0x54f   :  { %5705 = vmatpush3.bf16.msra.mxu0 %v6498_v17 }
 0x550   :  { %5706 = vmatprep.subr.bf16.mxu0 %v6499_v19 }
 0x551   :  { %5721 = vmatpush3.bf16.msra.mxu1 %v6515_v20 }
 0x552   :  { %5722 = vmatprep.subr.bf16.mxu1 %v6517_v23 }
 0x553   :  { %5707 = vmatpush3.bf16.msra.mxu0 %v6500_v25  ;;  %v6536_v25 = vld [vmem:[#allocation18 + $0x430] sm:$0xff]  }
 0x554   :  { %5736 = vmatprep.subr.bf16.mxu0 %v6502_v29  ;;  %v6538_v29 = vld [vmem:[#allocation18 + $0x428] sm:$0xff]  }
 0x555   :  { %5723 = vmatpush3.bf16.msra.mxu1 %v6519_v27  ;;  %v6539_v27 = vld [vmem:[#allocation18 + $0x460] sm:$0xff]  }
 0x556   :  { %4796 = vmatmul.mubr.bf16.vlgmr.msra.gmra.mxu0 %v3391_v36  ;;  %5724 = vmatprep.subr.bf16.mxu1 %v6521_v34  ;;  %v6541_v34 = vld [vmem:[#allocation18 + $0x458] sm:$0xff]   ;;  %v6543_v36 = vld [vmem:[#allocation18 + $0x450] sm:$0xff]  }
 0x557   :  { %5737 = vmatpush3.bf16.msra.mxu0 %v6504_v35  ;;  %v6542_v35 = vld [vmem:[#allocation18 + $0x418] sm:$0xff]  }
 0x558   :  { %5738 = vmatprep.subr.bf16.mxu0 %v6506_v7  ;;  %v6544_v7 = vld [vmem:[#allocation18 + $0x410] sm:$0xff]  }
 0x559   :  { %5725 = vmatpush3.bf16.msra.mxu1 %v6523_v37  ;;  %v6545_v37 = vld [vmem:[#allocation18 + $0x448] sm:$0xff]  }
 0x55a   :  { %5726 = vmatprep.subr.bf16.mxu1 %v6525_v28  ;;  %v6546_v28 = vld [vmem:[#allocation18 + $0x408] sm:$0xff]  }
 0x55b   :  { %5739 = vmatpush3.bf16.msra.mxu0 %v6508_v38  ;;  %v6547_v38 = vld [vmem:[#allocation18 + $0x440] sm:$0xff]  }
 0x55c   :  { %5740 = vmatprep.subr.bf16.mxu0 %v6510_v39  ;;  %v6548_v39 = vld [vmem:[#allocation18 + $0x400] sm:$0xff]  }
 0x55d   :  { %5727 = vmatpush3.bf16.msra.mxu1 %v6527_v0  ;;  %v1424_v0 = vld [vmem:[#allocation16 + $0x10] sm:$0x3] }
 0x55e   :  { %5728 = vmatprep.subr.bf16.mxu1 %v6529_v40 }
 0x55f   :  { %5741 = vmatpush3.bf16.msra.mxu0 %v6512_v41  ;;  %v1499_v41 = vrot.slane %v1424_v0, %v6990_v15 }
 0x560   :  { %5742 = vmatprep.subr.bf16.mxu0 %v6514_v42  ;;  %v1495_v42 = vrot.slane %v1424_v0, %v6987_v14 }
 0x561   :  { %5729 = vmatpush3.bf16.msra.mxu1 %v6531_v43 }
 0x562   :  { %5758 = vmatprep.subr.bf16.mxu1 %v6533_v44 }
 0x563   :  { %5743 = vmatpush3.bf16.msra.mxu0 %v6516_v45 }
 0x564   :  { %5744 = vmatprep.subr.bf16.mxu0 %v6518_v46 }
 0x567   :  { %5745 = vmatpush3.bf16.msra.mxu0 %v6520_v47 }
 0x568   :  { %5746 = vmatprep.subr.bf16.mxu0 %v6522_v48 }
 0x56b   :  { %5747 = vmatpush3.bf16.msra.mxu0 %v6524_v49 }
 0x56c   :  { %5748 = vmatprep.subr.bf16.mxu0 %v6526_v50 }
 0x56f   :  { %5749 = vmatpush3.bf16.msra.mxu0 %v6528_v51 }
 0x570   :  { %5750 = vmatprep.subr.bf16.mxu0 %v6530_v54 }
 0x573   :  { %5751 = vmatpush3.bf16.msra.mxu0 %v6532_v32 }
 0x576   :  { %v3250_v55 = vpop.f32.mrf.mxu0 }
 0x577   :  { %v3293_v56 = vpop.f32.mrf.mxu1  ;;  %v3251_v2 = vadd.f32 %v3250_v55, %v1479_v57 }
 0x578   :  { %v3252_v21 = vpop.f32.mrf.mxu0  ;;  %v3294_v5 = vadd.f32 %v3293_v56, %v1487_v59 }
 0x579   :  { %v3295_v60 = vpop.f32.mrf.mxu1  ;;  %v3253_v62 = vadd.f32 %v3252_v21, %v1483_v33  ;;  %v3357_v13 = vmax.f32 %v3251_v2, 0.0 }
 0x57a   :  { %v3254_v61 = vpop.f32.mrf.mxu0  ;;  %v3296_v52 = vadd.f32 %v3295_v60, %v1491_v58  ;;  %v3359_v24 = vmax.f32 %v3294_v5, 0.0 }
 0x57b   :  { %v3255_v63 = vadd.f32 %v3254_v61, %v1479_v57  ;;  %v3297_v1 = vpop.f32.mrf.mxu1  ;;  %v3358_v10 = vmax.f32 %v3253_v62, 0.0 }
 0x57c   :  { %v3298_v3 = vadd.f32 %v3297_v1, %v1487_v59  ;;  %v3256_v4 = vpop.f32.mrf.mxu0  ;;  %v3360_v16 = vmax.f32 %v3296_v52, 0.0 }
 0x57d   :  { %v3257_v53 = vadd.f32 %v3256_v4, %v1483_v33  ;;  %v3299_v6 = vpop.f32.mrf.mxu1  ;;  %v3375_v8 = vmax.f32 %v3255_v63, 0.0  ;;  %v7096_v33 = vld [vmem:[#allocation21] ss:$0 sm:$0xff] }
 0x57e   :  { %v3300_v9 = vadd.f32 %v3299_v6, %v1491_v58  ;;  %v3377_v30 = vmax.f32 %v3298_v3, 0.0  ;;  %4934 = vrot.lane.b32.xlu1 %v7096_v33, %s6851_s0 }
 0x57f   :  { %v3376_v12 = vmax.f32 %v3257_v53, 0.0  ;;  %v3393_v19 = vpack.c.bf16 %v3375_v8, %v3357_v13 }
 0x580   :  { %v3378_v11 = vmax.f32 %v3300_v9, 0.0  ;;  %v3395_v23 = vpack.c.bf16 %v3377_v30, %v3359_v24  ;;  %v5436_v30 = vld [vmem:[#allocation19] ss:$0 sm:$0xff] }
 0x581   :  { %v3394_v17 = vpack.c.bf16 %v3376_v12, %v3358_v10 }
 0x582   :  { %v3396_v20 = vpack.c.bf16 %v3378_v11, %v3360_v16  ;;  %4945 = vrot.lane.b32.xlu1 %v7096_v33, %s6852_s18 }
 0x583   :  { %4836 = vmatprep.mubr.bf16.mxu1 %v3394_v17 }
 0x584   :  { %4877 = vmatprep.mubr.bf16.mxu0 %v3396_v20  ;;  %4837 = vmatmul.mubr.bf16.vlgmr.msra.gmra.mxu1 %v3393_v19 }
 0x585   :  { %4878 = vmatmul.mubr.bf16.vlgmr.msra.gmra.mxu0 %v3395_v23  ;;  %5759 = vmatpush3.bf16.msra.mxu1 %v6534_v18 }
 0x586   :  { %5760 = vmatprep.subr.bf16.mxu1 %v6535_v22 }
 0x589   :  { %5761 = vmatpush3.bf16.msra.mxu1 %v6536_v25 }
 0x58a   :  { %5762 = vmatprep.subr.bf16.mxu1 %v6537_v26 }
 0x58d   :  { %5763 = vmatpush3.bf16.msra.mxu1 %v6538_v29 }
 0x58e   :  { %5764 = vmatprep.subr.bf16.mxu1 %v6539_v27 }
 0x591   :  { %5765 = vmatpush3.bf16.msra.mxu1 %v6540_v31 }
 0x592   :  { %5766 = vmatprep.subr.bf16.mxu1 %v6541_v34 }
 0x595   :  { %5767 = vmatpush3.bf16.msra.mxu1 %v6542_v35 }
 0x596   :  { %5768 = vmatprep.subr.bf16.mxu1 %v6543_v36 }
 0x597   :  { %v5598_v14 = vpop.f32.mrf.mxu1 }
 0x599   :  { %5769 = vmatpush3.bf16.msra.mxu1 %v6544_v7  ;;  %v5599_v15 = vpop.f32.mrf.mxu1 }
 0x59a   :  { %5770 = vmatprep.subr.bf16.mxu1 %v6545_v37  ;;  %v5600_v10 = vadd.f32 %v5599_v15, %v5598_v14 }
 0x59b   :  { %v5601_v57 = vpop.f32.mrf.mxu1 }
 0x59c   :  { %v4593_v11 = vadd.f32 %v5600_v10, %v5436_v30 }
 0x59d   :  { %5771 = vmatpush3.bf16.msra.mxu1 %v6546_v28  ;;  %v5602_v58 = vpop.f32.mrf.mxu1 }
 0x59e   :  { %5772 = vmatprep.subr.bf16.mxu1 %v6547_v38  ;;  %v5603_v19 = vadd.f32 %v5602_v58, %v5601_v57 }
 0x5a0   :  { %v4596_v31 = vadd.f32 %v5603_v19, %v5436_v30 }
 0x5a1   :  { %5773 = vmatpush3.bf16.msra.mxu1 %v6548_v39 }
 0x5b6   :  { %v3336_v40 = vpop.f32.mrf.mxu0 }
 0x5b7   :  { %v3337_v47 = vadd.f32 %v3336_v40, %v1495_v42 }
 0x5b8   :  { %v3338_v43 = vpop.f32.mrf.mxu0 }
 0x5b9   :  { %v3339_v45 = vadd.f32 %v3338_v43, %v1499_v41  ;;  %v3361_v32 = vmax.f32 %v3337_v47, 0.0 }
 0x5ba   :  { %v3340_v44 = vpop.f32.mrf.mxu0 }
 0x5bb   :  { %v3341_v46 = vadd.f32 %v3340_v44, %v1495_v42  ;;  %v3362_v51 = vmax.f32 %v3339_v45, 0.0 }
 0x5bc   :  { %v3342_v48 = vpop.f32.mrf.mxu0 }
 0x5bd   :  { %v3343_v49 = vadd.f32 %v3342_v48, %v1499_v41  ;;  %v3379_v50 = vmax.f32 %v3341_v46, 0.0 }
 0x5bf   :  { %v3380_v54 = vmax.f32 %v3343_v49, 0.0  ;;  %v3397_v56 = vpack.c.bf16 %v3379_v50, %v3361_v32 }
 0x5c1   :  { %v3398_v55 = vpack.c.bf16 %v3380_v54, %v3362_v51 }
 0x5c3   :  { %4918 = vmatprep.mubr.bf16.mxu1 %v3398_v55 }
 0x5c4   :  { %4919 = vmatmul.mubr.bf16.vlgmr.msra.gmra.mxu1 %v3397_v56  ;;  %v5642_v60 = vpop.f32.mrf.mxu1 }
 0x5c6   :  { %v5643_v62 = vpop.f32.mrf.mxu1 }
 0x5c7   :  { %v5644_v20 = vadd.f32 %v5643_v62, %v5642_v60 }
 0x5c8   :  { %v5645_v1 = vpop.f32.mrf.mxu1 }
 0x5ca   :  { %v5646_v52 = vpop.f32.mrf.mxu1 }
 0x5cb   :  { %v5647_v39 = vadd.f32 %v5646_v52, %v5645_v1 }
 0x5d6   :  { %v5620_v21 = vpop.f32.mrf.mxu0 }
 0x5d8   :  { %v5621_v59 = vpop.f32.mrf.mxu0 }
 0x5d9   :  { %v5622_v12 = vadd.f32 %v5621_v59, %v5620_v21 }
 0x5da   :  { %v5623_v61 = vpop.f32.mrf.mxu0 }
 0x5db   :  { %v4634_v17 = vadd.f32 %v5622_v12, %v4593_v11 }
 0x5dc   :  { %v5624_v63 = vpop.f32.mrf.mxu0 }
 0x5dd   :  { %v5625_v25 = vadd.f32 %v5624_v63, %v5623_v61  ;;  %v4675_v26 = vadd.f32 %v5644_v20, %v4634_v17 }
 0x5df   :  { %v4637_v37 = vadd.f32 %v5625_v25, %v4596_v31 }
 0x5e1   :  { %v4678_v43 = vadd.f32 %v5647_v39, %v4637_v37 }
 0x5f0   :  { %v4935_v1 = vpop.permute.xlu1 %4934 }
 0x5f1   :  { %vm4936_vm0 = vcmp.eq.f32.partialorder %v4935_v1, %v7096_v33 }
 0x5f6   :  { %v5664_v2 = vpop.f32.mrf.mxu0 }
 0x5f8   :  { %v5665_v3 = vpop.f32.mrf.mxu0 }
 0x5f9   :  { %v5666_v22 = vadd.f32 %v5665_v3, %v5664_v2  ;;  %v4946_v2 = vpop.permute.xlu1 %4945 }
 0x5fa   :  { %v5667_v5 = vpop.f32.mrf.mxu0  ;;  %vm4947_vm1 = vcmp.eq.f32.partialorder %v4946_v2, %v7096_v33 }
 0x5fb   :  { %v4716_v34 = vadd.f32 %v5666_v22, %v4675_v26 }
 0x5fc   :  { %v5668_v6 = vpop.f32.mrf.mxu0 }
 0x5fd   :  { %v5669_v0 = vadd.f32 %v5668_v6, %v5667_v5 }
 0x5ff   :  { %v4719_v47 = vadd.f32 %v5669_v0, %v4678_v43 }
 0x604   :  { %v5686_v4 = vpop.f32.mrf.mxu1 }
 0x606   :  { %v5687_v53 = vpop.f32.mrf.mxu1 }
 0x607   :  { %v5688_v29 = vadd.f32 %v5687_v53, %v5686_v4 }
 0x608   :  { %v5689_v8 = vpop.f32.mrf.mxu1 }
 0x609   :  { %v4757_v28 = vadd.f32 %v5688_v29, %v4716_v34 }
 0x60a   :  { %v5690_v13 = vpop.f32.mrf.mxu1 }
 0x60b   :  { %v5691_v44 = vadd.f32 %v5690_v13, %v5689_v8 }
 0x60d   :  { %v4760_v54 = vadd.f32 %v5691_v44, %v4719_v47 }
 0x616   :  { %v5708_v9 = vpop.f32.mrf.mxu0 }
 0x618   :  { %v5709_v16 = vpop.f32.mrf.mxu0 }
 0x619   :  { %v5710_v35 = vadd.f32 %v5709_v16, %v5708_v9 }
 0x61a   :  { %v5711_v18 = vpop.f32.mrf.mxu0 }
 0x61b   :  { %v4798_v40 = vadd.f32 %v5710_v35, %v4757_v28 }
 0x61c   :  { %v5712_v27 = vpop.f32.mrf.mxu0 }
 0x61d   :  { %v5713_v48 = vadd.f32 %v5712_v27, %v5711_v18 }
 0x61f   :  { %v4801_v15 = vadd.f32 %v5713_v48, %v4760_v54 }
 0x644   :  { %v5730_v24 = vpop.f32.mrf.mxu1 }
 0x645   :  { %v5752_v36 = vpop.f32.mrf.mxu0 }
 0x646   :  { %v5731_v23 = vpop.f32.mrf.mxu1 }
 0x647   :  { %v5732_v38 = vadd.f32 %v5731_v23, %v5730_v24  ;;  %v5753_v41 = vpop.f32.mrf.mxu0 }
 0x648   :  { %v5733_v7 = vpop.f32.mrf.mxu1  ;;  %v5754_v49 = vadd.f32 %v5753_v41, %v5752_v36 }
 0x649   :  { %v4839_v45 = vadd.f32 %v5732_v38, %v4798_v40  ;;  %v5755_v50 = vpop.f32.mrf.mxu0 }
 0x64a   :  { %v5734_v42 = vpop.f32.mrf.mxu1 }
 0x64b   :  { %v4880_v32 = vadd.f32 %v5754_v49, %v4839_v45  ;;  %v5735_v55 = vadd.f32 %v5734_v42, %v5733_v7  ;;  %v5756_v21 = vpop.f32.mrf.mxu0 }
 0x64c   :  { %v5757_v60 = vadd.f32 %v5756_v21, %v5755_v50 }
 0x64d   :  { %v4842_v59 = vadd.f32 %v5735_v55, %v4801_v15 }
 0x64f   :  { %v4883_v62 = vadd.f32 %v5757_v60, %v4842_v59 }
 0x684   :  { %v5774_v46 = vpop.f32.mrf.mxu1 }
 0x686   :  { %v5775_v51 = vpop.f32.mrf.mxu1 }
 0x687   :  { %v5776_v56 = vadd.f32 %v5775_v51, %v5774_v46 }
 0x688   :  { %v5777_v14 = vpop.f32.mrf.mxu1 }
 0x689   :  { %v4921_v57 = vadd.f32 %v5776_v56, %v4880_v32 }
 0x68a   :  { %v5778_v58 = vpop.f32.mrf.mxu1 }
 0x68b   :  { %4948 = vrot.lane.b32.xlu1 %v4921_v57, %s6852_s18  ;;  %4937 = vrot.lane.b32.xlu0 %v4921_v57, %s6851_s0  ;;  %v5779_v61 = vadd.f32 %v5778_v58, %v5777_v14 }
 0x68d   :  { %v4924_v63 = vadd.f32 %v5779_v61, %v4883_v62 }
 0x68f   :  { %4970 = vrot.lane.b32.xlu1 %v4921_v57, %s6853_s19  ;;  %4959 = vrot.lane.b32.xlu0 %v4921_v57, %s6854_s6 }
 0x693   :  { %4961 = vrot.lane.b32.xlu1 %v4924_v63, %s6854_s6  ;;  %4939 = vrot.lane.b32.xlu0 %v4924_v63, %s6851_s0 }
 0x697   :  { %4950 = vrot.lane.b32.xlu0 %v4924_v63, %s6852_s18  ;;  %4967 = vrot.lane.b32.xlu1 %v7096_v33, %s6853_s19 }
 0x69b   :  { %4956 = vrot.lane.b32.xlu0 %v7096_v33, %s6854_s6 }
 0x69f   :  { %4972 = vrot.lane.b32.xlu0 %v4924_v63, %s6853_s19 }
 0x6fd   :  { %v4949_v52 = vpop.permute.xlu1 %4948  ;;  %v4938_v3 = vpop.permute.xlu0 %4937 }
 0x6fe   :  { %v4941_v4 = vmax.f32 %v4921_v57, %v4938_v3 }
 0x700   :  { %v4943_v6 = vsel %vm4936_vm0, %v4941_v4, %v4921_v57 }
 0x701   :  { %v4960_v5 = vpop.permute.xlu0 %4959  ;;  %v4971_v53 = vpop.permute.xlu1 %4970  ;;  %v4952_v9 = vmax.f32 %v4943_v6, %v4949_v52 }
 0x703   :  { %v4954_v16 = vsel %vm4947_vm1, %v4952_v9, %v4943_v6 }
 0x704   :  { %v4963_v18 = vmax.f32 %v4954_v16, %v4960_v5 }
 0x705   :  { %v4940_v8 = vpop.permute.xlu0 %4939  ;;  %v4962_v30 = vpop.permute.xlu1 %4961 }
 0x706   :  { %v4942_v10 = vmax.f32 %v4924_v63, %v4940_v8 }
 0x708   :  { %v4944_v12 = vsel %vm4936_vm0, %v4942_v10, %v4924_v63 }
 0x709   :  { %v4951_v13 = vpop.permute.xlu0 %4950  ;;  %v4968_v24 = vpop.permute.xlu1 %4967 }
 0x70a   :  { %v4953_v11 = vmax.f32 %v4944_v12, %v4951_v13  ;;  %vm4969_vm3 = vcmp.eq.f32.partialorder %v4968_v24, %v7096_v33 }
 0x70c   :  { %v4955_v17 = vsel %vm4947_vm1, %v4953_v11, %v4944_v12 }
 0x70d   :  { %v4957_v19 = vpop.permute.xlu0 %4956  ;;  %v4964_v20 = vmax.f32 %v4955_v17, %v4962_v30 }
 0x70e   :  { %vm4958_vm2 = vcmp.eq.f32.partialorder %v4957_v19, %v7096_v33 }
 0x70f   :  { %v4965_v22 = vsel %vm4958_vm2, %v4963_v18, %v4954_v16  ;;  %v4966_v25 = vsel %vm4958_vm2, %v4964_v20, %v4955_v17 }
 0x710   :  { %v4974_v23 = vmax.f32 %v4965_v22, %v4971_v53 }
 0x711   :  { %v4973_v26 = vpop.permute.xlu0 %4972 }
 0x712   :  { %v4976_v29 = vsel %vm4969_vm3, %v4974_v23, %v4965_v22  ;;  %v4975_v27 = vmax.f32 %v4966_v25, %v4973_v26 }
 0x713   :  { %v4978_v31 = vsub.f32 %v4921_v57, %v4976_v29 }
 0x714   :  { %v4977_v34 = vsel %vm4969_vm3, %v4975_v27, %v4966_v25 }
 0x715   :  { %v4980_v35 = vmul.f32 1.442695, %v4978_v31  ;;  %v4979_v36 = vsub.f32 %v4924_v63, %v4977_v34 }
 0x717   :  { %6549 = vpow2.f32 %v4980_v35  ;;  %v4982_v7 = vmul.f32 1.442695, %v4979_v36 }
 0x719   :  { %6551 = vpow2.f32 %v4982_v7 }
 0x724   :  { %v6550_v37 = vpop.eup %6549 }
 0x725   :  { %4984 = vrot.lane.b32.xlu0 %v6550_v37, %s6851_s0 }
 0x726   :  { %v6552_v28 = vpop.eup %6551 }
 0x727   :  { %4986 = vrot.lane.b32.xlu1 %v6552_v28, %s6851_s0 }
 0x729   :  { %4992 = vrot.lane.b32.xlu0 %v6550_v37, %s6852_s18 }
 0x72b   :  { %4994 = vrot.lane.b32.xlu1 %v6552_v28, %s6852_s18 }
 0x72d   :  { %5000 = vrot.lane.b32.xlu0 %v6550_v37, %s6854_s6 }
 0x72f   :  { %5002 = vrot.lane.b32.xlu1 %v6552_v28, %s6854_s6 }
 0x731   :  { %5008 = vrot.lane.b32.xlu0 %v6550_v37, %s6853_s19 }
 0x733   :  { %5010 = vrot.lane.b32.xlu1 %v6552_v28, %s6853_s19 }
 0x797   :  { %v4985_v38 = vpop.permute.xlu0 %4984 }
 0x798   :  { %v4988_v40 = vsel %vm4936_vm0, %v4985_v38, 0.0 }
 0x799   :  { %v4987_v39 = vpop.permute.xlu1 %4986  ;;  %v4990_v44 = vadd.f32 %v6550_v37, %v4988_v40 }
 0x79a   :  { %v4989_v42 = vsel %vm4936_vm0, %v4987_v39, 0.0 }
 0x79b   :  { %v4993_v0 = vpop.permute.xlu0 %4992  ;;  %v4991_v48 = vadd.f32 %v6552_v28, %v4989_v42 }
 0x79c   :  { %v4996_v43 = vsel %vm4947_vm1, %v4993_v0, 0.0 }
 0x79d   :  { %v4995_v41 = vpop.permute.xlu1 %4994  ;;  %v4998_v49 = vadd.f32 %v4996_v43, %v4990_v44 }
 0x79e   :  { %v4997_v46 = vsel %vm4947_vm1, %v4995_v41, 0.0 }
 0x79f   :  { %v5001_v45 = vpop.permute.xlu0 %5000  ;;  %v4999_v54 = vadd.f32 %v4997_v46, %v4991_v48 }
 0x7a0   :  { %v5004_v47 = vsel %vm4958_vm2, %v5001_v45, 0.0 }
 0x7a1   :  { %v5003_v50 = vpop.permute.xlu1 %5002  ;;  %v5006_v32 = vadd.f32 %v5004_v47, %v4998_v49 }
 0x7a2   :  { %v5005_v51 = vsel %vm4958_vm2, %v5003_v50, 0.0 }
 0x7a3   :  { %v5009_v55 = vpop.permute.xlu0 %5008  ;;  %v5007_v14 = vadd.f32 %v5005_v51, %v4999_v54 }
 0x7a4   :  { %v5012_v56 = vsel %vm4969_vm3, %v5009_v55, 0.0 }
 0x7a5   :  { %v5014_v15 = vadd.f32 %v5012_v56, %v5006_v32  ;;  %v5011_v57 = vpop.permute.xlu1 %5010 }
 0x7a6   :  { %v5013_v21 = vsel %vm4969_vm3, %v5011_v57, 0.0 }
 0x7a7   :  { %6553 = vlog2.f32 %v5014_v15  ;;  %v5015_v58 = vadd.f32 %v5013_v21, %v5007_v14 }
 0x7a9   :  { %6555 = vlog2.f32 %v5015_v58 }
 0x7b4   :  { %v6554_v59 = vpop.eup %6553 }
 0x7b5   :  { %v5017_v60 = vmul.f32 0.6931472, %v6554_v59 }
 0x7b6   :  { %v6556_v61 = vpop.eup %6555 }
 0x7b7   :  { %v5020_v62 = vsub.f32 %v4978_v31, %v5017_v60  ;;  %v5019_v63 = vmul.f32 0.6931472, %v6556_v61 }
 0x7b9   :  { %5022 = vst [vmem:[%s7178_s14] sm:$0xff] %v5020_v62  ;;  %v5021_v1 = vsub.f32 %v4979_v36, %v5019_v63 }
 0x7bb   :  { %5023 = vst [vmem:[%s7178_s14 + $0x8] sm:$0xff] %v5021_v1 }
 0x7bc   :  { %5028 = vsyncpa [#allocation3], 1 }
 0x7bd   :  { %5029 = vsyncpa [#allocation5], 1 }
 0x7be   :  { %5030 = vsyncpa [#allocation8], 1 }
 0x7bf   :  { %5031 = vsyncpa [#allocation11], 1 }
 0x7c0   :  { %5032 = vsyncpa [#allocation14], 1 }
 0x7c1   :  { %5033 = vsyncpa [#allocation17], 1 }
 0x7c2   :  { %5034 = vsyncpa [#allocation20], 1 }

</bundles_post_ra>
